<compile_context>
chip_gen: v6e
topology: v6e:2x2x1
jax: 0.10.0
libtpu: 0.0.40
codegen_flags: <defaults>
</compile_context>

<pallas_src>
import collections
import functools

import jax
import jax.numpy as jnp
from jax.experimental import pallas as pl
from jax.experimental.pallas import tpu as pltpu


Config = collections.namedtuple(
    "Config",
    ["n", "h0", "w0", "c0", "kh", "kw",
     "oh1", "ow1", "c1", "oh2", "ow2", "c2",
     "d1", "d2", "nc", "tq"])


# ----------------------------------------------------------------------------
# Fused whole-network kernel.
# Grid: (d1 // tq,) steps over fc1's output columns ("arbitrary"/sequential).
# Activations use a 2-D (rows = H, cols = W*C) layout per batch element,
# batch elements stacked along rows, so every op is a plain 2-D slice/matmul.
# ----------------------------------------------------------------------------
def _fused_network_kernel(
        x_ref,                                  # (N*H0, W0*C0) f32 input
        bd1_ref, sc1_ref, sh1_ref,              # conv1 tap matrices + folded BN
        bd2_ref, sc2_ref, sh2_ref,              # conv2 tap matrices + folded BN
        w1_ref, b1_ref,                         # fc1 tile (OH2, OW2*C2, TQ) bf16
        w2_ref, b2_ref,                         # fc2 tile (TQ, D2) bf16
        w3_ref, b3_ref,                         # fc3 (D2, NC) f32
        o_ref,                                  # (N, NC) f32 output
        a1_ref, act_ref, h2_ref,                # VMEM scratch
        *, cfg):
    c = cfg
    k = pl.program_id(0)

    # -------- step 0: both conv + BN + ReLU blocks, activations stay in VMEM.
    @pl.when(k == 0)
    def _():
        sc1 = sc1_ref[...]          # (1, OW1*C1)
        sh1 = sh1_ref[...]
        sc2 = sc2_ref[...]          # (1, OW2*C2)
        sh2 = sh2_ref[...]
        for n in range(c.n):
            # conv block 1: (H0, W0*C0) -> (OH1, OW1*C1), 9 full-image matmuls.
            acc = jnp.zeros((c.oh1, c.ow1 * c.c1), jnp.float32)
            for t in range(c.kh * c.kw):
                i, j = divmod(t, c.kw)
                patch = x_ref[pl.ds(n * c.h0 + i, c.oh1),
                              pl.ds(j * c.c0, c.ow1 * c.c0)]
                acc = acc + jnp.dot(patch, bd1_ref[t],
                                    preferred_element_type=jnp.float32)
            a1_ref[pl.ds(n * c.oh1, c.oh1), :] = jnp.maximum(
                acc * sc1 + sh1, 0.0)

            # conv block 2: (OH1, OW1*C1) -> (OH2, OW2*C2).
            acc = jnp.zeros((c.oh2, c.ow2 * c.c2), jnp.float32)
            for t in range(c.kh * c.kw):
                i, j = divmod(t, c.kw)
                patch = a1_ref[pl.ds(n * c.oh1 + i, c.oh2),
                               pl.ds(j * c.c1, c.ow2 * c.c1)]
                acc = acc + jnp.dot(patch, bd2_ref[t],
                                    preferred_element_type=jnp.float32)
            act_ref[pl.ds(n * c.oh2, c.oh2), :] = jnp.maximum(
                acc * sc2 + sh2, 0.0)

        h2_ref[...] = jnp.zeros((c.n, c.d2), jnp.float32)

    # -------- every step: fc1 output tile k + its partial fc2 contribution.
    # fc1's (OH2*OW2*C2)-wide contraction is split into OH2 chunks of OW2*C2 so
    # the VMEM-resident activations are consumed without any in-kernel reshape.
    acts = [act_ref[pl.ds(n * c.oh2, c.oh2), :] for n in range(c.n)]
    h1 = b1_ref[...] + jnp.zeros((c.n, c.tq), jnp.float32)
    for r in range(c.oh2):
        lhs = jnp.concatenate([a[r:r + 1, :] for a in acts], axis=0)  # (N, OW2*C2)
        h1 = h1 + jnp.dot(lhs, w1_ref[r].astype(jnp.float32),
                          preferred_element_type=jnp.float32)
    h2_ref[...] += jnp.dot(h1, w2_ref[...].astype(jnp.float32),
                           preferred_element_type=jnp.float32)

    # -------- last step: fc2 bias + fc3, single output store.
    @pl.when(k == pl.num_programs(0) - 1)
    def _():
        h2 = h2_ref[...] + b2_ref[...]
        out = jnp.dot(h2, w3_ref[...],
                      preferred_element_type=jnp.float32) + b3_ref[...]
        o_ref[...] = out.astype(o_ref.dtype)


@functools.partial(jax.jit, static_argnames=("cfg",))
def _forward_impl(x_nchw, arrs, *, cfg):
    c = cfg
    # NCHW -> per-batch (H, W*C) layout, batch stacked along rows.  This is a
    # tiny (8 KB) one-time transform of the INPUT only; all intermediates stay
    # in VMEM inside the single fused kernel.
    x2d = jnp.transpose(x_nchw, (0, 2, 3, 1)).reshape(c.n * c.h0, c.w0 * c.c0)

    kernel = functools.partial(_fused_network_kernel, cfg=c)
    n_tiles = c.d1 // c.tq
    return pl.pallas_call(
        kernel,
        out_shape=jax.ShapeDtypeStruct((c.n, c.nc), jnp.float32),
        grid=(n_tiles,),
        in_specs=[
            pl.BlockSpec((c.n * c.h0, c.w0 * c.c0), lambda k: (0, 0)),
            pl.BlockSpec((c.kh * c.kw, c.ow1 * c.c0, c.ow1 * c.c1),
                         lambda k: (0, 0, 0)),
            pl.BlockSpec((1, c.ow1 * c.c1), lambda k: (0, 0)),
            pl.BlockSpec((1, c.ow1 * c.c1), lambda k: (0, 0)),
            pl.BlockSpec((c.kh * c.kw, c.ow2 * c.c1, c.ow2 * c.c2),
                         lambda k: (0, 0, 0)),
            pl.BlockSpec((1, c.ow2 * c.c2), lambda k: (0, 0)),
            pl.BlockSpec((1, c.ow2 * c.c2), lambda k: (0, 0)),
            pl.BlockSpec((c.oh2, c.ow2 * c.c2, c.tq), lambda k: (0, 0, k)),
            pl.BlockSpec((1, c.tq), lambda k: (0, k)),
            pl.BlockSpec((c.tq, c.d2), lambda k: (k, 0)),
            pl.BlockSpec((1, c.d2), lambda k: (0, 0)),
            pl.BlockSpec((c.d2, c.nc), lambda k: (0, 0)),
            pl.BlockSpec((1, c.nc), lambda k: (0, 0)),
        ],
        out_specs=pl.BlockSpec((c.n, c.nc), lambda k: (0, 0)),
        scratch_shapes=[
            pltpu.VMEM((c.n * c.oh1, c.ow1 * c.c1), jnp.float32),  # conv1 act
            pltpu.VMEM((c.n * c.oh2, c.ow2 * c.c2), jnp.float32),  # conv2 act
            pltpu.VMEM((c.n, c.d2), jnp.float32),                  # fc2 acc
        ],
        compiler_params=pltpu.CompilerParams(
            dimension_semantics=("arbitrary",)),
    )(x2d, arrs["bd1"], arrs["sc1"], arrs["sh1"],
      arrs["bd2"], arrs["sc2"], arrs["sh2"],
      arrs["w1r"], arrs["b1"], arrs["w2"], arrs["b2"],
      arrs["w3"], arrs["b3"])


def network_forward(x_nchw, pparams):
    return _forward_impl(x_nchw, pparams["arrays"], cfg=pparams["cfg"])


# ----------------------------------------------------------------------------
# Parameter setup (deterministic, synthetic) + one-time kernel preprocessing.
# ----------------------------------------------------------------------------
def init_params(key, in_channels, img_hw, num_class,
                out_channels=(8, 8), kernel=(3, 3)):
    blocks = []
    cin = in_channels
    h, w = img_hw
    k = key
    for cout in out_channels:
        k, kw_, kb_, kg_, kbt_, km_, kv_ = jax.random.split(k, 7)
        blocks.append(dict(
            w=0.1 * jax.random.normal(kw_, (kernel[0], kernel[1], cin, cout),
                                      jnp.float32),
            b=0.1 * jax.random.normal(kb_, (cout,), jnp.float32),
            gamma=1.0 + 0.1 * jax.random.normal(kg_, (cout,), jnp.float32),
            beta=0.05 * jax.random.normal(kbt_, (cout,), jnp.float32),
            mean=0.1 * jax.random.normal(km_, (cout,), jnp.float32),
            var=1.0 + 0.1 * jnp.abs(jax.random.normal(kv_, (cout,),
                                                      jnp.float32)),
        ))
        cin = cout
        h, w = h - kernel[0] + 1, w - kernel[1] + 1
    feat = cin * h * w
    k, k1, k1b, k2, k2b, k3, k3b = jax.random.split(k, 7)
    fc = dict(
        # big FC weights stored in bf16 (halves the dominant HBM weight DMA);
        # kernel and reference both upcast the same bf16 values to f32.
        w1=(0.05 * jax.random.normal(k1, (feat, 1024), jnp.float32)
            ).astype(jnp.bfloat16),
        b1=0.05 * jax.random.normal(k1b, (1024,), jnp.float32),
        w2=(0.05 * jax.random.normal(k2, (1024, 256), jnp.float32)
            ).astype(jnp.bfloat16),
        b2=0.05 * jax.random.normal(k2b, (256,), jnp.float32),
        w3=0.05 * jax.random.normal(k3, (256, num_class), jnp.float32),
        b3=0.05 * jax.random.normal(k3b, (num_class,), jnp.float32),
    )
    return dict(blocks=blocks, fc=fc)


def prepare_pallas_params(params, img_size_nchw):
    """One-time preprocessing of the module parameters for the fused kernel:
       - fold conv bias + inference BatchNorm into per-column scale/shift,
       - expand each conv tap into a block-diagonal (OW*Cin, OW*Cout) matrix,
       - fold PyTorch's NCHW flatten order into fc1's weight rows."""
    eps = 1e-5
    n, c0, h, w = img_size_nchw
    assert len(params["blocks"]) == 2
    cin = c0
    convs = []
    kh = kw = None
    for blk in params["blocks"]:
        w_hwio = blk["w"]
        kh, kw, _, cout = w_hwio.shape
        oh, ow = h - kh + 1, w - kw + 1
        scale = blk["gamma"] / jnp.sqrt(blk["var"] + eps)
        shift = blk["beta"] + (blk["b"] - blk["mean"]) * scale
        bd = jnp.stack([jnp.kron(jnp.eye(ow, dtype=jnp.float32), w_hwio[i, j])
                        for i in range(kh) for j in range(kw)])
        convs.append((bd,
                      jnp.tile(scale, ow).reshape(1, ow * cout),
                      jnp.tile(shift, ow).reshape(1, ow * cout)))
        h, w, cin = oh, ow, cout

    oh2, ow2, c2 = h, w, cin
    c1 = params["blocks"][0]["w"].shape[3]
    oh1 = img_size_nchw[2] - kh + 1
    ow1 = img_size_nchw[3] - kw + 1

    fc = params["fc"]
    d1 = fc["w1"].shape[1]
    d2 = fc["w2"].shape[1]
    nc = fc["w3"].shape[1]
    # fc1 rows are in NCHW-flatten order (c, h, w); permute to the kernel's
    # (h, w, c) layout and split per conv-output-row (no in-kernel reshape).
    w1r = jnp.transpose(fc["w1"].reshape(c2, oh2, ow2, d1),
                        (1, 2, 0, 3)).reshape(oh2, ow2 * c2, d1)

    arrs = dict(
        bd1=convs[0][0], sc1=convs[0][1], sh1=convs[0][2],
        bd2=convs[1][0], sc2=convs[1][1], sh2=convs[1][2],
        w1r=w1r, b1=fc["b1"].reshape(1, d1),
        w2=fc["w2"], b2=fc["b2"].reshape(1, d2),
        w3=fc["w3"], b3=fc["b3"].reshape(1, nc),
    )
    tq = 256
    assert d1 % tq == 0
    cfg = Config(n=n, h0=img_size_nchw[2], w0=img_size_nchw[3], c0=c0,
                 kh=kh, kw=kw, oh1=oh1, ow1=ow1, c1=c1,
                 oh2=oh2, ow2=ow2, c2=c2, d1=d1, d2=d2, nc=nc, tq=tq)
    return dict(arrays=arrs, cfg=cfg)


# ----------------------------------------------------------------------------
# Pure-JAX reference (PyTorch semantics) for validation.
# ----------------------------------------------------------------------------
def reference_forward(x_nchw, params):
    eps = 1e-5
    x = x_nchw
    for blk in params["blocks"]:
        w_oihw = jnp.transpose(blk["w"], (3, 2, 0, 1))
        y = jax.lax.conv_general_dilated(
            x, w_oihw, window_strides=(1, 1), padding="VALID",
            dimension_numbers=("NCHW", "OIHW", "NCHW"))
        y = y + blk["b"][None, :, None, None]
        y = (y - blk["mean"][None, :, None, None]) / jnp.sqrt(
            blk["var"][None, :, None, None] + eps)
        y = y * blk["gamma"][None, :, None, None] + blk["beta"][None, :, None, None]
        x = jnp.maximum(y, 0.0)
    x = x.reshape(x.shape[0], -1)
    fc = params["fc"]
    x = x @ fc["w1"].astype(jnp.float32) + fc["b1"]
    x = x @ fc["w2"].astype(jnp.float32) + fc["b2"]
    x = x @ fc["w3"] + fc["b3"]
    return x


if __name__ == "__main__":
    key = jax.random.PRNGKey(0)
    kx, kp = jax.random.split(key)

    N, C, H, W = 2, 4, 16, 16
    NUM_CLASS = 10

    x = jax.random.normal(kx, (N, C, H, W), jnp.float32)
    params = init_params(kp, C, (H, W), NUM_CLASS)
    pparams = prepare_pallas_params(params, (N, C, H, W))

    out = network_forward(x, pparams)
    out = jax.block_until_ready(out)

    ref = reference_forward(x, params)
    assert out.shape == (N, NUM_CLASS), out.shape
    if not jnp.allclose(out, ref, rtol=2e-3, atol=2e-3):
        raise AssertionError("Pallas output does not match JAX reference")

    print("KERNEL_OK")
</pallas_src>

<mosaic_0001>
module attributes {stable_mosaic.version = 11 : i64} {
  func.func @_fused_network_kernel(%arg0: i32, %arg1: memref<32x64xf32, #tpu.memory_space<vmem>>, %arg2: memref<9x56x112xf32, #tpu.memory_space<vmem>>, %arg3: memref<1x112xf32, #tpu.memory_space<vmem>>, %arg4: memref<1x112xf32, #tpu.memory_space<vmem>>, %arg5: memref<9x96x96xf32, #tpu.memory_space<vmem>>, %arg6: memref<1x96xf32, #tpu.memory_space<vmem>>, %arg7: memref<1x96xf32, #tpu.memory_space<vmem>>, %arg8: memref<12x96x256xbf16, #tpu.memory_space<vmem>>, %arg9: memref<1x256xf32, #tpu.memory_space<vmem>>, %arg10: memref<256x256xbf16, #tpu.memory_space<vmem>>, %arg11: memref<1x256xf32, #tpu.memory_space<vmem>>, %arg12: memref<256x10xf32, #tpu.memory_space<vmem>>, %arg13: memref<1x10xf32, #tpu.memory_space<vmem>>, %arg14: memref<2x10xf32, #tpu.memory_space<vmem>>, %arg15: memref<28x112xf32, #tpu.memory_space<vmem>>, %arg16: memref<24x96xf32, #tpu.memory_space<vmem>>, %arg17: memref<2x256xf32, #tpu.memory_space<vmem>>) attributes {dimension_semantics = [#tpu.dimension_semantics<arbitrary>], iteration_bounds = array<i64: 4>, scalar_prefetch = 0 : i64, scratch_operands = 3 : i64, tpu.core_type = #tpu.core_type<tc>, window_params = [{pipeline_mode = #tpu.pipeline_mode<synchronous>, transform_indices = @transform_0, window_bounds = array<i64: 32, 64>}, {pipeline_mode = #tpu.pipeline_mode<synchronous>, transform_indices = @transform_1, window_bounds = array<i64: 9, 56, 112>}, {pipeline_mode = #tpu.pipeline_mode<synchronous>, transform_indices = @transform_2, window_bounds = array<i64: 1, 112>}, {pipeline_mode = #tpu.pipeline_mode<synchronous>, transform_indices = @transform_3, window_bounds = array<i64: 1, 112>}, {pipeline_mode = #tpu.pipeline_mode<synchronous>, transform_indices = @transform_4, window_bounds = array<i64: 9, 96, 96>}, {pipeline_mode = #tpu.pipeline_mode<synchronous>, transform_indices = @transform_5, window_bounds = array<i64: 1, 96>}, {pipeline_mode = #tpu.pipeline_mode<synchronous>, transform_indices = @transform_6, window_bounds = array<i64: 1, 96>}, {transform_indices = @transform_7, window_bounds = array<i64: 12, 96, 256>}, {transform_indices = @transform_8, window_bounds = array<i64: 1, 256>}, {transform_indices = @transform_9, window_bounds = array<i64: 256, 256>}, {pipeline_mode = #tpu.pipeline_mode<synchronous>, transform_indices = @transform_10, window_bounds = array<i64: 1, 256>}, {pipeline_mode = #tpu.pipeline_mode<synchronous>, transform_indices = @transform_11, window_bounds = array<i64: 256, 10>}, {pipeline_mode = #tpu.pipeline_mode<synchronous>, transform_indices = @transform_12, window_bounds = array<i64: 1, 10>}, {pipeline_mode = #tpu.pipeline_mode<synchronous>, transform_indices = @transform_13, window_bounds = array<i64: 2, 10>}]} {
    %c0_i32 = arith.constant 0 : i32
    %0 = arith.cmpi eq, %arg0, %c0_i32 : i32
    %1 = arith.extui %0 : i1 to i32
    %c0_i32_0 = arith.constant 0 : i32
    %2 = arith.cmpi ne, %1, %c0_i32_0 : i32
    scf.if %2 {
      %c0_50 = arith.constant 0 : index
      %c0_51 = arith.constant 0 : index
      %114 = vector.load %arg3[%c0_50, %c0_51] : memref<1x112xf32, #tpu.memory_space<vmem>>, vector<1x112xf32>
      %c0_52 = arith.constant 0 : index
      %c0_53 = arith.constant 0 : index
      %115 = vector.load %arg4[%c0_52, %c0_53] : memref<1x112xf32, #tpu.memory_space<vmem>>, vector<1x112xf32>
      %c0_54 = arith.constant 0 : index
      %c0_55 = arith.constant 0 : index
      %116 = vector.load %arg6[%c0_54, %c0_55] : memref<1x96xf32, #tpu.memory_space<vmem>>, vector<1x96xf32>
      %c0_56 = arith.constant 0 : index
      %c0_57 = arith.constant 0 : index
      %117 = vector.load %arg7[%c0_56, %c0_57] : memref<1x96xf32, #tpu.memory_space<vmem>>, vector<1x96xf32>
      %cst_58 = arith.constant 0.000000e+00 : f32
      %118 = vector.broadcast %cst_58 : f32 to vector<14x112xf32>
      %c0_59 = arith.constant 0 : index
      %c0_60 = arith.constant 0 : index
      %119 = vector.load %arg1[%c0_59, %c0_60] : memref<32x64xf32, #tpu.memory_space<vmem>>, vector<14x56xf32>
      %c0_61 = arith.constant 0 : index
      %c0_62 = arith.constant 0 : index
      %c0_63 = arith.constant 0 : index
      %120 = vector.load %arg2[%c0_61, %c0_62, %c0_63] : memref<9x56x112xf32, #tpu.memory_space<vmem>>, vector<1x56x112xf32>
      %121 = vector.shape_cast %120 : vector<1x56x112xf32> to vector<56x112xf32>
      %cst_64 = arith.constant dense<0.000000e+00> : vector<14x112xf32>
      %122 = tpu.matmul %119, %121, %cst_64 {dimension_numbers = #tpu.dot_dimension_numbers<[1], [0], [0], [1], [0, 0, 1, 1], [], []>} : vector<14x56xf32>, vector<56x112xf32>, vector<14x112xf32> -> vector<14x112xf32>
      %123 = arith.addf %118, %122 : vector<14x112xf32>
      %c0_65 = arith.constant 0 : index
      %c4_66 = arith.constant 4 : index
      %124 = vector.load %arg1[%c0_65, %c4_66] : memref<32x64xf32, #tpu.memory_space<vmem>>, vector<14x56xf32>
      %c1_67 = arith.constant 1 : index
      %c0_68 = arith.constant 0 : index
      %c0_69 = arith.constant 0 : index
      %125 = vector.load %arg2[%c1_67, %c0_68, %c0_69] : memref<9x56x112xf32, #tpu.memory_space<vmem>>, vector<1x56x112xf32>
      %126 = vector.shape_cast %125 : vector<1x56x112xf32> to vector<56x112xf32>
      %cst_70 = arith.constant dense<0.000000e+00> : vector<14x112xf32>
      %127 = tpu.matmul %124, %126, %cst_70 {dimension_numbers = #tpu.dot_dimension_numbers<[1], [0], [0], [1], [0, 0, 1, 1], [], []>} : vector<14x56xf32>, vector<56x112xf32>, vector<14x112xf32> -> vector<14x112xf32>
      %128 = arith.addf %123, %127 : vector<14x112xf32>
      %c0_71 = arith.constant 0 : index
      %c8_72 = arith.constant 8 : index
      %129 = vector.load %arg1[%c0_71, %c8_72] : memref<32x64xf32, #tpu.memory_space<vmem>>, vector<14x56xf32>
      %c2_73 = arith.constant 2 : index
      %c0_74 = arith.constant 0 : index
      %c0_75 = arith.constant 0 : index
      %130 = vector.load %arg2[%c2_73, %c0_74, %c0_75] : memref<9x56x112xf32, #tpu.memory_space<vmem>>, vector<1x56x112xf32>
      %131 = vector.shape_cast %130 : vector<1x56x112xf32> to vector<56x112xf32>
      %cst_76 = arith.constant dense<0.000000e+00> : vector<14x112xf32>
      %132 = tpu.matmul %129, %131, %cst_76 {dimension_numbers = #tpu.dot_dimension_numbers<[1], [0], [0], [1], [0, 0, 1, 1], [], []>} : vector<14x56xf32>, vector<56x112xf32>, vector<14x112xf32> -> vector<14x112xf32>
      %133 = arith.addf %128, %132 : vector<14x112xf32>
      %c1_77 = arith.constant 1 : index
      %c0_78 = arith.constant 0 : index
      %134 = vector.load %arg1[%c1_77, %c0_78] : memref<32x64xf32, #tpu.memory_space<vmem>>, vector<14x56xf32>
      %c3_79 = arith.constant 3 : index
      %c0_80 = arith.constant 0 : index
      %c0_81 = arith.constant 0 : index
      %135 = vector.load %arg2[%c3_79, %c0_80, %c0_81] : memref<9x56x112xf32, #tpu.memory_space<vmem>>, vector<1x56x112xf32>
      %136 = vector.shape_cast %135 : vector<1x56x112xf32> to vector<56x112xf32>
      %cst_82 = arith.constant dense<0.000000e+00> : vector<14x112xf32>
      %137 = tpu.matmul %134, %136, %cst_82 {dimension_numbers = #tpu.dot_dimension_numbers<[1], [0], [0], [1], [0, 0, 1, 1], [], []>} : vector<14x56xf32>, vector<56x112xf32>, vector<14x112xf32> -> vector<14x112xf32>
      %138 = arith.addf %133, %137 : vector<14x112xf32>
      %c1_83 = arith.constant 1 : index
      %c4_84 = arith.constant 4 : index
      %139 = vector.load %arg1[%c1_83, %c4_84] : memref<32x64xf32, #tpu.memory_space<vmem>>, vector<14x56xf32>
      %c4_85 = arith.constant 4 : index
      %c0_86 = arith.constant 0 : index
      %c0_87 = arith.constant 0 : index
      %140 = vector.load %arg2[%c4_85, %c0_86, %c0_87] : memref<9x56x112xf32, #tpu.memory_space<vmem>>, vector<1x56x112xf32>
      %141 = vector.shape_cast %140 : vector<1x56x112xf32> to vector<56x112xf32>
      %cst_88 = arith.constant dense<0.000000e+00> : vector<14x112xf32>
      %142 = tpu.matmul %139, %141, %cst_88 {dimension_numbers = #tpu.dot_dimension_numbers<[1], [0], [0], [1], [0, 0, 1, 1], [], []>} : vector<14x56xf32>, vector<56x112xf32>, vector<14x112xf32> -> vector<14x112xf32>
      %143 = arith.addf %138, %142 : vector<14x112xf32>
      %c1_89 = arith.constant 1 : index
      %c8_90 = arith.constant 8 : index
      %144 = vector.load %arg1[%c1_89, %c8_90] : memref<32x64xf32, #tpu.memory_space<vmem>>, vector<14x56xf32>
      %c5_91 = arith.constant 5 : index
      %c0_92 = arith.constant 0 : index
      %c0_93 = arith.constant 0 : index
      %145 = vector.load %arg2[%c5_91, %c0_92, %c0_93] : memref<9x56x112xf32, #tpu.memory_space<vmem>>, vector<1x56x112xf32>
      %146 = vector.shape_cast %145 : vector<1x56x112xf32> to vector<56x112xf32>
      %cst_94 = arith.constant dense<0.000000e+00> : vector<14x112xf32>
      %147 = tpu.matmul %144, %146, %cst_94 {dimension_numbers = #tpu.dot_dimension_numbers<[1], [0], [0], [1], [0, 0, 1, 1], [], []>} : vector<14x56xf32>, vector<56x112xf32>, vector<14x112xf32> -> vector<14x112xf32>
      %148 = arith.addf %143, %147 : vector<14x112xf32>
      %c2_95 = arith.constant 2 : index
      %c0_96 = arith.constant 0 : index
      %149 = vector.load %arg1[%c2_95, %c0_96] : memref<32x64xf32, #tpu.memory_space<vmem>>, vector<14x56xf32>
      %c6_97 = arith.constant 6 : index
      %c0_98 = arith.constant 0 : index
      %c0_99 = arith.constant 0 : index
      %150 = vector.load %arg2[%c6_97, %c0_98, %c0_99] : memref<9x56x112xf32, #tpu.memory_space<vmem>>, vector<1x56x112xf32>
      %151 = vector.shape_cast %150 : vector<1x56x112xf32> to vector<56x112xf32>
      %cst_100 = arith.constant dense<0.000000e+00> : vector<14x112xf32>
      %152 = tpu.matmul %149, %151, %cst_100 {dimension_numbers = #tpu.dot_dimension_numbers<[1], [0], [0], [1], [0, 0, 1, 1], [], []>} : vector<14x56xf32>, vector<56x112xf32>, vector<14x112xf32> -> vector<14x112xf32>
      %153 = arith.addf %148, %152 : vector<14x112xf32>
      %c2_101 = arith.constant 2 : index
      %c4_102 = arith.constant 4 : index
      %154 = vector.load %arg1[%c2_101, %c4_102] : memref<32x64xf32, #tpu.memory_space<vmem>>, vector<14x56xf32>
      %c7_103 = arith.constant 7 : index
      %c0_104 = arith.constant 0 : index
      %c0_105 = arith.constant 0 : index
      %155 = vector.load %arg2[%c7_103, %c0_104, %c0_105] : memref<9x56x112xf32, #tpu.memory_space<vmem>>, vector<1x56x112xf32>
      %156 = vector.shape_cast %155 : vector<1x56x112xf32> to vector<56x112xf32>
      %cst_106 = arith.constant dense<0.000000e+00> : vector<14x112xf32>
      %157 = tpu.matmul %154, %156, %cst_106 {dimension_numbers = #tpu.dot_dimension_numbers<[1], [0], [0], [1], [0, 0, 1, 1], [], []>} : vector<14x56xf32>, vector<56x112xf32>, vector<14x112xf32> -> vector<14x112xf32>
      %158 = arith.addf %153, %157 : vector<14x112xf32>
      %c2_107 = arith.constant 2 : index
      %c8_108 = arith.constant 8 : index
      %159 = vector.load %arg1[%c2_107, %c8_108] : memref<32x64xf32, #tpu.memory_space<vmem>>, vector<14x56xf32>
      %c8_109 = arith.constant 8 : index
      %c0_110 = arith.constant 0 : index
      %c0_111 = arith.constant 0 : index
      %160 = vector.load %arg2[%c8_109, %c0_110, %c0_111] : memref<9x56x112xf32, #tpu.memory_space<vmem>>, vector<1x56x112xf32>
      %161 = vector.shape_cast %160 : vector<1x56x112xf32> to vector<56x112xf32>
      %cst_112 = arith.constant dense<0.000000e+00> : vector<14x112xf32>
      %162 = tpu.matmul %159, %161, %cst_112 {dimension_numbers = #tpu.dot_dimension_numbers<[1], [0], [0], [1], [0, 0, 1, 1], [], []>} : vector<14x56xf32>, vector<56x112xf32>, vector<14x112xf32> -> vector<14x112xf32>
      %163 = arith.addf %158, %162 : vector<14x112xf32>
      %164 = vector.broadcast %114 : vector<1x112xf32> to vector<14x112xf32>
      %165 = arith.mulf %163, %164 : vector<14x112xf32>
      %166 = vector.broadcast %115 : vector<1x112xf32> to vector<14x112xf32>
      %167 = arith.addf %165, %166 : vector<14x112xf32>
      %cst_113 = arith.constant 0.000000e+00 : f32
      %168 = vector.broadcast %cst_113 : f32 to vector<14x112xf32>
      %169 = arith.maximumf %167, %168 : vector<14x112xf32>
      %c0_114 = arith.constant 0 : index
      %c0_115 = arith.constant 0 : index
      %170 = vector.load %arg15[%c0_114, %c0_115] : memref<28x112xf32, #tpu.memory_space<vmem>>, vector<14x112xf32>
      tpu.vector_store %arg15[%c0_114, %c0_115], %169 {strides = array<i32>} : memref<28x112xf32, #tpu.memory_space<vmem>>, vector<14x112xf32>,
      %cst_116 = arith.constant 0.000000e+00 : f32
      %171 = vector.broadcast %cst_116 : f32 to vector<12x96xf32>
      %c0_117 = arith.constant 0 : index
      %c0_118 = arith.constant 0 : index
      %172 = vector.load %arg15[%c0_117, %c0_118] : memref<28x112xf32, #tpu.memory_space<vmem>>, vector<12x96xf32>
      %c0_119 = arith.constant 0 : index
      %c0_120 = arith.constant 0 : index
      %c0_121 = arith.constant 0 : index
      %173 = vector.load %arg5[%c0_119, %c0_120, %c0_121] : memref<9x96x96xf32, #tpu.memory_space<vmem>>, vector<1x96x96xf32>
      %174 = vector.shape_cast %173 : vector<1x96x96xf32> to vector<96x96xf32>
      %cst_122 = arith.constant dense<0.000000e+00> : vector<12x96xf32>
      %175 = tpu.matmul %172, %174, %cst_122 {dimension_numbers = #tpu.dot_dimension_numbers<[1], [0], [0], [1], [0, 0, 1, 1], [], []>} : vector<12x96xf32>, vector<96x96xf32>, vector<12x96xf32> -> vector<12x96xf32>
      %176 = arith.addf %171, %175 : vector<12x96xf32>
      %c0_123 = arith.constant 0 : index
      %c8_124 = arith.constant 8 : index
      %177 = vector.load %arg15[%c0_123, %c8_124] : memref<28x112xf32, #tpu.memory_space<vmem>>, vector<12x96xf32>
      %c1_125 = arith.constant 1 : index
      %c0_126 = arith.constant 0 : index
      %c0_127 = arith.constant 0 : index
      %178 = vector.load %arg5[%c1_125, %c0_126, %c0_127] : memref<9x96x96xf32, #tpu.memory_space<vmem>>, vector<1x96x96xf32>
      %179 = vector.shape_cast %178 : vector<1x96x96xf32> to vector<96x96xf32>
      %cst_128 = arith.constant dense<0.000000e+00> : vector<12x96xf32>
      %180 = tpu.matmul %177, %179, %cst_128 {dimension_numbers = #tpu.dot_dimension_numbers<[1], [0], [0], [1], [0, 0, 1, 1], [], []>} : vector<12x96xf32>, vector<96x96xf32>, vector<12x96xf32> -> vector<12x96xf32>
      %181 = arith.addf %176, %180 : vector<12x96xf32>
      %c0_129 = arith.constant 0 : index
      %c16 = arith.constant 16 : index
      %182 = vector.load %arg15[%c0_129, %c16] : memref<28x112xf32, #tpu.memory_space<vmem>>, vector<12x96xf32>
      %c2_130 = arith.constant 2 : index
      %c0_131 = arith.constant 0 : index
      %c0_132 = arith.constant 0 : index
      %183 = vector.load %arg5[%c2_130, %c0_131, %c0_132] : memref<9x96x96xf32, #tpu.memory_space<vmem>>, vector<1x96x96xf32>
      %184 = vector.shape_cast %183 : vector<1x96x96xf32> to vector<96x96xf32>
      %cst_133 = arith.constant dense<0.000000e+00> : vector<12x96xf32>
      %185 = tpu.matmul %182, %184, %cst_133 {dimension_numbers = #tpu.dot_dimension_numbers<[1], [0], [0], [1], [0, 0, 1, 1], [], []>} : vector<12x96xf32>, vector<96x96xf32>, vector<12x96xf32> -> vector<12x96xf32>
      %186 = arith.addf %181, %185 : vector<12x96xf32>
      %c1_134 = arith.constant 1 : index
      %c0_135 = arith.constant 0 : index
      %187 = vector.load %arg15[%c1_134, %c0_135] : memref<28x112xf32, #tpu.memory_space<vmem>>, vector<12x96xf32>
      %c3_136 = arith.constant 3 : index
      %c0_137 = arith.constant 0 : index
      %c0_138 = arith.constant 0 : index
      %188 = vector.load %arg5[%c3_136, %c0_137, %c0_138] : memref<9x96x96xf32, #tpu.memory_space<vmem>>, vector<1x96x96xf32>
      %189 = vector.shape_cast %188 : vector<1x96x96xf32> to vector<96x96xf32>
      %cst_139 = arith.constant dense<0.000000e+00> : vector<12x96xf32>
      %190 = tpu.matmul %187, %189, %cst_139 {dimension_numbers = #tpu.dot_dimension_numbers<[1], [0], [0], [1], [0, 0, 1, 1], [], []>} : vector<12x96xf32>, vector<96x96xf32>, vector<12x96xf32> -> vector<12x96xf32>
      %191 = arith.addf %186, %190 : vector<12x96xf32>
      %c1_140 = arith.constant 1 : index
      %c8_141 = arith.constant 8 : index
      %192 = vector.load %arg15[%c1_140, %c8_141] : memref<28x112xf32, #tpu.memory_space<vmem>>, vector<12x96xf32>
      %c4_142 = arith.constant 4 : index
      %c0_143 = arith.constant 0 : index
      %c0_144 = arith.constant 0 : index
      %193 = vector.load %arg5[%c4_142, %c0_143, %c0_144] : memref<9x96x96xf32, #tpu.memory_space<vmem>>, vector<1x96x96xf32>
      %194 = vector.shape_cast %193 : vector<1x96x96xf32> to vector<96x96xf32>
      %cst_145 = arith.constant dense<0.000000e+00> : vector<12x96xf32>
      %195 = tpu.matmul %192, %194, %cst_145 {dimension_numbers = #tpu.dot_dimension_numbers<[1], [0], [0], [1], [0, 0, 1, 1], [], []>} : vector<12x96xf32>, vector<96x96xf32>, vector<12x96xf32> -> vector<12x96xf32>
      %196 = arith.addf %191, %195 : vector<12x96xf32>
      %c1_146 = arith.constant 1 : index
      %c16_147 = arith.constant 16 : index
      %197 = vector.load %arg15[%c1_146, %c16_147] : memref<28x112xf32, #tpu.memory_space<vmem>>, vector<12x96xf32>
      %c5_148 = arith.constant 5 : index
      %c0_149 = arith.constant 0 : index
      %c0_150 = arith.constant 0 : index
      %198 = vector.load %arg5[%c5_148, %c0_149, %c0_150] : memref<9x96x96xf32, #tpu.memory_space<vmem>>, vector<1x96x96xf32>
      %199 = vector.shape_cast %198 : vector<1x96x96xf32> to vector<96x96xf32>
      %cst_151 = arith.constant dense<0.000000e+00> : vector<12x96xf32>
      %200 = tpu.matmul %197, %199, %cst_151 {dimension_numbers = #tpu.dot_dimension_numbers<[1], [0], [0], [1], [0, 0, 1, 1], [], []>} : vector<12x96xf32>, vector<96x96xf32>, vector<12x96xf32> -> vector<12x96xf32>
      %201 = arith.addf %196, %200 : vector<12x96xf32>
      %c2_152 = arith.constant 2 : index
      %c0_153 = arith.constant 0 : index
      %202 = vector.load %arg15[%c2_152, %c0_153] : memref<28x112xf32, #tpu.memory_space<vmem>>, vector<12x96xf32>
      %c6_154 = arith.constant 6 : index
      %c0_155 = arith.constant 0 : index
      %c0_156 = arith.constant 0 : index
      %203 = vector.load %arg5[%c6_154, %c0_155, %c0_156] : memref<9x96x96xf32, #tpu.memory_space<vmem>>, vector<1x96x96xf32>
      %204 = vector.shape_cast %203 : vector<1x96x96xf32> to vector<96x96xf32>
      %cst_157 = arith.constant dense<0.000000e+00> : vector<12x96xf32>
      %205 = tpu.matmul %202, %204, %cst_157 {dimension_numbers = #tpu.dot_dimension_numbers<[1], [0], [0], [1], [0, 0, 1, 1], [], []>} : vector<12x96xf32>, vector<96x96xf32>, vector<12x96xf32> -> vector<12x96xf32>
      %206 = arith.addf %201, %205 : vector<12x96xf32>
      %c2_158 = arith.constant 2 : index
      %c8_159 = arith.constant 8 : index
      %207 = vector.load %arg15[%c2_158, %c8_159] : memref<28x112xf32, #tpu.memory_space<vmem>>, vector<12x96xf32>
      %c7_160 = arith.constant 7 : index
      %c0_161 = arith.constant 0 : index
      %c0_162 = arith.constant 0 : index
      %208 = vector.load %arg5[%c7_160, %c0_161, %c0_162] : memref<9x96x96xf32, #tpu.memory_space<vmem>>, vector<1x96x96xf32>
      %209 = vector.shape_cast %208 : vector<1x96x96xf32> to vector<96x96xf32>
      %cst_163 = arith.constant dense<0.000000e+00> : vector<12x96xf32>
      %210 = tpu.matmul %207, %209, %cst_163 {dimension_numbers = #tpu.dot_dimension_numbers<[1], [0], [0], [1], [0, 0, 1, 1], [], []>} : vector<12x96xf32>, vector<96x96xf32>, vector<12x96xf32> -> vector<12x96xf32>
      %211 = arith.addf %206, %210 : vector<12x96xf32>
      %c2_164 = arith.constant 2 : index
      %c16_165 = arith.constant 16 : index
      %212 = vector.load %arg15[%c2_164, %c16_165] : memref<28x112xf32, #tpu.memory_space<vmem>>, vector<12x96xf32>
      %c8_166 = arith.constant 8 : index
      %c0_167 = arith.constant 0 : index
      %c0_168 = arith.constant 0 : index
      %213 = vector.load %arg5[%c8_166, %c0_167, %c0_168] : memref<9x96x96xf32, #tpu.memory_space<vmem>>, vector<1x96x96xf32>
      %214 = vector.shape_cast %213 : vector<1x96x96xf32> to vector<96x96xf32>
      %cst_169 = arith.constant dense<0.000000e+00> : vector<12x96xf32>
      %215 = tpu.matmul %212, %214, %cst_169 {dimension_numbers = #tpu.dot_dimension_numbers<[1], [0], [0], [1], [0, 0, 1, 1], [], []>} : vector<12x96xf32>, vector<96x96xf32>, vector<12x96xf32> -> vector<12x96xf32>
      %216 = arith.addf %211, %215 : vector<12x96xf32>
      %217 = vector.broadcast %116 : vector<1x96xf32> to vector<12x96xf32>
      %218 = arith.mulf %216, %217 : vector<12x96xf32>
      %219 = vector.broadcast %117 : vector<1x96xf32> to vector<12x96xf32>
      %220 = arith.addf %218, %219 : vector<12x96xf32>
      %cst_170 = arith.constant 0.000000e+00 : f32
      %221 = vector.broadcast %cst_170 : f32 to vector<12x96xf32>
      %222 = arith.maximumf %220, %221 : vector<12x96xf32>
      %c0_171 = arith.constant 0 : index
      %c0_172 = arith.constant 0 : index
      %223 = vector.load %arg16[%c0_171, %c0_172] : memref<24x96xf32, #tpu.memory_space<vmem>>, vector<12x96xf32>
      tpu.vector_store %arg16[%c0_171, %c0_172], %222 {strides = array<i32>} : memref<24x96xf32, #tpu.memory_space<vmem>>, vector<12x96xf32>,
      %cst_173 = arith.constant 0.000000e+00 : f32
      %224 = vector.broadcast %cst_173 : f32 to vector<14x112xf32>
      %c16_174 = arith.constant 16 : index
      %c0_175 = arith.constant 0 : index
      %225 = vector.load %arg1[%c16_174, %c0_175] : memref<32x64xf32, #tpu.memory_space<vmem>>, vector<14x56xf32>
      %c0_176 = arith.constant 0 : index
      %c0_177 = arith.constant 0 : index
      %c0_178 = arith.constant 0 : index
      %226 = vector.load %arg2[%c0_176, %c0_177, %c0_178] : memref<9x56x112xf32, #tpu.memory_space<vmem>>, vector<1x56x112xf32>
      %227 = vector.shape_cast %226 : vector<1x56x112xf32> to vector<56x112xf32>
      %cst_179 = arith.constant dense<0.000000e+00> : vector<14x112xf32>
      %228 = tpu.matmul %225, %227, %cst_179 {dimension_numbers = #tpu.dot_dimension_numbers<[1], [0], [0], [1], [0, 0, 1, 1], [], []>} : vector<14x56xf32>, vector<56x112xf32>, vector<14x112xf32> -> vector<14x112xf32>
      %229 = arith.addf %224, %228 : vector<14x112xf32>
      %c16_180 = arith.constant 16 : index
      %c4_181 = arith.constant 4 : index
      %230 = vector.load %arg1[%c16_180, %c4_181] : memref<32x64xf32, #tpu.memory_space<vmem>>, vector<14x56xf32>
      %c1_182 = arith.constant 1 : index
      %c0_183 = arith.constant 0 : index
      %c0_184 = arith.constant 0 : index
      %231 = vector.load %arg2[%c1_182, %c0_183, %c0_184] : memref<9x56x112xf32, #tpu.memory_space<vmem>>, vector<1x56x112xf32>
      %232 = vector.shape_cast %231 : vector<1x56x112xf32> to vector<56x112xf32>
      %cst_185 = arith.constant dense<0.000000e+00> : vector<14x112xf32>
      %233 = tpu.matmul %230, %232, %cst_185 {dimension_numbers = #tpu.dot_dimension_numbers<[1], [0], [0], [1], [0, 0, 1, 1], [], []>} : vector<14x56xf32>, vector<56x112xf32>, vector<14x112xf32> -> vector<14x112xf32>
      %234 = arith.addf %229, %233 : vector<14x112xf32>
      %c16_186 = arith.constant 16 : index
      %c8_187 = arith.constant 8 : index
      %235 = vector.load %arg1[%c16_186, %c8_187] : memref<32x64xf32, #tpu.memory_space<vmem>>, vector<14x56xf32>
      %c2_188 = arith.constant 2 : index
      %c0_189 = arith.constant 0 : index
      %c0_190 = arith.constant 0 : index
      %236 = vector.load %arg2[%c2_188, %c0_189, %c0_190] : memref<9x56x112xf32, #tpu.memory_space<vmem>>, vector<1x56x112xf32>
      %237 = vector.shape_cast %236 : vector<1x56x112xf32> to vector<56x112xf32>
      %cst_191 = arith.constant dense<0.000000e+00> : vector<14x112xf32>
      %238 = tpu.matmul %235, %237, %cst_191 {dimension_numbers = #tpu.dot_dimension_numbers<[1], [0], [0], [1], [0, 0, 1, 1], [], []>} : vector<14x56xf32>, vector<56x112xf32>, vector<14x112xf32> -> vector<14x112xf32>
      %239 = arith.addf %234, %238 : vector<14x112xf32>
      %c17 = arith.constant 17 : index
      %c0_192 = arith.constant 0 : index
      %240 = vector.load %arg1[%c17, %c0_192] : memref<32x64xf32, #tpu.memory_space<vmem>>, vector<14x56xf32>
      %c3_193 = arith.constant 3 : index
      %c0_194 = arith.constant 0 : index
      %c0_195 = arith.constant 0 : index
      %241 = vector.load %arg2[%c3_193, %c0_194, %c0_195] : memref<9x56x112xf32, #tpu.memory_space<vmem>>, vector<1x56x112xf32>
      %242 = vector.shape_cast %241 : vector<1x56x112xf32> to vector<56x112xf32>
      %cst_196 = arith.constant dense<0.000000e+00> : vector<14x112xf32>
      %243 = tpu.matmul %240, %242, %cst_196 {dimension_numbers = #tpu.dot_dimension_numbers<[1], [0], [0], [1], [0, 0, 1, 1], [], []>} : vector<14x56xf32>, vector<56x112xf32>, vector<14x112xf32> -> vector<14x112xf32>
      %244 = arith.addf %239, %243 : vector<14x112xf32>
      %c17_197 = arith.constant 17 : index
      %c4_198 = arith.constant 4 : index
      %245 = vector.load %arg1[%c17_197, %c4_198] : memref<32x64xf32, #tpu.memory_space<vmem>>, vector<14x56xf32>
      %c4_199 = arith.constant 4 : index
      %c0_200 = arith.constant 0 : index
      %c0_201 = arith.constant 0 : index
      %246 = vector.load %arg2[%c4_199, %c0_200, %c0_201] : memref<9x56x112xf32, #tpu.memory_space<vmem>>, vector<1x56x112xf32>
      %247 = vector.shape_cast %246 : vector<1x56x112xf32> to vector<56x112xf32>
      %cst_202 = arith.constant dense<0.000000e+00> : vector<14x112xf32>
      %248 = tpu.matmul %245, %247, %cst_202 {dimension_numbers = #tpu.dot_dimension_numbers<[1], [0], [0], [1], [0, 0, 1, 1], [], []>} : vector<14x56xf32>, vector<56x112xf32>, vector<14x112xf32> -> vector<14x112xf32>
      %249 = arith.addf %244, %248 : vector<14x112xf32>
      %c17_203 = arith.constant 17 : index
      %c8_204 = arith.constant 8 : index
      %250 = vector.load %arg1[%c17_203, %c8_204] : memref<32x64xf32, #tpu.memory_space<vmem>>, vector<14x56xf32>
      %c5_205 = arith.constant 5 : index
      %c0_206 = arith.constant 0 : index
      %c0_207 = arith.constant 0 : index
      %251 = vector.load %arg2[%c5_205, %c0_206, %c0_207] : memref<9x56x112xf32, #tpu.memory_space<vmem>>, vector<1x56x112xf32>
      %252 = vector.shape_cast %251 : vector<1x56x112xf32> to vector<56x112xf32>
      %cst_208 = arith.constant dense<0.000000e+00> : vector<14x112xf32>
      %253 = tpu.matmul %250, %252, %cst_208 {dimension_numbers = #tpu.dot_dimension_numbers<[1], [0], [0], [1], [0, 0, 1, 1], [], []>} : vector<14x56xf32>, vector<56x112xf32>, vector<14x112xf32> -> vector<14x112xf32>
      %254 = arith.addf %249, %253 : vector<14x112xf32>
      %c18 = arith.constant 18 : index
      %c0_209 = arith.constant 0 : index
      %255 = vector.load %arg1[%c18, %c0_209] : memref<32x64xf32, #tpu.memory_space<vmem>>, vector<14x56xf32>
      %c6_210 = arith.constant 6 : index
      %c0_211 = arith.constant 0 : index
      %c0_212 = arith.constant 0 : index
      %256 = vector.load %arg2[%c6_210, %c0_211, %c0_212] : memref<9x56x112xf32, #tpu.memory_space<vmem>>, vector<1x56x112xf32>
      %257 = vector.shape_cast %256 : vector<1x56x112xf32> to vector<56x112xf32>
      %cst_213 = arith.constant dense<0.000000e+00> : vector<14x112xf32>
      %258 = tpu.matmul %255, %257, %cst_213 {dimension_numbers = #tpu.dot_dimension_numbers<[1], [0], [0], [1], [0, 0, 1, 1], [], []>} : vector<14x56xf32>, vector<56x112xf32>, vector<14x112xf32> -> vector<14x112xf32>
      %259 = arith.addf %254, %258 : vector<14x112xf32>
      %c18_214 = arith.constant 18 : index
      %c4_215 = arith.constant 4 : index
      %260 = vector.load %arg1[%c18_214, %c4_215] : memref<32x64xf32, #tpu.memory_space<vmem>>, vector<14x56xf32>
      %c7_216 = arith.constant 7 : index
      %c0_217 = arith.constant 0 : index
      %c0_218 = arith.constant 0 : index
      %261 = vector.load %arg2[%c7_216, %c0_217, %c0_218] : memref<9x56x112xf32, #tpu.memory_space<vmem>>, vector<1x56x112xf32>
      %262 = vector.shape_cast %261 : vector<1x56x112xf32> to vector<56x112xf32>
      %cst_219 = arith.constant dense<0.000000e+00> : vector<14x112xf32>
      %263 = tpu.matmul %260, %262, %cst_219 {dimension_numbers = #tpu.dot_dimension_numbers<[1], [0], [0], [1], [0, 0, 1, 1], [], []>} : vector<14x56xf32>, vector<56x112xf32>, vector<14x112xf32> -> vector<14x112xf32>
      %264 = arith.addf %259, %263 : vector<14x112xf32>
      %c18_220 = arith.constant 18 : index
      %c8_221 = arith.constant 8 : index
      %265 = vector.load %arg1[%c18_220, %c8_221] : memref<32x64xf32, #tpu.memory_space<vmem>>, vector<14x56xf32>
      %c8_222 = arith.constant 8 : index
      %c0_223 = arith.constant 0 : index
      %c0_224 = arith.constant 0 : index
      %266 = vector.load %arg2[%c8_222, %c0_223, %c0_224] : memref<9x56x112xf32, #tpu.memory_space<vmem>>, vector<1x56x112xf32>
      %267 = vector.shape_cast %266 : vector<1x56x112xf32> to vector<56x112xf32>
      %cst_225 = arith.constant dense<0.000000e+00> : vector<14x112xf32>
      %268 = tpu.matmul %265, %267, %cst_225 {dimension_numbers = #tpu.dot_dimension_numbers<[1], [0], [0], [1], [0, 0, 1, 1], [], []>} : vector<14x56xf32>, vector<56x112xf32>, vector<14x112xf32> -> vector<14x112xf32>
      %269 = arith.addf %264, %268 : vector<14x112xf32>
      %270 = vector.broadcast %114 : vector<1x112xf32> to vector<14x112xf32>
      %271 = arith.mulf %269, %270 : vector<14x112xf32>
      %272 = vector.broadcast %115 : vector<1x112xf32> to vector<14x112xf32>
      %273 = arith.addf %271, %272 : vector<14x112xf32>
      %cst_226 = arith.constant 0.000000e+00 : f32
      %274 = vector.broadcast %cst_226 : f32 to vector<14x112xf32>
      %275 = arith.maximumf %273, %274 : vector<14x112xf32>
      %c14 = arith.constant 14 : index
      %c0_227 = arith.constant 0 : index
      %276 = vector.load %arg15[%c14, %c0_227] : memref<28x112xf32, #tpu.memory_space<vmem>>, vector<14x112xf32>
      tpu.vector_store %arg15[%c14, %c0_227], %275 {strides = array<i32>} : memref<28x112xf32, #tpu.memory_space<vmem>>, vector<14x112xf32>,
      %cst_228 = arith.constant 0.000000e+00 : f32
      %277 = vector.broadcast %cst_228 : f32 to vector<12x96xf32>
      %c14_229 = arith.constant 14 : index
      %c0_230 = arith.constant 0 : index
      %278 = vector.load %arg15[%c14_229, %c0_230] : memref<28x112xf32, #tpu.memory_space<vmem>>, vector<12x96xf32>
      %c0_231 = arith.constant 0 : index
      %c0_232 = arith.constant 0 : index
      %c0_233 = arith.constant 0 : index
      %279 = vector.load %arg5[%c0_231, %c0_232, %c0_233] : memref<9x96x96xf32, #tpu.memory_space<vmem>>, vector<1x96x96xf32>
      %280 = vector.shape_cast %279 : vector<1x96x96xf32> to vector<96x96xf32>
      %cst_234 = arith.constant dense<0.000000e+00> : vector<12x96xf32>
      %281 = tpu.matmul %278, %280, %cst_234 {dimension_numbers = #tpu.dot_dimension_numbers<[1], [0], [0], [1], [0, 0, 1, 1], [], []>} : vector<12x96xf32>, vector<96x96xf32>, vector<12x96xf32> -> vector<12x96xf32>
      %282 = arith.addf %277, %281 : vector<12x96xf32>
      %c14_235 = arith.constant 14 : index
      %c8_236 = arith.constant 8 : index
      %283 = vector.load %arg15[%c14_235, %c8_236] : memref<28x112xf32, #tpu.memory_space<vmem>>, vector<12x96xf32>
      %c1_237 = arith.constant 1 : index
      %c0_238 = arith.constant 0 : index
      %c0_239 = arith.constant 0 : index
      %284 = vector.load %arg5[%c1_237, %c0_238, %c0_239] : memref<9x96x96xf32, #tpu.memory_space<vmem>>, vector<1x96x96xf32>
      %285 = vector.shape_cast %284 : vector<1x96x96xf32> to vector<96x96xf32>
      %cst_240 = arith.constant dense<0.000000e+00> : vector<12x96xf32>
      %286 = tpu.matmul %283, %285, %cst_240 {dimension_numbers = #tpu.dot_dimension_numbers<[1], [0], [0], [1], [0, 0, 1, 1], [], []>} : vector<12x96xf32>, vector<96x96xf32>, vector<12x96xf32> -> vector<12x96xf32>
      %287 = arith.addf %282, %286 : vector<12x96xf32>
      %c14_241 = arith.constant 14 : index
      %c16_242 = arith.constant 16 : index
      %288 = vector.load %arg15[%c14_241, %c16_242] : memref<28x112xf32, #tpu.memory_space<vmem>>, vector<12x96xf32>
      %c2_243 = arith.constant 2 : index
      %c0_244 = arith.constant 0 : index
      %c0_245 = arith.constant 0 : index
      %289 = vector.load %arg5[%c2_243, %c0_244, %c0_245] : memref<9x96x96xf32, #tpu.memory_space<vmem>>, vector<1x96x96xf32>
      %290 = vector.shape_cast %289 : vector<1x96x96xf32> to vector<96x96xf32>
      %cst_246 = arith.constant dense<0.000000e+00> : vector<12x96xf32>
      %291 = tpu.matmul %288, %290, %cst_246 {dimension_numbers = #tpu.dot_dimension_numbers<[1], [0], [0], [1], [0, 0, 1, 1], [], []>} : vector<12x96xf32>, vector<96x96xf32>, vector<12x96xf32> -> vector<12x96xf32>
      %292 = arith.addf %287, %291 : vector<12x96xf32>
      %c15 = arith.constant 15 : index
      %c0_247 = arith.constant 0 : index
      %293 = vector.load %arg15[%c15, %c0_247] : memref<28x112xf32, #tpu.memory_space<vmem>>, vector<12x96xf32>
      %c3_248 = arith.constant 3 : index
      %c0_249 = arith.constant 0 : index
      %c0_250 = arith.constant 0 : index
      %294 = vector.load %arg5[%c3_248, %c0_249, %c0_250] : memref<9x96x96xf32, #tpu.memory_space<vmem>>, vector<1x96x96xf32>
      %295 = vector.shape_cast %294 : vector<1x96x96xf32> to vector<96x96xf32>
      %cst_251 = arith.constant dense<0.000000e+00> : vector<12x96xf32>
      %296 = tpu.matmul %293, %295, %cst_251 {dimension_numbers = #tpu.dot_dimension_numbers<[1], [0], [0], [1], [0, 0, 1, 1], [], []>} : vector<12x96xf32>, vector<96x96xf32>, vector<12x96xf32> -> vector<12x96xf32>
      %297 = arith.addf %292, %296 : vector<12x96xf32>
      %c15_252 = arith.constant 15 : index
      %c8_253 = arith.constant 8 : index
      %298 = vector.load %arg15[%c15_252, %c8_253] : memref<28x112xf32, #tpu.memory_space<vmem>>, vector<12x96xf32>
      %c4_254 = arith.constant 4 : index
      %c0_255 = arith.constant 0 : index
      %c0_256 = arith.constant 0 : index
      %299 = vector.load %arg5[%c4_254, %c0_255, %c0_256] : memref<9x96x96xf32, #tpu.memory_space<vmem>>, vector<1x96x96xf32>
      %300 = vector.shape_cast %299 : vector<1x96x96xf32> to vector<96x96xf32>
      %cst_257 = arith.constant dense<0.000000e+00> : vector<12x96xf32>
      %301 = tpu.matmul %298, %300, %cst_257 {dimension_numbers = #tpu.dot_dimension_numbers<[1], [0], [0], [1], [0, 0, 1, 1], [], []>} : vector<12x96xf32>, vector<96x96xf32>, vector<12x96xf32> -> vector<12x96xf32>
      %302 = arith.addf %297, %301 : vector<12x96xf32>
      %c15_258 = arith.constant 15 : index
      %c16_259 = arith.constant 16 : index
      %303 = vector.load %arg15[%c15_258, %c16_259] : memref<28x112xf32, #tpu.memory_space<vmem>>, vector<12x96xf32>
      %c5_260 = arith.constant 5 : index
      %c0_261 = arith.constant 0 : index
      %c0_262 = arith.constant 0 : index
      %304 = vector.load %arg5[%c5_260, %c0_261, %c0_262] : memref<9x96x96xf32, #tpu.memory_space<vmem>>, vector<1x96x96xf32>
      %305 = vector.shape_cast %304 : vector<1x96x96xf32> to vector<96x96xf32>
      %cst_263 = arith.constant dense<0.000000e+00> : vector<12x96xf32>
      %306 = tpu.matmul %303, %305, %cst_263 {dimension_numbers = #tpu.dot_dimension_numbers<[1], [0], [0], [1], [0, 0, 1, 1], [], []>} : vector<12x96xf32>, vector<96x96xf32>, vector<12x96xf32> -> vector<12x96xf32>
      %307 = arith.addf %302, %306 : vector<12x96xf32>
      %c16_264 = arith.constant 16 : index
      %c0_265 = arith.constant 0 : index
      %308 = vector.load %arg15[%c16_264, %c0_265] : memref<28x112xf32, #tpu.memory_space<vmem>>, vector<12x96xf32>
      %c6_266 = arith.constant 6 : index
      %c0_267 = arith.constant 0 : index
      %c0_268 = arith.constant 0 : index
      %309 = vector.load %arg5[%c6_266, %c0_267, %c0_268] : memref<9x96x96xf32, #tpu.memory_space<vmem>>, vector<1x96x96xf32>
      %310 = vector.shape_cast %309 : vector<1x96x96xf32> to vector<96x96xf32>
      %cst_269 = arith.constant dense<0.000000e+00> : vector<12x96xf32>
      %311 = tpu.matmul %308, %310, %cst_269 {dimension_numbers = #tpu.dot_dimension_numbers<[1], [0], [0], [1], [0, 0, 1, 1], [], []>} : vector<12x96xf32>, vector<96x96xf32>, vector<12x96xf32> -> vector<12x96xf32>
      %312 = arith.addf %307, %311 : vector<12x96xf32>
      %c16_270 = arith.constant 16 : index
      %c8_271 = arith.constant 8 : index
      %313 = vector.load %arg15[%c16_270, %c8_271] : memref<28x112xf32, #tpu.memory_space<vmem>>, vector<12x96xf32>
      %c7_272 = arith.constant 7 : index
      %c0_273 = arith.constant 0 : index
      %c0_274 = arith.constant 0 : index
      %314 = vector.load %arg5[%c7_272, %c0_273, %c0_274] : memref<9x96x96xf32, #tpu.memory_space<vmem>>, vector<1x96x96xf32>
      %315 = vector.shape_cast %314 : vector<1x96x96xf32> to vector<96x96xf32>
      %cst_275 = arith.constant dense<0.000000e+00> : vector<12x96xf32>
      %316 = tpu.matmul %313, %315, %cst_275 {dimension_numbers = #tpu.dot_dimension_numbers<[1], [0], [0], [1], [0, 0, 1, 1], [], []>} : vector<12x96xf32>, vector<96x96xf32>, vector<12x96xf32> -> vector<12x96xf32>
      %317 = arith.addf %312, %316 : vector<12x96xf32>
      %c16_276 = arith.constant 16 : index
      %c16_277 = arith.constant 16 : index
      %318 = vector.load %arg15[%c16_276, %c16_277] : memref<28x112xf32, #tpu.memory_space<vmem>>, vector<12x96xf32>
      %c8_278 = arith.constant 8 : index
      %c0_279 = arith.constant 0 : index
      %c0_280 = arith.constant 0 : index
      %319 = vector.load %arg5[%c8_278, %c0_279, %c0_280] : memref<9x96x96xf32, #tpu.memory_space<vmem>>, vector<1x96x96xf32>
      %320 = vector.shape_cast %319 : vector<1x96x96xf32> to vector<96x96xf32>
      %cst_281 = arith.constant dense<0.000000e+00> : vector<12x96xf32>
      %321 = tpu.matmul %318, %320, %cst_281 {dimension_numbers = #tpu.dot_dimension_numbers<[1], [0], [0], [1], [0, 0, 1, 1], [], []>} : vector<12x96xf32>, vector<96x96xf32>, vector<12x96xf32> -> vector<12x96xf32>
      %322 = arith.addf %317, %321 : vector<12x96xf32>
      %323 = vector.broadcast %116 : vector<1x96xf32> to vector<12x96xf32>
      %324 = arith.mulf %322, %323 : vector<12x96xf32>
      %325 = vector.broadcast %117 : vector<1x96xf32> to vector<12x96xf32>
      %326 = arith.addf %324, %325 : vector<12x96xf32>
      %cst_282 = arith.constant 0.000000e+00 : f32
      %327 = vector.broadcast %cst_282 : f32 to vector<12x96xf32>
      %328 = arith.maximumf %326, %327 : vector<12x96xf32>
      %c12_283 = arith.constant 12 : index
      %c0_284 = arith.constant 0 : index
      %329 = vector.load %arg16[%c12_283, %c0_284] : memref<24x96xf32, #tpu.memory_space<vmem>>, vector<12x96xf32>
      tpu.vector_store %arg16[%c12_283, %c0_284], %328 {strides = array<i32>} : memref<24x96xf32, #tpu.memory_space<vmem>>, vector<12x96xf32>,
      %cst_285 = arith.constant 0.000000e+00 : f32
      %330 = vector.broadcast %cst_285 : f32 to vector<2x256xf32>
      %c0_286 = arith.constant 0 : index
      %c0_287 = arith.constant 0 : index
      %331 = vector.load %arg17[%c0_286, %c0_287] : memref<2x256xf32, #tpu.memory_space<vmem>>, vector<2x256xf32>
      tpu.vector_store %arg17[%c0_286, %c0_287], %330 {strides = array<i32>} : memref<2x256xf32, #tpu.memory_space<vmem>>, vector<2x256xf32>,
    } else {
    }
    %c0 = arith.constant 0 : index
    %c0_1 = arith.constant 0 : index
    %3 = vector.load %arg16[%c0, %c0_1] : memref<24x96xf32, #tpu.memory_space<vmem>>, vector<12x96xf32>
    %c12 = arith.constant 12 : index
    %c0_2 = arith.constant 0 : index
    %4 = vector.load %arg16[%c12, %c0_2] : memref<24x96xf32, #tpu.memory_space<vmem>>, vector<12x96xf32>
    %c0_3 = arith.constant 0 : index
    %c0_4 = arith.constant 0 : index
    %5 = vector.load %arg9[%c0_3, %c0_4] : memref<1x256xf32, #tpu.memory_space<vmem>>, vector<1x256xf32>
    %cst = arith.constant 0.000000e+00 : f32
    %6 = vector.broadcast %cst : f32 to vector<2x256xf32>
    %7 = vector.broadcast %5 : vector<1x256xf32> to vector<2x256xf32>
    %8 = arith.addf %7, %6 : vector<2x256xf32>
    %9 = vector.extract_strided_slice %3 {offsets = [0, 0], sizes = [1, 96], strides = [1, 1]} : vector<12x96xf32> to vector<1x96xf32>
    %10 = vector.extract_strided_slice %4 {offsets = [0, 0], sizes = [1, 96], strides = [1, 1]} : vector<12x96xf32> to vector<1x96xf32>
    %11 = tpu.concatenate %9, %10 in 0 : vector<1x96xf32>, vector<1x96xf32> -> vector<2x96xf32>
    %c0_5 = arith.constant 0 : index
    %c0_6 = arith.constant 0 : index
    %c0_7 = arith.constant 0 : index
    %12 = vector.load %arg8[%c0_5, %c0_6, %c0_7] : memref<12x96x256xbf16, #tpu.memory_space<vmem>>, vector<1x96x256xbf16>
    %13 = vector.shape_cast %12 : vector<1x96x256xbf16> to vector<96x256xbf16>
    %14 = arith.extf %13 : vector<96x256xbf16> to vector<96x256xf32>
    %cst_8 = arith.constant dense<0.000000e+00> : vector<2x256xf32>
    %15 = tpu.matmul %11, %14, %cst_8 {dimension_numbers = #tpu.dot_dimension_numbers<[1], [0], [0], [1], [0, 0, 1, 1], [], []>} : vector<2x96xf32>, vector<96x256xf32>, vector<2x256xf32> -> vector<2x256xf32>
    %16 = arith.addf %8, %15 : vector<2x256xf32>
    %17 = vector.extract_strided_slice %3 {offsets = [1, 0], sizes = [1, 96], strides = [1, 1]} : vector<12x96xf32> to vector<1x96xf32>
    %18 = vector.extract_strided_slice %4 {offsets = [1, 0], sizes = [1, 96], strides = [1, 1]} : vector<12x96xf32> to vector<1x96xf32>
    %19 = tpu.concatenate %17, %18 in 0 : vector<1x96xf32>, vector<1x96xf32> -> vector<2x96xf32>
    %c1 = arith.constant 1 : index
    %c0_9 = arith.constant 0 : index
    %c0_10 = arith.constant 0 : index
    %20 = vector.load %arg8[%c1, %c0_9, %c0_10] : memref<12x96x256xbf16, #tpu.memory_space<vmem>>, vector<1x96x256xbf16>
    %21 = vector.shape_cast %20 : vector<1x96x256xbf16> to vector<96x256xbf16>
    %22 = arith.extf %21 : vector<96x256xbf16> to vector<96x256xf32>
    %cst_11 = arith.constant dense<0.000000e+00> : vector<2x256xf32>
    %23 = tpu.matmul %19, %22, %cst_11 {dimension_numbers = #tpu.dot_dimension_numbers<[1], [0], [0], [1], [0, 0, 1, 1], [], []>} : vector<2x96xf32>, vector<96x256xf32>, vector<2x256xf32> -> vector<2x256xf32>
    %24 = arith.addf %16, %23 : vector<2x256xf32>
    %25 = vector.extract_strided_slice %3 {offsets = [2, 0], sizes = [1, 96], strides = [1, 1]} : vector<12x96xf32> to vector<1x96xf32>
    %26 = vector.extract_strided_slice %4 {offsets = [2, 0], sizes = [1, 96], strides = [1, 1]} : vector<12x96xf32> to vector<1x96xf32>
    %27 = tpu.concatenate %25, %26 in 0 : vector<1x96xf32>, vector<1x96xf32> -> vector<2x96xf32>
    %c2 = arith.constant 2 : index
    %c0_12 = arith.constant 0 : index
    %c0_13 = arith.constant 0 : index
    %28 = vector.load %arg8[%c2, %c0_12, %c0_13] : memref<12x96x256xbf16, #tpu.memory_space<vmem>>, vector<1x96x256xbf16>
    %29 = vector.shape_cast %28 : vector<1x96x256xbf16> to vector<96x256xbf16>
    %30 = arith.extf %29 : vector<96x256xbf16> to vector<96x256xf32>
    %cst_14 = arith.constant dense<0.000000e+00> : vector<2x256xf32>
    %31 = tpu.matmul %27, %30, %cst_14 {dimension_numbers = #tpu.dot_dimension_numbers<[1], [0], [0], [1], [0, 0, 1, 1], [], []>} : vector<2x96xf32>, vector<96x256xf32>, vector<2x256xf32> -> vector<2x256xf32>
    %32 = arith.addf %24, %31 : vector<2x256xf32>
    %33 = vector.extract_strided_slice %3 {offsets = [3, 0], sizes = [1, 96], strides = [1, 1]} : vector<12x96xf32> to vector<1x96xf32>
    %34 = vector.extract_strided_slice %4 {offsets = [3, 0], sizes = [1, 96], strides = [1, 1]} : vector<12x96xf32> to vector<1x96xf32>
    %35 = tpu.concatenate %33, %34 in 0 : vector<1x96xf32>, vector<1x96xf32> -> vector<2x96xf32>
    %c3 = arith.constant 3 : index
    %c0_15 = arith.constant 0 : index
    %c0_16 = arith.constant 0 : index
    %36 = vector.load %arg8[%c3, %c0_15, %c0_16] : memref<12x96x256xbf16, #tpu.memory_space<vmem>>, vector<1x96x256xbf16>
    %37 = vector.shape_cast %36 : vector<1x96x256xbf16> to vector<96x256xbf16>
    %38 = arith.extf %37 : vector<96x256xbf16> to vector<96x256xf32>
    %cst_17 = arith.constant dense<0.000000e+00> : vector<2x256xf32>
    %39 = tpu.matmul %35, %38, %cst_17 {dimension_numbers = #tpu.dot_dimension_numbers<[1], [0], [0], [1], [0, 0, 1, 1], [], []>} : vector<2x96xf32>, vector<96x256xf32>, vector<2x256xf32> -> vector<2x256xf32>
    %40 = arith.addf %32, %39 : vector<2x256xf32>
    %41 = vector.extract_strided_slice %3 {offsets = [4, 0], sizes = [1, 96], strides = [1, 1]} : vector<12x96xf32> to vector<1x96xf32>
    %42 = vector.extract_strided_slice %4 {offsets = [4, 0], sizes = [1, 96], strides = [1, 1]} : vector<12x96xf32> to vector<1x96xf32>
    %43 = tpu.concatenate %41, %42 in 0 : vector<1x96xf32>, vector<1x96xf32> -> vector<2x96xf32>
    %c4 = arith.constant 4 : index
    %c0_18 = arith.constant 0 : index
    %c0_19 = arith.constant 0 : index
    %44 = vector.load %arg8[%c4, %c0_18, %c0_19] : memref<12x96x256xbf16, #tpu.memory_space<vmem>>, vector<1x96x256xbf16>
    %45 = vector.shape_cast %44 : vector<1x96x256xbf16> to vector<96x256xbf16>
    %46 = arith.extf %45 : vector<96x256xbf16> to vector<96x256xf32>
    %cst_20 = arith.constant dense<0.000000e+00> : vector<2x256xf32>
    %47 = tpu.matmul %43, %46, %cst_20 {dimension_numbers = #tpu.dot_dimension_numbers<[1], [0], [0], [1], [0, 0, 1, 1], [], []>} : vector<2x96xf32>, vector<96x256xf32>, vector<2x256xf32> -> vector<2x256xf32>
    %48 = arith.addf %40, %47 : vector<2x256xf32>
    %49 = vector.extract_strided_slice %3 {offsets = [5, 0], sizes = [1, 96], strides = [1, 1]} : vector<12x96xf32> to vector<1x96xf32>
    %50 = vector.extract_strided_slice %4 {offsets = [5, 0], sizes = [1, 96], strides = [1, 1]} : vector<12x96xf32> to vector<1x96xf32>
    %51 = tpu.concatenate %49, %50 in 0 : vector<1x96xf32>, vector<1x96xf32> -> vector<2x96xf32>
    %c5 = arith.constant 5 : index
    %c0_21 = arith.constant 0 : index
    %c0_22 = arith.constant 0 : index
    %52 = vector.load %arg8[%c5, %c0_21, %c0_22] : memref<12x96x256xbf16, #tpu.memory_space<vmem>>, vector<1x96x256xbf16>
    %53 = vector.shape_cast %52 : vector<1x96x256xbf16> to vector<96x256xbf16>
    %54 = arith.extf %53 : vector<96x256xbf16> to vector<96x256xf32>
    %cst_23 = arith.constant dense<0.000000e+00> : vector<2x256xf32>
    %55 = tpu.matmul %51, %54, %cst_23 {dimension_numbers = #tpu.dot_dimension_numbers<[1], [0], [0], [1], [0, 0, 1, 1], [], []>} : vector<2x96xf32>, vector<96x256xf32>, vector<2x256xf32> -> vector<2x256xf32>
    %56 = arith.addf %48, %55 : vector<2x256xf32>
    %57 = vector.extract_strided_slice %3 {offsets = [6, 0], sizes = [1, 96], strides = [1, 1]} : vector<12x96xf32> to vector<1x96xf32>
    %58 = vector.extract_strided_slice %4 {offsets = [6, 0], sizes = [1, 96], strides = [1, 1]} : vector<12x96xf32> to vector<1x96xf32>
    %59 = tpu.concatenate %57, %58 in 0 : vector<1x96xf32>, vector<1x96xf32> -> vector<2x96xf32>
    %c6 = arith.constant 6 : index
    %c0_24 = arith.constant 0 : index
    %c0_25 = arith.constant 0 : index
    %60 = vector.load %arg8[%c6, %c0_24, %c0_25] : memref<12x96x256xbf16, #tpu.memory_space<vmem>>, vector<1x96x256xbf16>
    %61 = vector.shape_cast %60 : vector<1x96x256xbf16> to vector<96x256xbf16>
    %62 = arith.extf %61 : vector<96x256xbf16> to vector<96x256xf32>
    %cst_26 = arith.constant dense<0.000000e+00> : vector<2x256xf32>
    %63 = tpu.matmul %59, %62, %cst_26 {dimension_numbers = #tpu.dot_dimension_numbers<[1], [0], [0], [1], [0, 0, 1, 1], [], []>} : vector<2x96xf32>, vector<96x256xf32>, vector<2x256xf32> -> vector<2x256xf32>
    %64 = arith.addf %56, %63 : vector<2x256xf32>
    %65 = vector.extract_strided_slice %3 {offsets = [7, 0], sizes = [1, 96], strides = [1, 1]} : vector<12x96xf32> to vector<1x96xf32>
    %66 = vector.extract_strided_slice %4 {offsets = [7, 0], sizes = [1, 96], strides = [1, 1]} : vector<12x96xf32> to vector<1x96xf32>
    %67 = tpu.concatenate %65, %66 in 0 : vector<1x96xf32>, vector<1x96xf32> -> vector<2x96xf32>
    %c7 = arith.constant 7 : index
    %c0_27 = arith.constant 0 : index
    %c0_28 = arith.constant 0 : index
    %68 = vector.load %arg8[%c7, %c0_27, %c0_28] : memref<12x96x256xbf16, #tpu.memory_space<vmem>>, vector<1x96x256xbf16>
    %69 = vector.shape_cast %68 : vector<1x96x256xbf16> to vector<96x256xbf16>
    %70 = arith.extf %69 : vector<96x256xbf16> to vector<96x256xf32>
    %cst_29 = arith.constant dense<0.000000e+00> : vector<2x256xf32>
    %71 = tpu.matmul %67, %70, %cst_29 {dimension_numbers = #tpu.dot_dimension_numbers<[1], [0], [0], [1], [0, 0, 1, 1], [], []>} : vector<2x96xf32>, vector<96x256xf32>, vector<2x256xf32> -> vector<2x256xf32>
    %72 = arith.addf %64, %71 : vector<2x256xf32>
    %73 = vector.extract_strided_slice %3 {offsets = [8, 0], sizes = [1, 96], strides = [1, 1]} : vector<12x96xf32> to vector<1x96xf32>
    %74 = vector.extract_strided_slice %4 {offsets = [8, 0], sizes = [1, 96], strides = [1, 1]} : vector<12x96xf32> to vector<1x96xf32>
    %75 = tpu.concatenate %73, %74 in 0 : vector<1x96xf32>, vector<1x96xf32> -> vector<2x96xf32>
    %c8 = arith.constant 8 : index
    %c0_30 = arith.constant 0 : index
    %c0_31 = arith.constant 0 : index
    %76 = vector.load %arg8[%c8, %c0_30, %c0_31] : memref<12x96x256xbf16, #tpu.memory_space<vmem>>, vector<1x96x256xbf16>
    %77 = vector.shape_cast %76 : vector<1x96x256xbf16> to vector<96x256xbf16>
    %78 = arith.extf %77 : vector<96x256xbf16> to vector<96x256xf32>
    %cst_32 = arith.constant dense<0.000000e+00> : vector<2x256xf32>
    %79 = tpu.matmul %75, %78, %cst_32 {dimension_numbers = #tpu.dot_dimension_numbers<[1], [0], [0], [1], [0, 0, 1, 1], [], []>} : vector<2x96xf32>, vector<96x256xf32>, vector<2x256xf32> -> vector<2x256xf32>
    %80 = arith.addf %72, %79 : vector<2x256xf32>
    %81 = vector.extract_strided_slice %3 {offsets = [9, 0], sizes = [1, 96], strides = [1, 1]} : vector<12x96xf32> to vector<1x96xf32>
    %82 = vector.extract_strided_slice %4 {offsets = [9, 0], sizes = [1, 96], strides = [1, 1]} : vector<12x96xf32> to vector<1x96xf32>
    %83 = tpu.concatenate %81, %82 in 0 : vector<1x96xf32>, vector<1x96xf32> -> vector<2x96xf32>
    %c9 = arith.constant 9 : index
    %c0_33 = arith.constant 0 : index
    %c0_34 = arith.constant 0 : index
    %84 = vector.load %arg8[%c9, %c0_33, %c0_34] : memref<12x96x256xbf16, #tpu.memory_space<vmem>>, vector<1x96x256xbf16>
    %85 = vector.shape_cast %84 : vector<1x96x256xbf16> to vector<96x256xbf16>
    %86 = arith.extf %85 : vector<96x256xbf16> to vector<96x256xf32>
    %cst_35 = arith.constant dense<0.000000e+00> : vector<2x256xf32>
    %87 = tpu.matmul %83, %86, %cst_35 {dimension_numbers = #tpu.dot_dimension_numbers<[1], [0], [0], [1], [0, 0, 1, 1], [], []>} : vector<2x96xf32>, vector<96x256xf32>, vector<2x256xf32> -> vector<2x256xf32>
    %88 = arith.addf %80, %87 : vector<2x256xf32>
    %89 = vector.extract_strided_slice %3 {offsets = [10, 0], sizes = [1, 96], strides = [1, 1]} : vector<12x96xf32> to vector<1x96xf32>
    %90 = vector.extract_strided_slice %4 {offsets = [10, 0], sizes = [1, 96], strides = [1, 1]} : vector<12x96xf32> to vector<1x96xf32>
    %91 = tpu.concatenate %89, %90 in 0 : vector<1x96xf32>, vector<1x96xf32> -> vector<2x96xf32>
    %c10 = arith.constant 10 : index
    %c0_36 = arith.constant 0 : index
    %c0_37 = arith.constant 0 : index
    %92 = vector.load %arg8[%c10, %c0_36, %c0_37] : memref<12x96x256xbf16, #tpu.memory_space<vmem>>, vector<1x96x256xbf16>
    %93 = vector.shape_cast %92 : vector<1x96x256xbf16> to vector<96x256xbf16>
    %94 = arith.extf %93 : vector<96x256xbf16> to vector<96x256xf32>
    %cst_38 = arith.constant dense<0.000000e+00> : vector<2x256xf32>
    %95 = tpu.matmul %91, %94, %cst_38 {dimension_numbers = #tpu.dot_dimension_numbers<[1], [0], [0], [1], [0, 0, 1, 1], [], []>} : vector<2x96xf32>, vector<96x256xf32>, vector<2x256xf32> -> vector<2x256xf32>
    %96 = arith.addf %88, %95 : vector<2x256xf32>
    %97 = vector.extract_strided_slice %3 {offsets = [11, 0], sizes = [1, 96], strides = [1, 1]} : vector<12x96xf32> to vector<1x96xf32>
    %98 = vector.extract_strided_slice %4 {offsets = [11, 0], sizes = [1, 96], strides = [1, 1]} : vector<12x96xf32> to vector<1x96xf32>
    %99 = tpu.concatenate %97, %98 in 0 : vector<1x96xf32>, vector<1x96xf32> -> vector<2x96xf32>
    %c11 = arith.constant 11 : index
    %c0_39 = arith.constant 0 : index
    %c0_40 = arith.constant 0 : index
    %100 = vector.load %arg8[%c11, %c0_39, %c0_40] : memref<12x96x256xbf16, #tpu.memory_space<vmem>>, vector<1x96x256xbf16>
    %101 = vector.shape_cast %100 : vector<1x96x256xbf16> to vector<96x256xbf16>
    %102 = arith.extf %101 : vector<96x256xbf16> to vector<96x256xf32>
    %cst_41 = arith.constant dense<0.000000e+00> : vector<2x256xf32>
    %103 = tpu.matmul %99, %102, %cst_41 {dimension_numbers = #tpu.dot_dimension_numbers<[1], [0], [0], [1], [0, 0, 1, 1], [], []>} : vector<2x96xf32>, vector<96x256xf32>, vector<2x256xf32> -> vector<2x256xf32>
    %104 = arith.addf %96, %103 : vector<2x256xf32>
    %c0_42 = arith.constant 0 : index
    %c0_43 = arith.constant 0 : index
    %105 = vector.load %arg17[%c0_42, %c0_43] : memref<2x256xf32, #tpu.memory_space<vmem>>, vector<2x256xf32>
    %c0_44 = arith.constant 0 : index
    %c0_45 = arith.constant 0 : index
    %106 = vector.load %arg10[%c0_44, %c0_45] : memref<256x256xbf16, #tpu.memory_space<vmem>>, vector<256x256xbf16>
    %107 = arith.extf %106 : vector<256x256xbf16> to vector<256x256xf32>
    %cst_46 = arith.constant dense<0.000000e+00> : vector<2x256xf32>
    %108 = tpu.matmul %104, %107, %cst_46 {dimension_numbers = #tpu.dot_dimension_numbers<[1], [0], [0], [1], [0, 0, 1, 1], [], []>} : vector<2x256xf32>, vector<256x256xf32>, vector<2x256xf32> -> vector<2x256xf32>
    %109 = arith.addf %105, %108 : vector<2x256xf32>
    %c0_47 = arith.constant 0 : index
    %c0_48 = arith.constant 0 : index
    %110 = vector.load %arg17[%c0_47, %c0_48] : memref<2x256xf32, #tpu.memory_space<vmem>>, vector<2x256xf32>
    tpu.vector_store %arg17[%c0_47, %c0_48], %109 {strides = array<i32>} : memref<2x256xf32, #tpu.memory_space<vmem>>, vector<2x256xf32>,
    %c3_i32 = arith.constant 3 : i32
    %111 = arith.cmpi eq, %arg0, %c3_i32 : i32
    %112 = arith.extui %111 : i1 to i32
    %c0_i32_49 = arith.constant 0 : i32
    %113 = arith.cmpi ne, %112, %c0_i32_49 : i32
    scf.if %113 {
      %c0_50 = arith.constant 0 : index
      %c0_51 = arith.constant 0 : index
      %114 = vector.load %arg17[%c0_50, %c0_51] : memref<2x256xf32, #tpu.memory_space<vmem>>, vector<2x256xf32>
      %c0_52 = arith.constant 0 : index
      %c0_53 = arith.constant 0 : index
      %115 = vector.load %arg11[%c0_52, %c0_53] : memref<1x256xf32, #tpu.memory_space<vmem>>, vector<1x256xf32>
      %116 = vector.broadcast %115 : vector<1x256xf32> to vector<2x256xf32>
      %117 = arith.addf %114, %116 : vector<2x256xf32>
      %c0_54 = arith.constant 0 : index
      %c0_55 = arith.constant 0 : index
      %118 = vector.load %arg12[%c0_54, %c0_55] : memref<256x10xf32, #tpu.memory_space<vmem>>, vector<256x10xf32>
      %cst_56 = arith.constant dense<0.000000e+00> : vector<2x10xf32>
      %119 = tpu.matmul %117, %118, %cst_56 {dimension_numbers = #tpu.dot_dimension_numbers<[1], [0], [0], [1], [0, 0, 1, 1], [], []>} : vector<2x256xf32>, vector<256x10xf32>, vector<2x10xf32> -> vector<2x10xf32>
      %c0_57 = arith.constant 0 : index
      %c0_58 = arith.constant 0 : index
      %120 = vector.load %arg13[%c0_57, %c0_58] : memref<1x10xf32, #tpu.memory_space<vmem>>, vector<1x10xf32>
      %121 = vector.broadcast %120 : vector<1x10xf32> to vector<2x10xf32>
      %122 = arith.addf %119, %121 : vector<2x10xf32>
      %c0_59 = arith.constant 0 : index
      %c0_60 = arith.constant 0 : index
      %123 = vector.load %arg14[%c0_59, %c0_60] : memref<2x10xf32, #tpu.memory_space<vmem>>, vector<2x10xf32>
      tpu.vector_store %arg14[%c0_59, %c0_60], %122 {strides = array<i32>} : memref<2x10xf32, #tpu.memory_space<vmem>>, vector<2x10xf32>,
    } else {
    }
    return
  }
  func.func @transform_0(%arg0: i32) -> (i32, i32) {
    %c0_i32 = arith.constant 0 : i32
    %c0_i32_0 = arith.constant 0 : i32
    %c0_i32_1 = arith.constant 0 : i32
    return %c0_i32, %c0_i32_0 : i32, i32
  }
  func.func @transform_1(%arg0: i32) -> (i32, i32, i32) {
    %c0_i32 = arith.constant 0 : i32
    %c0_i32_0 = arith.constant 0 : i32
    %c0_i32_1 = arith.constant 0 : i32
    %c0_i32_2 = arith.constant 0 : i32
    return %c0_i32, %c0_i32_0, %c0_i32_1 : i32, i32, i32
  }
  func.func @transform_2(%arg0: i32) -> (i32, i32) {
    %c0_i32 = arith.constant 0 : i32
    %c0_i32_0 = arith.constant 0 : i32
    %c0_i32_1 = arith.constant 0 : i32
    return %c0_i32, %c0_i32_0 : i32, i32
  }
  func.func @transform_3(%arg0: i32) -> (i32, i32) {
    %c0_i32 = arith.constant 0 : i32
    %c0_i32_0 = arith.constant 0 : i32
    %c0_i32_1 = arith.constant 0 : i32
    return %c0_i32, %c0_i32_0 : i32, i32
  }
  func.func @transform_4(%arg0: i32) -> (i32, i32, i32) {
    %c0_i32 = arith.constant 0 : i32
    %c0_i32_0 = arith.constant 0 : i32
    %c0_i32_1 = arith.constant 0 : i32
    %c0_i32_2 = arith.constant 0 : i32
    return %c0_i32, %c0_i32_0, %c0_i32_1 : i32, i32, i32
  }
  func.func @transform_5(%arg0: i32) -> (i32, i32) {
    %c0_i32 = arith.constant 0 : i32
    %c0_i32_0 = arith.constant 0 : i32
    %c0_i32_1 = arith.constant 0 : i32
    return %c0_i32, %c0_i32_0 : i32, i32
  }
  func.func @transform_6(%arg0: i32) -> (i32, i32) {
    %c0_i32 = arith.constant 0 : i32
    %c0_i32_0 = arith.constant 0 : i32
    %c0_i32_1 = arith.constant 0 : i32
    return %c0_i32, %c0_i32_0 : i32, i32
  }
  func.func @transform_7(%arg0: i32) -> (i32, i32, i32) {
    %c0_i32 = arith.constant 0 : i32
    %c0_i32_0 = arith.constant 0 : i32
    %c0_i32_1 = arith.constant 0 : i32
    return %c0_i32, %c0_i32_0, %arg0 : i32, i32, i32
  }
  func.func @transform_8(%arg0: i32) -> (i32, i32) {
    %c0_i32 = arith.constant 0 : i32
    %c0_i32_0 = arith.constant 0 : i32
    return %c0_i32, %arg0 : i32, i32
  }
  func.func @transform_9(%arg0: i32) -> (i32, i32) {
    %c0_i32 = arith.constant 0 : i32
    %c0_i32_0 = arith.constant 0 : i32
    return %arg0, %c0_i32 : i32, i32
  }
  func.func @transform_10(%arg0: i32) -> (i32, i32) {
    %c0_i32 = arith.constant 0 : i32
    %c0_i32_0 = arith.constant 0 : i32
    %c0_i32_1 = arith.constant 0 : i32
    return %c0_i32, %c0_i32_0 : i32, i32
  }
  func.func @transform_11(%arg0: i32) -> (i32, i32) {
    %c0_i32 = arith.constant 0 : i32
    %c0_i32_0 = arith.constant 0 : i32
    %c0_i32_1 = arith.constant 0 : i32
    return %c0_i32, %c0_i32_0 : i32, i32
  }
  func.func @transform_12(%arg0: i32) -> (i32, i32) {
    %c0_i32 = arith.constant 0 : i32
    %c0_i32_0 = arith.constant 0 : i32
    %c0_i32_1 = arith.constant 0 : i32
    return %c0_i32, %c0_i32_0 : i32, i32
  }
  func.func @transform_13(%arg0: i32) -> (i32, i32) {
    %c0_i32 = arith.constant 0 : i32
    %c0_i32_0 = arith.constant 0 : i32
    %c0_i32_1 = arith.constant 0 : i32
    return %c0_i32, %c0_i32_0 : i32, i32
  }
}

</mosaic_0001>

<bundles_post_ra>
// kernel: _forward_impl.1
= control target key start
LH: loop header
LB: loop body
LE: loop exit
PB: predicated region body
PF: predicated region fallthrough
CT: control target
= control target key end

     0   :  { %s9097_s0 = inlined_call_operand.vmem [shape: f32[32,64], index: 0, kind: input, shape index: {}]   ;;  %s9098_s1 = inlined_call_operand.hbm [shape: f32[9,56,112], index: 1, kind: input, shape index: {}]   ;;  %s9099_s2 = inlined_call_operand.hbm [shape: f32[1,112], index: 2, kind: input, shape index: {}]   ;;  %s9100_s3 = inlined_call_operand.hbm [shape: f32[1,112], index: 3, kind: input, shape index: {}]   ;;  %s9101_s4 = inlined_call_operand.hbm [shape: f32[9,96,96], index: 4, kind: input, shape index: {}]   ;;  %s9102_s5 = inlined_call_operand.hbm [shape: f32[1,96], index: 5, kind: input, shape index: {}]   ;;  %s9103_s6 = inlined_call_operand.hbm [shape: f32[1,96], index: 6, kind: input, shape index: {}]   ;;  %s9104_s7 = inlined_call_operand.hbm [shape: bf16[12,96,1024], index: 7, kind: input, shape index: {}]   ;;  %s9105_s8 = inlined_call_operand.hbm [shape: f32[1,1024], index: 8, kind: input, shape index: {}]   ;;  %s9106_s9 = inlined_call_operand.hbm [shape: bf16[1024,256], index: 9, kind: input, shape index: {}]   ;;  %s9107_s10 = inlined_call_operand.hbm [shape: f32[1,256], index: 10, kind: input, shape index: {}]   ;;  %s9108_s11 = inlined_call_operand.vmem [shape: f32[256,10], index: 11, kind: input, shape index: {}]   ;;  %s9109_s12 = inlined_call_operand.hbm [shape: f32[1,10], index: 12, kind: input, shape index: {}]   ;;  %s9110_s13 = inlined_call_operand.hbm [shape: f32[2,10], index: 13, kind: output, shape index: {}]  }
   0x1   :  { %9135 = sst [smem:[#allocation35_spill]] %s9097_s0 }
   0x2   :  { %9136 = sst [smem:[#allocation36_spill]] %s9098_s1 }
   0x3   :  { %9137 = sst [smem:[#allocation37_spill]] %s9099_s2 }
   0x4   :  { %9138 = sst [smem:[#allocation38_spill]] %s9100_s3 }
   0x5   :  { %9139 = sst [smem:[#allocation39_spill]] %s9101_s4 }
   0x6   :  { %9140 = sst [smem:[#allocation40_spill]] %s9104_s7 }
   0x7   :  { %9141 = sst [smem:[#allocation41_spill]] %s9108_s11 }
   0x8   :  { %9142 = sst [smem:[#allocation42_spill]] %s9110_s13 }
   0x9   :  { %18 = vsyncpa [#allocation6], 0 }
   0xa   :  { %19 = vsyncpa [#allocation9], 0 }
   0xb   :  { %20 = vsyncpa [#allocation12], 0 }
   0xc   :  { %21 = vsyncpa [#allocation15], 0 }
   0xd   :  { %22 = vsyncpa [#allocation7], 0  ;;  %s8151_s25 = smov 0   ;;  %s8153_s26 = smov 0  }
   0xe   :  { %s8155_s27 = smov 0   ;;  %s8157_s28 = smov 0  }
   0xf LB: > { %9143 = sst [smem:[#allocation30_spill]] %s8050_s26  ;;  %s8060_s29 = smov [#allocation5]   ;;  %s8058_s28 = sphi %s8157_s28, %s9187_s28   ;;  %s8054_s27 = sphi %s8155_s27, %s9190_s27   ;;  %s8050_s26 = sphi %s8153_s26, %s9189_s26   ;;  %s8046_s25 = sphi %s8151_s25, %s9188_s25  }
  0x10   : > { %9144 = sst [smem:[#allocation31_spill]] %s8054_s27  ;;  %s357_s30 = sshll.u32 %s8060_s29, 4  ;;  %s358_s30 = int_to_ptr.vmem [resolvable:$true] %s357_s30 }
  0x11   : > { %s8172_s14 = sadd.s32 4294967295, %s8058_s28   ;;  %p6028_p0 = scmp.ge.s32.totalorder %s8058_s28, 1 }
  0x12   : > { %p9116_p1 = scmp.eq.s32.totalorder %s8172_s14, 0  ;;  %p342_p2 = scmp.lt.s32.totalorder %s8058_s28, 5 }
  0x13   : > { %s8061_s16 = smov [#allocation8]   ;;  %s8062_s19 = smov [#allocation11]  }
  0x14   : > { %p8178_p4 = pnand %p6028_p0, %p342_p2  ;;  %s371_s17 = sshll.u32 %s8061_s16, 4  ;;  %s372_s17 = int_to_ptr.vmem [resolvable:$true] %s371_s17 }
  0x15   : > { %s392_s20 = sshll.u32 %s8062_s19, 4  ;;  %s7691_s22 = scalar_lea.vmem %s358_s30, 8064  ;;  %s8190_s20 = int_to_ptr.vmem [resolvable:$true] %s392_s20 }
  0x16   : > { %s9145_s15 = scalar_select %p8178_p4, 1, 0 }
  0x17   : > { %p7574_p5 = pneg %p8178_p4  ;;  %p7692_p8 = scmp.ne.s32.totalorder %s358_s30, %s7691_s22 }
  0x18   : > { %p7699_p11 = scmp.lt.s32.totalorder %s358_s30, %s358_s30  ;;  %p7700_p12 = scmp.lt.s32.totalorder %s7691_s22, %s7691_s22 }
  0x19   : > { %p8186_p6 = pnand %p7574_p5, %p9116_p1 }
  0x1a   : > { %p7701_p13 = por %p7700_p12, %p7699_p11 }
  0x1b   : > { %s9146_s18 = scalar_select %p8186_p6, 1, 0 }
  0x1c   : > { %p8194_p7 = pneg %p8186_p6 }
  0x1e   : > { %s9147_s21 = scalar_select %p8194_p7, 1, 0 }
  0x1f   : > { %p7694_p9 = pnand %p7692_p8, %p8194_p7 }
  0x21   : > { %p7695_p10 = pneg %p7694_p9 }
  0x23   : > { %p7702_p0 = pnand %p7701_p13, %p7695_p10 }
  0x25   : > { %7705 = shalt.err (!%p7702_p0)
}
  0x26   : > { %s9112_s23 = smov 128   ;;  %s9114_s24 = smov 8  }
  0x27   : > { %s9148_s1 = sld [smem:[#allocation36_spill]]  ;;  %s7717_s19 = scalar_lea.vmem %s372_s17, 16 }
  0x28   : > { %p7718_p2 = scmp.ne.s32.totalorder %s372_s17, %s7717_s19  ;;  %s7724_s22 = scalar_lea.vmem %s372_s17, 32 }
  0x29   : > { %p7725_p9 = scmp.lt.s32.totalorder %s372_s17, %s372_s17  ;;  %p7726_p10 = scmp.lt.s32.totalorder %s7724_s22, %s7717_s19 }
  0x2a   : > { %p7720_p5 = pnand %p7718_p2, %p8194_p7 }
  0x2b   : > { %p7727_p11 = por %p7726_p10, %p7725_p9 }
  0x2c   : > { %p7721_p8 = pneg %p7720_p5 }
  0x2d   : > { %7577 = dma.hbm_to_vmem [thread:$0]  (!%p8186_p6), %s9148_s1, 8064, %s358_s30, [#allocation6], %s9112_s23, %s9112_s23, %s9114_s24  }
  0x2e   : > { %p7728_p12 = pnand %p7727_p11, %p7721_p8 }
  0x30   : > { %7731 = shalt.err (!%p7728_p12)
}
  0x31   : > { %s9149_s2 = sld [smem:[#allocation37_spill]]  ;;  %s7743_s30 = scalar_lea.vmem %s8190_s20, 13824 }
  0x32   : > { %p7744_p13 = scmp.ne.s32.totalorder %s8190_s20, %s7743_s30  ;;  %p7751_p5 = scmp.lt.s32.totalorder %s8190_s20, %s8190_s20 }
  0x33   : > { %p7752_p9 = scmp.lt.s32.totalorder %s7743_s30, %s7743_s30 }
  0x34   : > { %p7746_p0 = pnand %p7744_p13, %p8194_p7 }
  0x35   : > { %p7753_p8 = por %p7752_p9, %p7751_p5 }
  0x36   : > { %p7747_p2 = pneg %p7746_p0 }
  0x37   : > { %7580 = dma.hbm_to_vmem [thread:$0]  (!%p8186_p6), %s9149_s2, 16, %s372_s17, [#allocation9]  }
  0x38   : > { %p7754_p10 = pnand %p7753_p8, %p7747_p2 }
  0x3a   : > { %7757 = shalt.err (!%p7754_p10)
}
  0x3b   : > { %s9150_s4 = sld [smem:[#allocation39_spill]]  ;;  %s8231_s17 = sadd.s32 1, %s8058_s28  }
  0x3c   : > { %9151 = sst [smem:[#allocation32_spill]] %s8231_s17  ;;  %s179_s29 = ssub.s32 %s8058_s28, %s8231_s17 }
  0x3d   : > { %s182_s16 = sadd.s32 1, %s8054_s27  ;;  %p180_p11 = scmp.eq.s32.totalorder %s179_s29, 0 }
  0x3e   : > { %p189_p12 = scmp.ne.s32.totalorder %s8054_s27, %s8050_s26  ;;  %p190_p13 = scmp.eq.s32.totalorder %s8058_s28, 0 }
  0x3f   : > { %p195_p0 = scmp.ne.s32.totalorder %s8050_s26, %s8046_s25  ;;  %p7617_p9 = scmp.lt.s32.totalorder %s8058_s28, 4 }
  0x40   : > { %s8242_s19 = scalar_select %p180_p11, %s8054_s27, %s182_s16  }
  0x41   : > { %7586 = dma.hbm_to_vmem [thread:$0]  (!%p8186_p6), %s9150_s4, 13824, %s8190_s20, [#allocation12], %s9112_s23, %s9112_s23, %s9114_s24  }
  0x42   : > { %9152 = sst [smem:[#allocation33_spill]] %s8242_s19  ;;  %p191_p2 = por %p190_p13, %p189_p12 }
  0x43   : > { %p8246_p5 = por %p9116_p1, %p195_p0  ;;  %s453_s30 = sand.u32 1, %s8058_s28  }
  0x44   : > { %s8253_s20 = sand.u32 1, %s8054_s27   ;;  %s6285_s13 = sshll.u32 %s8058_s28, 7 }
  0x45   : > { %s9153_s22 = scalar_select %p8246_p5, 1, 0 }
  0x46   : > { %s7530_s11 = smul.u32 1152, %s8253_s20  ;;  %s9155_s7 = sld [smem:[#allocation40_spill]] }
  0x47   : > { %9154 = sst [smem:[#allocation34_spill]] %s9153_s22  ;;  %p8262_p8 = pnand %p7617_p9, %p191_p2 }
  0x48   : > { %s457_s16 = scalar_lea.vmem [#allocation16], %s7530_s11  ;;  %s8268_s2 = scalar_lea.sflag [#allocation6], %s453_s30 }
  0x49   : > { %s9156_s25 = scalar_select %p8262_p8, 1, 0 }
  0x4a   : > { %s464_s1 = sshll.u32 %s457_s16, 4  ;;  %p8274_p11 = pneg %p8262_p8  ;;  %s8266_s1 = int_to_ptr.vmem [resolvable:$true] %s464_s1 }
  0x4c   : > { %s8260_s24 = scalar_lea.hbm %s9155_s7, %s6285_s13  ;;  %s7763_s11 = scalar_lea.hbm %s9155_s7, 73728 }
  0x4d   : > { %s7758_s4 = scalar_lea.hbm %s8260_s24, 18432  ;;  %p7764_p0 = scmp.lt.s32.totalorder %s8260_s24, %s9155_s7 }
  0x4e   : > { %p7759_p10 = scmp.ne.s32.totalorder %s8260_s24, %s7758_s4  ;;  %p7765_p2 = scmp.lt.s32.totalorder %s7763_s11, %s7758_s4 }
  0x4f   : > { %s9157_s23 = scalar_select %p8274_p11, 1, 0 }
  0x50   : > { %p7761_p12 = pnand %p8274_p11, %p7759_p10  ;;  %p7766_p9 = por %p7765_p2, %p7764_p0 }
  0x52   : > { %p7762_p13 = pneg %p7761_p12 }
  0x54   : > { %p7767_p3 = pnand %p7766_p9, %p7762_p13 }
  0x56   : > { %7770 = shalt.err (!%p7767_p3)
}
  0x57   : > { %s7771_s30 = scalar_lea.vmem %s8266_s1, 18432  ;;  %s8065_s27 = smov [#allocation16]  }
  0x58   : > { %p7772_p1 = scmp.ne.s32.totalorder %s8266_s1, %s7771_s30  ;;  %s7776_s13 = sshll.u32 %s8065_s27, 4  ;;  %s7777_s13 = int_to_ptr.vmem [resolvable:$false] %s7776_s13 }
  0x59   : > { %s7778_s29 = scalar_lea.vmem %s7777_s13, 36864  ;;  %p7779_p5 = scmp.lt.s32.totalorder %s8266_s1, %s7777_s13 }
  0x5a   : > { %p7774_p10 = pnand %p7772_p1, %p8274_p11  ;;  %p7780_p4 = scmp.lt.s32.totalorder %s7778_s29, %s7771_s30 }
  0x5c   : > { %p7775_p12 = pneg %p7774_p10  ;;  %p7781_p6 = por %p7780_p4, %p7779_p5 }
  0x5e   : > { %p7782_p7 = pnand %p7781_p6, %p7775_p12 }
  0x60   : > { %7785 = shalt.err (!%p7782_p7)
}
  0x61   : > { %s8066_s4 = smov 512   ;;  %s9158_s19 = smov 8  }
  0x62   : > { %s9159_s11 = smov 128   ;;  %s8067_s16 = smov [#allocation10]  }
  0x63   : > { %7602 = dma.hbm_to_vmem [thread:$0]  (!%p8262_p8), %s8260_s24, 18432, %s8266_s1, %s8268_s2, %s8066_s4, %s9159_s11, %s9158_s19  }
  0x64   : > { %s382_s7 = sshll.u32 %s8067_s16, 4  ;;  %s8068_s27 = smov [#allocation13]   ;;  %s383_s7 = int_to_ptr.vmem [resolvable:$true] %s382_s7 }
  0x65   : > { %s406_s17 = sshll.u32 %s8068_s27, 4  ;;  %s7797_s13 = scalar_lea.vmem %s383_s7, 16  ;;  %s407_s17 = int_to_ptr.vmem [resolvable:$true] %s406_s17 }
  0x66   : > { %p7798_p1 = scmp.ne.s32.totalorder %s383_s7, %s7797_s13  ;;  %p9160_p3 = scmp.ne.s32.totalorder %s9147_s21, 0 }
  0x67   : > { %s7804_s30 = scalar_lea.vmem %s383_s7, 32  ;;  %p7805_p7 = scmp.lt.s32.totalorder %s383_s7, %s383_s7 }
  0x68   : > { %p7800_p4 = pnand %p7798_p1, %p9160_p3  ;;  %p7806_p5 = scmp.lt.s32.totalorder %s7804_s30, %s7797_s13 }
  0x6a   : > { %p7801_p6 = pneg %p7800_p4  ;;  %p7807_p13 = por %p7806_p5, %p7805_p7 }
  0x6c   : > { %p7808_p0 = pnand %p7807_p13, %p7801_p6 }
  0x6e   : > { %7811 = shalt.err (!%p7808_p0)
}
  0x6f   : > { %p9161_p2 = scmp.ne.s32.totalorder %s9146_s18, 0  ;;  %s9162_s3 = sld [smem:[#allocation38_spill]] }
  0x70   : > { %s6040_s24 = sshll.u32 %s8253_s20, 1  ;;  %s7823_s4 = scalar_lea.vmem %s407_s17, 16 }
  0x71   : > { %p7824_p9 = scmp.ne.s32.totalorder %s407_s17, %s7823_s4  ;;  %s7830_s16 = scalar_lea.vmem %s407_s17, 32 }
  0x72   : > { %p7831_p1 = scmp.lt.s32.totalorder %s407_s17, %s407_s17  ;;  %p7832_p4 = scmp.lt.s32.totalorder %s7830_s16, %s7823_s4 }
  0x73   : > { %p7826_p10 = pnand %p7824_p9, %p9160_p3 }
  0x74   : > { %p7833_p6 = por %p7832_p4, %p7831_p1 }
  0x75   : > { %7583 = dma.hbm_to_vmem [thread:$0]  (!%p9161_p2), %s9162_s3, 16, %s383_s7, [#allocation9]  }
  0x76   : > { %p7827_p12 = pneg %p7826_p10 }
  0x78   : > { %p7834_p7 = pnand %p7833_p6, %p7827_p12 }
  0x7a   : > { %7837 = shalt.err (!%p7834_p7)
}
  0x7b   : > { %7589 = dma.hbm_to_vmem [thread:$0]  (!%p9161_p2), %s9102_s5, 16, %s407_s17, [#allocation12]  }
  0x7c   : > { %s6286_s7 = sshll.u32 %s8058_s28, 5  ;;  %s478_s3 = scalar_lea.vmem [#allocation17], %s6040_s24 }
  0x7d   : > { %s484_s1 = scalar_lea.hbm %s9105_s8, %s6286_s7  ;;  %s486_s0 = sshll.u32 %s478_s3, 4  ;;  %s487_s0 = int_to_ptr.vmem [resolvable:$true] %s486_s0 }
  0x7e   : > { %s7838_s4 = scalar_lea.hbm %s484_s1, 32  ;;  %s7843_s27 = scalar_lea.hbm %s9105_s8, 128 }
  0x7f   : > { %p7839_p5 = scmp.ne.s32.totalorder %s484_s1, %s7838_s4  ;;  %p7844_p9 = scmp.lt.s32.totalorder %s484_s1, %s9105_s8 }
  0x80   : > { %p7845_p10 = scmp.lt.s32.totalorder %s7843_s27, %s7838_s4 }
  0x81   : > { %p7841_p13 = pnand %p7839_p5, %p8274_p11 }
  0x82   : > { %p7846_p12 = por %p7845_p10, %p7844_p9 }
  0x83   : > { %p7842_p0 = pneg %p7841_p13 }
  0x85   : > { %p7847_p1 = pnand %p7846_p12, %p7842_p0 }
  0x87   : > { %7850 = shalt.err (!%p7847_p1)
}
  0x88   : > { %s7851_s17 = scalar_lea.vmem %s487_s0, 32  ;;  %s8069_s3 = smov [#allocation17]  }
  0x89   : > { %p7852_p4 = scmp.ne.s32.totalorder %s487_s0, %s7851_s17  ;;  %s7856_s24 = sshll.u32 %s8069_s3, 4  ;;  %s7857_s24 = int_to_ptr.vmem [resolvable:$false] %s7856_s24 }
  0x8a   : > { %s7858_s7 = scalar_lea.vmem %s7857_s24, 64  ;;  %p7859_p5 = scmp.lt.s32.totalorder %s487_s0, %s7857_s24 }
  0x8b   : > { %p7854_p6 = pnand %p7852_p4, %p8274_p11  ;;  %p7860_p13 = scmp.lt.s32.totalorder %s7858_s7, %s7851_s17 }
  0x8d   : > { %p7855_p7 = pneg %p7854_p6  ;;  %p7861_p2 = por %p7860_p13, %p7859_p5 }
  0x8f   : > { %p7862_p3 = pnand %p7861_p2, %p7855_p7 }
  0x91   : > { %7865 = shalt.err (!%p7862_p3)
}
  0x92   : > { %7605 = dma.hbm_to_vmem [thread:$0]  (!%p8262_p8), %s484_s1, 32, %s487_s0, %s8268_s2  }
  0x93   : > { %s8070_s26 = smov [#allocation14]   ;;  %s8071_s30 = smov [#allocation19]  }
  0x94   : > { %s417_s22 = sshll.u32 %s8070_s26, 4  ;;  %s428_s29 = sshll.u32 %s8071_s30, 4  ;;  %s418_s22 = int_to_ptr.vmem [resolvable:$true] %s417_s22  ;;  %s429_s29 = int_to_ptr.vmem [resolvable:$true] %s428_s29 }
  0x95   : > { %s7877_s4 = scalar_lea.vmem %s418_s22, 16  ;;  %p9163_p9 = scmp.ne.s32.totalorder %s9147_s21, 0 }
  0x96   : > { %p7878_p0 = scmp.ne.s32.totalorder %s418_s22, %s7877_s4  ;;  %s7884_s16 = scalar_lea.vmem %s418_s22, 32 }
  0x97   : > { %p7885_p1 = scmp.lt.s32.totalorder %s418_s22, %s418_s22  ;;  %p7886_p4 = scmp.lt.s32.totalorder %s7884_s16, %s7877_s4 }
  0x98   : > { %p7880_p10 = pnand %p7878_p0, %p9163_p9 }
  0x99   : > { %p7887_p2 = por %p7886_p4, %p7885_p1 }
  0x9a   : > { %p7881_p12 = pneg %p7880_p10 }
  0x9c   : > { %p7888_p3 = pnand %p7887_p2, %p7881_p12 }
  0x9e   : > { %7891 = shalt.err (!%p7888_p3)
}
  0x9f   : > { %p9164_p6 = scmp.ne.s32.totalorder %s9146_s18, 0  ;;  %s7903_s1 = scalar_lea.vmem %s429_s29, 32 }
  0xa0   : > { %p7904_p7 = scmp.ne.s32.totalorder %s429_s29, %s7903_s1  ;;  %p7911_p0 = scmp.lt.s32.totalorder %s429_s29, %s429_s29 }
  0xa1   : > { %7592 = dma.hbm_to_vmem [thread:$0]  (!%p9164_p6), %s9103_s6, 16, %s418_s22, [#allocation15]  }
  0xa2   : > { %p7906_p5 = pnand %p7904_p7, %p9163_p9  ;;  %p7912_p10 = scmp.lt.s32.totalorder %s7903_s1, %s7903_s1 }
  0xa4   : > { %p7907_p13 = pneg %p7906_p5  ;;  %p7913_p8 = por %p7912_p10, %p7911_p0 }
  0xa6   : > { %p7914_p11 = pnand %p7913_p8, %p7907_p13 }
  0xa8   : > { %7917 = shalt.err (!%p7914_p11)
}
  0xa9   : > { %7595 = dma.hbm_to_vmem [thread:$0]  (!%p9164_p6), %s9107_s10, 32, %s429_s29, [#allocation9]  }
  0xaa   : > { %s8072_s3 = smov [#allocation20]   ;;  %s6043_s7 = sshll.u32 %s8253_s20, 8 }
  0xab   : > { %s442_s24 = sshll.u32 %s8072_s3, 4  ;;  %s443_s24 = int_to_ptr.vmem [resolvable:$true] %s442_s24 }
  0xac   : > { %s7929_s26 = scalar_lea.vmem %s443_s24, 16  ;;  %s7936_s22 = scalar_lea.vmem %s443_s24, 32 }
  0xad   : > { %p7930_p12 = scmp.ne.s32.totalorder %s443_s24, %s7929_s26  ;;  %p7937_p8 = scmp.lt.s32.totalorder %s443_s24, %s443_s24 }
  0xae   : > { %p7938_p11 = scmp.lt.s32.totalorder %s7936_s22, %s7929_s26 }
  0xaf   : > { %p7932_p1 = pnand %p7930_p12, %p9163_p9 }
  0xb0   : > { %p7939_p2 = por %p7938_p11, %p7937_p8 }
  0xb1   : > { %p7933_p4 = pneg %p7932_p1 }
  0xb3   : > { %p7940_p3 = pnand %p7939_p2, %p7933_p4 }
  0xb5   : > { %7943 = shalt.err (!%p7940_p3)
}
  0xb6   : > { %7598 = dma.hbm_to_vmem [thread:$0]  (!%p9164_p6), %s9109_s12, 16, %s443_s24, [#allocation12]  }
  0xb7   : > { %s6288_s20 = sshll.u32 %s8058_s28, 12  ;;  %s497_s29 = scalar_lea.vmem [#allocation18], %s6043_s7 }
  0xb8   : > { %s505_s16 = sshll.u32 %s497_s29, 4  ;;  %s8357_s0 = scalar_lea.hbm %s9106_s9, %s6288_s20  ;;  %s506_s16 = int_to_ptr.vmem [resolvable:$true] %s505_s16 }
  0xb9   : > { %s7944_s1 = scalar_lea.hbm %s8357_s0, 4096  ;;  %p9165_p7 = scmp.ne.s32.totalorder %s9157_s23, 0 }
  0xba   : > { %p7945_p9 = scmp.ne.s32.totalorder %s8357_s0, %s7944_s1  ;;  %s7949_s28 = scalar_lea.hbm %s9106_s9, 16384 }
  0xbb   : > { %p7950_p6 = scmp.lt.s32.totalorder %s8357_s0, %s9106_s9  ;;  %p7951_p0 = scmp.lt.s32.totalorder %s7949_s28, %s7944_s1 }
  0xbc   : > { %p7947_p5 = pnand %p7945_p9, %p9165_p7 }
  0xbd   : > { %p7952_p10 = por %p7951_p0, %p7950_p6 }
  0xbe   : > { %p7948_p13 = pneg %p7947_p5 }
  0xc0   : > { %p7953_p12 = pnand %p7952_p10, %p7948_p13 }
  0xc2   : > { %7956 = shalt.err (!%p7953_p12)
}
  0xc3   : > { %s7957_s24 = scalar_lea.vmem %s506_s16, 4096  ;;  %s8073_s7 = smov [#allocation18]  }
  0xc4   : > { %p7958_p1 = scmp.ne.s32.totalorder %s506_s16, %s7957_s24  ;;  %s7962_s26 = sshll.u32 %s8073_s7, 4  ;;  %s7963_s26 = int_to_ptr.vmem [resolvable:$false] %s7962_s26 }
  0xc5   : > { %s7964_s22 = scalar_lea.vmem %s7963_s26, 8192  ;;  %p7965_p11 = scmp.lt.s32.totalorder %s506_s16, %s7963_s26 }
  0xc6   : > { %p7960_p4 = pnand %p7958_p1, %p9165_p7  ;;  %p7966_p2 = scmp.lt.s32.totalorder %s7964_s22, %s7957_s24 }
  0xc8   : > { %p7961_p8 = pneg %p7960_p4  ;;  %p7967_p3 = por %p7966_p2, %p7965_p11 }
  0xca   : > { %p7968_p9 = pnand %p7967_p3, %p7961_p8 }
  0xcc   : > { %7971 = shalt.err (!%p7968_p9)
}
  0xcd   : > { %p9166_p5 = scmp.ne.s32.totalorder %s9156_s25, 0  ;;  %p9167_p7 = scmp.ne.s32.totalorder %s9145_s15, 0 }
  0xce   : > { %p9168_p13 = scmp.eq.s32.totalorder (!%p9167_p7), %s8172_s14, 0 }
  0xcf   : > { %7608 = dma.hbm_to_vmem [thread:$0]  (!%p9166_p5), %s8357_s0, 4096, %s506_s16, %s8268_s2, %s9159_s11, %s9159_s11, %s9158_s19  }
  0xd0   : > { %517 = sbr.rel (%p9167_p7) target bundleno = 2375 (0x947), region = 72 }
  0xd5   : > { %8013 = dma.done.wait (%p9168_p13), [#allocation6], 8064   ;;  %p9169_p6 = pmov %p9168_p13 }
  0xd7   : > { %8015 = vsyncadd (%p9169_p6), [#allocation6], 4294959232  ;;  %p9170_p0 = pmov %p9169_p6 }
  0xd9   : > { %8017 = dma.done.wait (%p9170_p0), [#allocation9], 32   ;;  %p9171_p10 = pmov %p9170_p0 }
  0xda   : > { %p9172_p12 = pmov %p9170_p0 }
  0xdb   : > { %8019 = vsyncadd (%p9171_p10), [#allocation9], 4294967264 }
  0xdc   : > { %8021 = dma.done.wait (%p9172_p12), [#allocation12], 13840   ;;  %p9173_p1 = pmov %p9170_p0 }
  0xdd   : > { %p9174_p4 = pmov %p9170_p0 }
  0xde   : > { %8023 = vsyncadd (%p9173_p1), [#allocation12], 4294953456 }
  0xdf   : > { %8025 = dma.done.wait (%p9174_p4), [#allocation15], 16   ;;  %p9175_p8 = pmov %p9170_p0 }
  0xe0   : > { %s9176_s2 = sld [smem:[#allocation30_spill]]  ;;  %s543_s25 = sand.u32 1, %s8172_s14  }
  0xe1   : > { %8027 = vsyncadd (%p9175_p8), [#allocation15], 4294967280  ;;  %s9177_s15 = sld [smem:[#allocation34_spill]]  ;;  %s544_s11 = scalar_lea.sflag [#allocation6], %s543_s25 }
  0xe6   : > { %s545_s23 = sand.u32 1, %s9176_s2  }
  0xe7   : > { %s7531_s19 = smul.u32 1152, %s545_s23  ;;  %p9178_p11 = scmp.ne.s32.totalorder %s9177_s15, 0 }
  0xe9   : > { %s8399_s30 = scalar_lea.vmem [#allocation16], %s7531_s19 }
  0xea   : > { %8029 = dma.done.wait (%p9178_p11), %s544_s11, 22560  }
  0xeb   : > { %8031 = vsyncadd (%p9178_p11), %s544_s11, 4294944736  ;;  %s6054_s4 = sshll.u32 %s545_s23, 1  ;;  %s6055_s20 = sshll.u32 %s545_s23, 8 }
  0xec   : > { %s8405_s29 = scalar_lea.vmem [#allocation17], %s6054_s4  ;;  %s8407_s16 = scalar_lea.vmem [#allocation18], %s6055_s20 }
  0xed   : > { %p9179_p2 = pmov %p9170_p0 }
  0xee   : > { %p9180_p3 = pmov %p9170_p0 }
  0xef   : > { %8033 = dma.done.wait (%p9179_p2), [#allocation9], 32  }
  0xf0   : > { %8035 = vsyncadd (%p9180_p3), [#allocation9], 4294967264  ;;  %p9181_p9 = pmov %p9170_p0 }
  0xf1   : > { %p9182_p5 = pmov %p9170_p0 }
  0xf2   : > { %8037 = dma.done.wait (%p9181_p9), [#allocation12], 16  }
  0xf3   : > { %8039 = vsyncadd (%p9182_p5), [#allocation12], 4294967280  ;;  %p9183_p7 = scmp.ne.s32.totalorder %s8172_s14, 0 }
  0xf4   : > { %s9184_s0 = sld [smem:[#allocation35_spill]] (!%p9183_p7)  ;;  %s8074_s1 = smov (!%p9183_p7), 124  }
  0xf5   : > { %627 = sbr.rel (%p9183_p7) target bundleno = 1550 (0x60e), region = 120  ;;  %s8075_s18 = smov (!%p9183_p7), 120  }
  0xf6   : > { %s8076_s25 = smov (!%p9183_p7), 112  }
  0xfa   : > { %v8422_v0 = vld [vmem:[%s9184_s0] sm:$0xff]  ;;  %vm655_vm0 = vcmask 457728   ;;  %v8434_v3 = vld [vmem:[%s9184_s0 + $0x8] sm:$0x3f]  ;;  %v646_v5 = vld [vmem:[#allocation5 + $0x58] sm:$0xff]  ;;  %vm1485_vm1 = vcmask 914432  }
  0xfb   : > { %651 = vrot.lane.b32.xlu0 %v8422_v0, %s8074_s1  ;;  %822 = vrot.lane.b32.xlu1 %v8422_v0, %s8075_s18  ;;  %v907_v1 = vld [vmem:[%s9184_s0 + $0x1] sm:$0xff]  ;;  %v908_v6 = vld [vmem:[%s9184_s0 + $0x9] sm:$0x3f]  ;;  %v916_v8 = vld [vmem:[#allocation5 + $0xd8] sm:$0xff]  ;;  %vm1483_vm2 = vcmask 916480   ;;  %vm1520_vm3 = vcmask 785408  }
  0xfc   : > { %v648_v2 = vld [vmem:[#allocation5 + $0x68] sm:$0xff]  ;;  %v647_v4 = vld [vmem:[#allocation5 + $0x60] sm:$0xff]  ;;  %6803 = vmatprep.mubr.msk.f32.mxu1 %vm655_vm0, %v907_v1  ;;  %v645_v7 = vld [vmem:[#allocation5 + $0x50] sm:$0xff]  ;;  %6789 = vmatprep.subr.mxu1 %v916_v8  ;;  %vm2384_vm4 = vcmask 781312  }
  0xfd   : > { %6738 = vmatprep.subr.mxu0 %v648_v2  ;;  %v644_v9 = vld [vmem:[#allocation5 + $0x48] sm:$0xff]  ;;  %v915_v10 = vld [vmem:[#allocation5 + $0xd0] sm:$0xff]  ;;  %6790 = vmatpush3.msra.mxu1 %v916_v8  ;;  %v643_v12 = vld [vmem:[#allocation5 + $0x40] sm:$0xff] }
  0xfe   : > { %6739 = vmatpush3.msra.mxu0 %v648_v2  ;;  %6791 = vmatprep.subr.mxu1 %v915_v10  ;;  %v914_v11 = vld [vmem:[#allocation5 + $0xc8] sm:$0xff]  ;;  %v913_v13 = vld [vmem:[#allocation5 + $0xc0] sm:$0xff]  ;;  %v642_v16 = vld [vmem:[#allocation5 + $0x38] sm:$0xff] }
  0xff   : > { %6740 = vmatprep.subr.mxu0 %v647_v4  ;;  %653 = vrot.lane.b32.xlu0 %v8434_v3, %s8074_s1  ;;  %v8451_v14 = vld [vmem:[%s9184_s0 + $0x2] sm:$0xff]  ;;  %v8456_v15 = vld [vmem:[%s9184_s0 + $0xa] sm:$0x3f]  ;;  %v912_v17 = vld [vmem:[#allocation5 + $0xb8] sm:$0xff] }
 0x100   : > { %824 = vrot.lane.b32.xlu1 %v8434_v3, %s8075_s18  ;;  %6741 = vmatpush3.msra.mxu0 %v647_v4  ;;  %v640_v18 = vld [vmem:[#allocation5 + $0x30] sm:$0xff]  ;;  %v910_v20 = vld [vmem:[#allocation5 + $0xa8] sm:$0xff]  ;;  %v1099_v22 = vld [vmem:[#allocation5 + $0x140] sm:$0xff] }
 0x101   : > { %6742 = vmatprep.subr.mxu0 %v646_v5  ;;  %6792 = vmatpush3.msra.mxu1 %v915_v10  ;;  %v911_v19 = vld [vmem:[#allocation5 + $0xb0] sm:$0xff]  ;;  %v1100_v21 = vld [vmem:[#allocation5 + $0x148] sm:$0xff]  ;;  %v1098_v23 = vld [vmem:[#allocation5 + $0x138] sm:$0xff] }
 0x102   : > { %6743 = vmatpush3.msra.mxu0 %v646_v5  ;;  %6793 = vmatprep.subr.mxu1 %v914_v11  ;;  %v1097_v24 = vld [vmem:[#allocation5 + $0x130] sm:$0xff]  ;;  %v1096_v25 = vld [vmem:[#allocation5 + $0x128] sm:$0xff]  ;;  %v1095_v26 = vld [vmem:[#allocation5 + $0x120] sm:$0xff] }
 0x103   : > { %1008 = vrot.lane.b32.xlu0 %v907_v1, %s8074_s1  ;;  %6744 = vmatprep.subr.mxu0 %v645_v7  ;;  %v1094_v27 = vld [vmem:[#allocation5 + $0x118] sm:$0xff]  ;;  %v639_v32 = vld [vmem:[#allocation5 + $0x28] sm:$0xff]  ;;  %v638_v34 = vld [vmem:[#allocation5 + $0x20] sm:$0xff] }
 0x104   : > { %1010 = vrot.lane.b32.xlu1 %v908_v6, %s8074_s1  ;;  %6745 = vmatpush3.msra.mxu0 %v645_v7  ;;  %v1286_v28 = vld [vmem:[#allocation5 + $0x1b8] sm:$0xff]  ;;  %v636_v38 = vld [vmem:[#allocation5 + $0x10] sm:$0xff]  ;;  %v635_v39 = vld [vmem:[#allocation5 + $0x8] sm:$0xff] }
 0x105   : > { %6746 = vmatprep.subr.mxu0 %v644_v9  ;;  %6794 = vmatpush3.msra.mxu1 %v914_v11  ;;  %v637_v35 = vld [vmem:[#allocation5 + $0x18] sm:$0xff]  ;;  %v1285_v42 = vld [vmem:[#allocation5 + $0x1b0] sm:$0xff]  ;;  %v634_v43 = vld [vmem:[#allocation5] sm:$0xff] }
 0x106   : > { %6747 = vmatpush3.msra.mxu0 %v644_v9  ;;  %6795 = vmatprep.subr.mxu1 %v913_v13  ;;  %v1284_v44 = vld [vmem:[#allocation5 + $0x1a8] sm:$0xff]  ;;  %v821_v45 = vld [vmem:[#allocation5 + $0xa0] sm:$0xff]  ;;  %v820_v46 = vld [vmem:[#allocation5 + $0x98] sm:$0xff] }
 0x107   : > { %1101 = vrot.lane.b32.xlu0 %v907_v1, %s8075_s18  ;;  %6748 = vmatprep.subr.mxu0 %v643_v12  ;;  %v1283_v47 = vld [vmem:[#allocation5 + $0x1a0] sm:$0xff]  ;;  %v819_v48 = vld [vmem:[#allocation5 + $0x90] sm:$0xff]  ;;  %v1282_v49 = vld [vmem:[#allocation5 + $0x198] sm:$0xff] }
 0x108   : > { %1103 = vrot.lane.b32.xlu1 %v908_v6, %s8075_s18  ;;  %6749 = vmatpush3.msra.mxu0 %v643_v12  ;;  %v818_v50 = vld [vmem:[#allocation5 + $0x88] sm:$0xff]  ;;  %v1281_v51 = vld [vmem:[#allocation5 + $0x190] sm:$0xff]  ;;  %v817_v52 = vld [vmem:[#allocation5 + $0x80] sm:$0xff] }
 0x109   : > { %6750 = vmatprep.subr.mxu0 %v642_v16  ;;  %6796 = vmatpush3.msra.mxu1 %v913_v13  ;;  %v1280_v53 = vld [vmem:[#allocation5 + $0x188] sm:$0xff]  ;;  %v816_v54 = vld [vmem:[#allocation5 + $0x78] sm:$0xff]  ;;  %v815_v56 = vld [vmem:[#allocation5 + $0x70] sm:$0xff] }
 0x10a   : > { %6751 = vmatpush3.msra.mxu0 %v642_v16  ;;  %6797 = vmatprep.subr.mxu1 %v912_v17  ;;  %v1007_v58 = vld [vmem:[#allocation5 + $0x110] sm:$0xff]  ;;  %v1006_v59 = vld [vmem:[#allocation5 + $0x108] sm:$0xff]  ;;  %v1005_v60 = vld [vmem:[#allocation5 + $0x100] sm:$0xff] }
 0x10b   : > { %1287 = vrot.lane.b32.xlu0 %v8451_v14, %s8074_s1  ;;  %6755 = vmatprep.subr.mxu0 %v640_v18  ;;  %v1004_v61 = vld [vmem:[#allocation5 + $0xf8] sm:$0xff]  ;;  %v1003_v62 = vld [vmem:[#allocation5 + $0xf0] sm:$0xff]  ;;  %v1002_v63 = vld [vmem:[#allocation5 + $0xe8] sm:$0xff] }
 0x10c   : > { %1289 = vrot.lane.b32.xlu1 %v8456_v15, %s8074_s1  ;;  %6798 = vmatpush3.msra.mxu1 %v912_v17  ;;  %v1195_v1 = vld [vmem:[#allocation5 + $0x180] sm:$0xff]  ;;  %v1194_v2 = vld [vmem:[#allocation5 + $0x178] sm:$0xff]  ;;  %v1192_v4 = vld [vmem:[#allocation5 + $0x168] sm:$0xff] }
 0x10d   : > { %6799 = vmatprep.subr.mxu1 %v911_v19  ;;  %v1191_v5 = vld [vmem:[#allocation5 + $0x160] sm:$0xff]  ;;  %v1189_v7 = vld [vmem:[#allocation5 + $0x150] sm:$0xff]  ;;  %v1378_v10 = vld [vmem:[#allocation5 + $0x1e8] sm:$0xff] }
 0x10e   : > { %6800 = vmatpush3.msra.mxu1 %v911_v19  ;;  %v1379_v8 = vld [vmem:[#allocation5 + $0x1f0] sm:$0xff]  ;;  %v1377_v11 = vld [vmem:[#allocation5 + $0x1e0] sm:$0xff]  ;;  %v1376_v12 = vld [vmem:[#allocation5 + $0x1d8] sm:$0xff] }
 0x10f   : > { %1380 = vrot.lane.b32.xlu0 %v8451_v14, %s8075_s18  ;;  %6801 = vmatprep.subr.mxu1 %v910_v20  ;;  %v1375_v13 = vld [vmem:[#allocation5 + $0x1d0] sm:$0xff]  ;;  %v1373_v16 = vld [vmem:[#allocation5 + $0x1c0] sm:$0xff] }
 0x110   : > { %1382 = vrot.lane.b32.xlu1 %v8456_v15, %s8075_s18  ;;  %6802 = vmatpush3.msra.mxu1 %v910_v20  ;;  %v1500_v17 = vld [vmem:[#allocation11 + $0x58] sm:$0xff]  ;;  %v1498_v19 = vld [vmem:[#allocation11 + $0x48] sm:$0xff]  ;;  %v1497_v20 = vld [vmem:[#allocation11 + $0x40] sm:$0xff] }
 0x111   : > { %6804 = vmatmul.mubr.msk.f32.vlgmr.msra.gmra.mxu1 %vm655_vm0, %v908_v6  ;;  %6823 = vmatprep.subr.mxu1 %v1100_v21  ;;  %v1190_v6 = vld [vmem:[#allocation5 + $0x158] sm:$0xff] }
 0x112   : > { %6824 = vmatpush3.msra.mxu1 %v1100_v21  ;;  %v1496_v21 = vld [vmem:[#allocation11 + $0x38] sm:$0xff] }
 0x113   : > { %6825 = vmatprep.subr.mxu1 %v1099_v22 }
 0x114   : > { %6826 = vmatpush3.msra.mxu1 %v1099_v22  ;;  %v1495_v22 = vld [vmem:[#allocation11 + $0x30] sm:$0xff] }
 0x115   : > { %6827 = vmatprep.subr.mxu1 %v1098_v23 }
 0x116   : > { %6828 = vmatpush3.msra.mxu1 %v1098_v23  ;;  %v1494_v23 = vld [vmem:[#allocation11 + $0x28] sm:$0xff] }
 0x117   : > { %6829 = vmatprep.subr.mxu1 %v1097_v24 }
 0x118   : > { %6830 = vmatpush3.msra.mxu1 %v1097_v24  ;;  %v1493_v24 = vld [vmem:[#allocation11 + $0x20] sm:$0xff] }
 0x119   : > { %6831 = vmatprep.subr.mxu1 %v1096_v25 }
 0x11a   : > { %6832 = vmatpush3.msra.mxu1 %v1096_v25  ;;  %v1492_v25 = vld [vmem:[#allocation11 + $0x18] sm:$0xff] }
 0x11b   : > { %6833 = vmatprep.subr.mxu1 %v1095_v26 }
 0x11c   : > { %6834 = vmatpush3.msra.mxu1 %v1095_v26  ;;  %v1491_v26 = vld [vmem:[#allocation11 + $0x10] sm:$0xff] }
 0x11d   : > { %6835 = vmatprep.subr.mxu1 %v1094_v27 }
 0x11e   : > { %6836 = vmatpush3.msra.mxu1 %v1094_v27  ;;  %v1490_v27 = vld [vmem:[#allocation11 + $0x8] sm:$0xff] }
 0x11f   : > { %6857 = vmatprep.subr.mxu1 %v1286_v28 }
 0x16d   : > { %v652_v29 = vpop.permute.xlu0 %651  ;;  %v823_v30 = vpop.permute.xlu1 %822 }
 0x16e   : > { %6752 = vmatprep.mubr.msk.f32.mxu0 %vm655_vm0, %v652_v29  ;;  %v8496_v29 = vld [vmem:[#allocation11 + $0x178] sm:$0xff] }
 0x171   : > { %v654_v31 = vpop.permute.xlu0 %653 }
 0x172   : > { %v8468_v33 = vpop.permute.xlu1 %824  ;;  %6753 = vmatmul.mubr.msk.f32.vlgmr.msra.gmra.mxu0 %vm655_vm0, %v654_v31  ;;  %v1512_v31 = vld [vmem:[#allocation11 + $0xb0] sm:$0xff] }
 0x173   : > { %6756 = vmatpush3.msra.mxu0 %v640_v18  ;;  %6769 = vmatprep.mubr.msk.f32.mxu0 %vm655_vm0, %v8422_v0  ;;  %v1001_v0 = vld [vmem:[#allocation5 + $0xe0] sm:$0xff]  ;;  %v1499_v18 = vld [vmem:[#allocation11 + $0x50] sm:$0xff] }
 0x174   : > { %6757 = vmatprep.subr.mxu0 %v639_v32 }
 0x175   : > { %6758 = vmatpush3.msra.mxu0 %v639_v32  ;;  %v8473_v36 = vpop.permute.xlu0 %1008  ;;  %v1511_v32 = vld [vmem:[#allocation11 + $0xa8] sm:$0xff] }
 0x176   : > { %v8475_v37 = vpop.permute.xlu1 %1010  ;;  %6759 = vmatprep.subr.mxu0 %v638_v34 }
 0x177   : > { %6760 = vmatpush3.msra.mxu0 %v638_v34  ;;  %v1509_v34 = vld [vmem:[#allocation11 + $0x98] sm:$0xff] }
 0x178   : > { %6761 = vmatprep.subr.mxu0 %v637_v35 }
 0x179   : > { %6762 = vmatpush3.msra.mxu0 %v637_v35  ;;  %v1102_v40 = vpop.permute.xlu0 %1101  ;;  %v1508_v35 = vld [vmem:[#allocation11 + $0x90] sm:$0xff] }
 0x17a   : > { %v1104_v41 = vpop.permute.xlu1 %1103  ;;  %6763 = vmatprep.subr.mxu0 %v636_v38  ;;  %6837 = vmatprep.mubr.msk.f32.mxu1 %vm655_vm0, %v1102_v40  ;;  %v1503_v40 = vld [vmem:[#allocation11 + $0x68] sm:$0xff] }
 0x17b   : > { %6764 = vmatpush3.msra.mxu0 %v636_v38  ;;  %6838 = vmatmul.mubr.msk.f32.vlgmr.msra.gmra.mxu1 %vm655_vm0, %v1104_v41  ;;  %v1505_v38 = vld [vmem:[#allocation11 + $0x78] sm:$0xff] }
 0x17c   : > { %6765 = vmatprep.subr.mxu0 %v635_v39  ;;  %6858 = vmatpush3.msra.mxu1 %v1286_v28  ;;  %v1489_v28 = vld [vmem:[#allocation11] sm:$0xff] }
 0x17d   : > { %6766 = vmatpush3.msra.mxu0 %v635_v39  ;;  %6859 = vmatprep.subr.mxu1 %v1285_v42  ;;  %v1288_v55 = vpop.permute.xlu0 %1287  ;;  %v1504_v39 = vld [vmem:[#allocation11 + $0x70] sm:$0xff] }
 0x17e   : > { %6767 = vmatprep.subr.mxu0 %v634_v43  ;;  %6860 = vmatpush3.msra.mxu1 %v1285_v42  ;;  %v1290_v57 = vpop.permute.xlu1 %1289 }
 0x17f   : > { %6768 = vmatpush3.msra.mxu0 %v634_v43  ;;  %6861 = vmatprep.subr.mxu1 %v1284_v44 }
 0x180   : > { %6770 = vmatmul.mubr.msk.f32.vlgmr.msra.gmra.mxu0 %vm655_vm0, %v8434_v3  ;;  %6772 = vmatprep.subr.mxu0 %v821_v45  ;;  %v1193_v3 = vld [vmem:[#allocation5 + $0x170] sm:$0xff] }
 0x181   : > { %6773 = vmatpush3.msra.mxu0 %v821_v45  ;;  %6786 = vmatprep.mubr.msk.f32.mxu0 %vm655_vm0, %v823_v30  ;;  %v1381_v9 = vpop.permute.xlu0 %1380  ;;  %v1513_v30 = vld [vmem:[#allocation11 + $0xb8] sm:$0xff] }
 0x182   : > { %6774 = vmatprep.subr.mxu0 %v820_v46  ;;  %6862 = vmatpush3.msra.mxu1 %v1284_v44 }
 0x183   : > { %6775 = vmatpush3.msra.mxu0 %v820_v46  ;;  %6863 = vmatprep.subr.mxu1 %v1283_v47 }
 0x184   : > { %6776 = vmatprep.subr.mxu0 %v819_v48  ;;  %6864 = vmatpush3.msra.mxu1 %v1283_v47 }
 0x185   : > { %6777 = vmatpush3.msra.mxu0 %v819_v48  ;;  %6865 = vmatprep.subr.mxu1 %v1282_v49 }
 0x186   : > { %6778 = vmatprep.subr.mxu0 %v818_v50  ;;  %6866 = vmatpush3.msra.mxu1 %v1282_v49 }
 0x187   : > { %6779 = vmatpush3.msra.mxu0 %v818_v50  ;;  %6867 = vmatprep.subr.mxu1 %v1281_v51 }
 0x188   : > { %6780 = vmatprep.subr.mxu0 %v817_v52  ;;  %6868 = vmatpush3.msra.mxu1 %v1281_v51 }
 0x189   : > { %6781 = vmatpush3.msra.mxu0 %v817_v52  ;;  %6869 = vmatprep.subr.mxu1 %v1280_v53 }
 0x18a   : > { %6782 = vmatprep.subr.mxu0 %v816_v54  ;;  %6870 = vmatpush3.msra.mxu1 %v1280_v53 }
 0x18b   : > { %6783 = vmatpush3.msra.mxu0 %v816_v54  ;;  %6871 = vmatprep.mubr.msk.f32.mxu1 %vm655_vm0, %v1288_v55 }
 0x18c   : > { %6784 = vmatprep.subr.mxu0 %v815_v56  ;;  %6872 = vmatmul.mubr.msk.f32.vlgmr.msra.gmra.mxu1 %vm655_vm0, %v1290_v57 }
 0x18d   : > { %6785 = vmatpush3.msra.mxu0 %v815_v56  ;;  %6891 = vmatprep.subr.mxu1 %v1513_v30 }
 0x18e   : > { %6787 = vmatmul.mubr.msk.f32.vlgmr.msra.gmra.mxu0 %vm655_vm0, %v8468_v33  ;;  %6806 = vmatprep.subr.mxu0 %v1007_v58  ;;  %v1510_v33 = vld [vmem:[#allocation11 + $0xa0] sm:$0xff] }
 0x18f   : > { %6807 = vmatpush3.msra.mxu0 %v1007_v58  ;;  %6820 = vmatprep.mubr.msk.f32.mxu0 %vm655_vm0, %v8473_v36  ;;  %v1507_v36 = vld [vmem:[#allocation11 + $0x88] sm:$0xff] }
 0x190   : > { %6808 = vmatprep.subr.mxu0 %v1006_v59  ;;  %6892 = vmatpush3.msra.mxu1 %v1513_v30  ;;  %v1785_v30 = vld [vmem:[#allocation11 + $0x148] sm:$0xff] }
 0x191   : > { %6809 = vmatpush3.msra.mxu0 %v1006_v59  ;;  %6893 = vmatprep.subr.mxu1 %v1512_v31 }
 0x192   : > { %6810 = vmatprep.subr.mxu0 %v1005_v60  ;;  %6894 = vmatpush3.msra.mxu1 %v1512_v31  ;;  %v1784_v31 = vld [vmem:[#allocation11 + $0x140] sm:$0xff] }
 0x193   : > { %6811 = vmatpush3.msra.mxu0 %v1005_v60  ;;  %6895 = vmatprep.subr.mxu1 %v1511_v32 }
 0x194   : > { %6812 = vmatprep.subr.mxu0 %v1004_v61  ;;  %6896 = vmatpush3.msra.mxu1 %v1511_v32 }
 0x195   : > { %6813 = vmatpush3.msra.mxu0 %v1004_v61  ;;  %6897 = vmatprep.subr.mxu1 %v1510_v33 }
 0x196   : > { %6814 = vmatprep.subr.mxu0 %v1003_v62  ;;  %6898 = vmatpush3.msra.mxu1 %v1510_v33  ;;  %v1783_v33 = vld [vmem:[#allocation11 + $0x138] sm:$0xff] }
 0x197   : > { %6815 = vmatpush3.msra.mxu0 %v1003_v62  ;;  %6899 = vmatprep.subr.mxu1 %v1509_v34 }
 0x198   : > { %6816 = vmatprep.subr.mxu0 %v1002_v63  ;;  %6900 = vmatpush3.msra.mxu1 %v1509_v34 }
 0x199   : > { %6817 = vmatpush3.msra.mxu0 %v1002_v63  ;;  %6901 = vmatprep.subr.mxu1 %v1508_v35 }
 0x19a   : > { %6818 = vmatprep.subr.mxu0 %v1001_v0  ;;  %6902 = vmatpush3.msra.mxu1 %v1508_v35  ;;  %v1782_v35 = vld [vmem:[#allocation11 + $0x130] sm:$0xff] }
 0x19b   : > { %6819 = vmatpush3.msra.mxu0 %v1001_v0  ;;  %6903 = vmatprep.subr.mxu1 %v1507_v36 }
 0x19c   : > { %6821 = vmatmul.mubr.msk.f32.vlgmr.msra.gmra.mxu0 %vm655_vm0, %v8475_v37  ;;  %6840 = vmatprep.subr.mxu0 %v1195_v1  ;;  %v1506_v37 = vld [vmem:[#allocation11 + $0x80] sm:$0xff] }
 0x19d   : > { %6841 = vmatpush3.msra.mxu0 %v1195_v1  ;;  %6854 = vmatprep.mubr.msk.f32.mxu0 %vm655_vm0, %v8451_v14  ;;  %v1374_v14 = vld [vmem:[#allocation5 + $0x1c8] sm:$0xff] }
 0x19e   : > { %6842 = vmatprep.subr.mxu0 %v1194_v2  ;;  %6904 = vmatpush3.msra.mxu1 %v1507_v36  ;;  %v1781_v36 = vld [vmem:[#allocation11 + $0x128] sm:$0xff] }
 0x19f   : > { %6843 = vmatpush3.msra.mxu0 %v1194_v2  ;;  %6905 = vmatprep.subr.mxu1 %v1506_v37 }
 0x1a0   : > { %6844 = vmatprep.subr.mxu0 %v1193_v3  ;;  %6906 = vmatpush3.msra.mxu1 %v1506_v37  ;;  %v8529_v37 = vld [vmem:[%s9184_s0 + $0x18] sm:$0x3f] }
 0x1a1   : > { %6845 = vmatpush3.msra.mxu0 %v1193_v3  ;;  %6907 = vmatprep.subr.mxu1 %v1505_v38 }
 0x1a2   : > { %6846 = vmatprep.subr.mxu0 %v1192_v4  ;;  %6908 = vmatpush3.msra.mxu1 %v1505_v38  ;;  %v1780_v38 = vld [vmem:[#allocation11 + $0x120] sm:$0xff] }
 0x1a3   : > { %6847 = vmatpush3.msra.mxu0 %v1192_v4  ;;  %6909 = vmatprep.subr.mxu1 %v1504_v39 }
 0x1a4   : > { %6848 = vmatprep.subr.mxu0 %v1191_v5  ;;  %6910 = vmatpush3.msra.mxu1 %v1504_v39  ;;  %v8536_v39 = vld [vmem:[%s9184_s0 + $0x10] sm:$0xff] }
 0x1a5   : > { %6849 = vmatpush3.msra.mxu0 %v1191_v5  ;;  %6911 = vmatprep.subr.mxu1 %v1503_v40 }
 0x1a6   : > { %6850 = vmatprep.subr.mxu0 %v1190_v6  ;;  %6912 = vmatpush3.msra.mxu1 %v1503_v40  ;;  %v1985_v40 = vld [vmem:[#allocation11 + $0x238] sm:$0xff] }
 0x1a7   : > { %6851 = vmatpush3.msra.mxu0 %v1190_v6  ;;  %v6077_v6 = vld [vmem:[#allocation8] ss:$0 sm:$0xff] }
 0x1a8   : > { %6852 = vmatprep.subr.mxu0 %v1189_v7 }
 0x1a9   : > { %6853 = vmatpush3.msra.mxu0 %v1189_v7 }
 0x1aa   : > { %6855 = vmatmul.mubr.msk.f32.vlgmr.msra.gmra.mxu0 %vm655_vm0, %v8456_v15  ;;  %6874 = vmatprep.subr.mxu0 %v1379_v8  ;;  %v1383_v15 = vpop.permute.xlu1 %1382 }
 0x1ab   : > { %6875 = vmatpush3.msra.mxu0 %v1379_v8  ;;  %6888 = vmatprep.mubr.msk.f32.mxu0 %vm655_vm0, %v1381_v9 }
 0x1ac   : > { %6876 = vmatprep.subr.mxu0 %v1378_v10 }
 0x1ad   : > { %6877 = vmatpush3.msra.mxu0 %v1378_v10  ;;  %v6078_v10 = vld [vmem:[#allocation10] ss:$0 sm:$0xff] }
 0x1ae   : > { %6878 = vmatprep.subr.mxu0 %v1377_v11 }
 0x1af   : > { %6879 = vmatpush3.msra.mxu0 %v1377_v11 }
 0x1b0   : > { %6880 = vmatprep.subr.mxu0 %v1376_v12 }
 0x1b1   : > { %6881 = vmatpush3.msra.mxu0 %v1376_v12 }
 0x1b2   : > { %6882 = vmatprep.subr.mxu0 %v1375_v13 }
 0x1b3   : > { %6883 = vmatpush3.msra.mxu0 %v1375_v13 }
 0x1b4   : > { %6884 = vmatprep.subr.mxu0 %v1374_v14 }
 0x1b5   : > { %6885 = vmatpush3.msra.mxu0 %v1374_v14  ;;  %v1502_v14 = vld [vmem:[#allocation11 + $0x60] sm:$0xff] }
 0x1b6   : > { %6886 = vmatprep.subr.mxu0 %v1373_v16  ;;  %6913 = vmatprep.subr.mxu1 %v1502_v14 }
 0x1b7   : > { %6887 = vmatpush3.msra.mxu0 %v1373_v16  ;;  %6914 = vmatpush3.msra.mxu1 %v1502_v14  ;;  %v1681_v14 = vld [vmem:[#allocation11 + $0xc8] sm:$0xff] }
 0x1b8   : > { %6889 = vmatmul.mubr.msk.f32.vlgmr.msra.gmra.mxu0 %vm655_vm0, %v1383_v15  ;;  %6918 = vmatprep.subr.mxu0 %v1500_v17 }
 0x1b9   : > { %6919 = vmatpush3.msra.mxu0 %v1500_v17  ;;  %v8499_v17 = vld [vmem:[#allocation11 + $0x118] sm:$0xff] }
 0x1ba   : > { %6920 = vmatprep.subr.mxu0 %v1499_v18  ;;  %6945 = vmatprep.subr.mxu1 %v8499_v17 }
 0x1bb   : > { %6921 = vmatpush3.msra.mxu0 %v1499_v18 }
 0x1bc   : > { %6922 = vmatprep.subr.mxu0 %v1498_v19 }
 0x1bd   : > { %6923 = vmatpush3.msra.mxu0 %v1498_v19 }
 0x1be   : > { %6924 = vmatprep.subr.mxu0 %v1497_v20 }
 0x1bf   : > { %6925 = vmatpush3.msra.mxu0 %v1497_v20 }
 0x1c0   : > { %6926 = vmatprep.subr.mxu0 %v1496_v21 }
 0x1c1   : > { %6927 = vmatpush3.msra.mxu0 %v1496_v21 }
 0x1c2   : > { %6928 = vmatprep.subr.mxu0 %v1495_v22 }
 0x1c3   : > { %6929 = vmatpush3.msra.mxu0 %v1495_v22 }
 0x1c4   : > { %6930 = vmatprep.subr.mxu0 %v1494_v23 }
 0x1c5   : > { %6931 = vmatpush3.msra.mxu0 %v1494_v23  ;;  %v1790_v23 = vld [vmem:[#allocation11 + $0x170] sm:$0xff] }
 0x1c6   : > { %6932 = vmatprep.subr.mxu0 %v1493_v24 }
 0x1c7   : > { %6933 = vmatpush3.msra.mxu0 %v1493_v24 }
 0x1c8   : > { %6934 = vmatprep.subr.mxu0 %v1492_v25 }
 0x1c9   : > { %6935 = vmatpush3.msra.mxu0 %v1492_v25  ;;  %v1789_v25 = vld [vmem:[#allocation11 + $0x168] sm:$0xff] }
 0x1ca   : > { %6936 = vmatprep.subr.mxu0 %v1491_v26 }
 0x1cb   : > { %6937 = vmatpush3.msra.mxu0 %v1491_v26  ;;  %v1788_v26 = vld [vmem:[#allocation11 + $0x160] sm:$0xff] }
 0x1cc   : > { %6938 = vmatprep.subr.mxu0 %v1490_v27 }
 0x1cd   : > { %6939 = vmatpush3.msra.mxu0 %v1490_v27 }
 0x1ce   : > { %6940 = vmatprep.subr.mxu0 %v1489_v28 }
 0x1cf   : > { %6941 = vmatpush3.msra.mxu0 %v1489_v28  ;;  %v1787_v28 = vld [vmem:[#allocation11 + $0x158] sm:$0xff] }
 0x1d0   : > { %6972 = vmatprep.subr.mxu0 %v8496_v29 }
 0x1d1   : > { %v6805_v48 = vpop.f32.mrf.mxu1 }
 0x1d3   : > { %v989_v53 = vpop.f32.mrf.mxu1 }
 0x232   : > { %v6754_v41 = vpop.f32.mrf.mxu0 }
 0x234   : > { %v726_v42 = vpop.f32.mrf.mxu0 }
 0x23b   : > { %v6839_v56 = vpop.f32.mrf.mxu1 }
 0x23d   : > { %v1175_v61 = vpop.f32.mrf.mxu1 }
 0x240   : > { %v6771_v43 = vpop.f32.mrf.mxu0 }
 0x241   : > { %v811_v46 = vadd.f32 %v6771_v43, %v6754_v41  ;;  %v1984_v41 = vld [vmem:[#allocation11 + $0x230] sm:$0xff]  ;;  %v8548_v43 = vld [vmem:[%s9184_s0 + $0x19] sm:$0x3f] }
 0x242   : > { %v805_v44 = vpop.f32.mrf.mxu0 }
 0x243   : > { %v806_v49 = vadd.f32 %v805_v44, %v726_v42  ;;  %v1983_v42 = vld [vmem:[#allocation11 + $0x228] sm:$0xff]  ;;  %v1982_v44 = vld [vmem:[#allocation11 + $0x220] sm:$0xff] }
 0x24c   : > { %v6873_v0 = vpop.f32.mrf.mxu1 }
 0x24e   : > { %v6788_v45 = vpop.f32.mrf.mxu0  ;;  %v1361_v4 = vpop.f32.mrf.mxu1 }
 0x24f   : > { %v906_v50 = vadd.f32 %v6788_v45, %v811_v46  ;;  %v8555_v45 = vld [vmem:[%s9184_s0 + $0x11] sm:$0xff] }
 0x250   : > { %v896_v47 = vpop.f32.mrf.mxu0  ;;  %v1981_v46 = vld [vmem:[#allocation11 + $0x218] sm:$0xff] }
 0x251   : > { %v905_v52 = vadd.f32 %v896_v47, %v806_v49  ;;  %v999_v54 = vadd.f32 %v6805_v48, %v906_v50  ;;  %v1980_v47 = vld [vmem:[#allocation11 + $0x210] sm:$0xff]  ;;  %v1979_v48 = vld [vmem:[#allocation11 + $0x208] sm:$0xff]  ;;  %v8566_v49 = vld [vmem:[%s9184_s0 + $0x1a] sm:$0x3f] }
 0x252   : > { %v1978_v50 = vld [vmem:[#allocation11 + $0x200] sm:$0xff] }
 0x253   : > { %v998_v57 = vadd.f32 %v989_v53, %v905_v52  ;;  %v1977_v52 = vld [vmem:[#allocation11 + $0x1f8] sm:$0xff]  ;;  %v1976_v53 = vld [vmem:[#allocation11 + $0x1f0] sm:$0xff] }
 0x25c   : > { %v6822_v51 = vpop.f32.mrf.mxu0 }
 0x25d   : > { %v1092_v58 = vadd.f32 %v6822_v51, %v999_v54  ;;  %v8573_v51 = vld [vmem:[%s9184_s0 + $0x12] sm:$0xff]  ;;  %v1975_v54 = vld [vmem:[#allocation11 + $0x1e8] sm:$0xff] }
 0x25e   : > { %v1082_v55 = vpop.f32.mrf.mxu0 }
 0x25f   : > { %v1091_v60 = vadd.f32 %v1082_v55, %v998_v57  ;;  %v1185_v62 = vadd.f32 %v6839_v56, %v1092_v58  ;;  %v1974_v55 = vld [vmem:[#allocation11 + $0x1e0] sm:$0xff]  ;;  %v2181_v56 = vld [vmem:[#allocation11 + $0x2f8] sm:$0xff] }
 0x261   : > { %v1184_v1 = vadd.f32 %v1175_v61, %v1091_v60  ;;  %v1689_v61 = vld [vmem:[#allocation11 + $0x108] sm:$0xff] }
 0x26a   : > { %v6856_v59 = vpop.f32.mrf.mxu0 }
 0x26b   : > { %v1278_v2 = vadd.f32 %v6856_v59, %v1185_v62  ;;  %v1690_v59 = vld [vmem:[#allocation11 + $0x110] sm:$0xff] }
 0x26c   : > { %v1268_v63 = vpop.f32.mrf.mxu0 }
 0x26d   : > { %v1277_v3 = vadd.f32 %v1268_v63, %v1184_v1  ;;  %v1371_v5 = vadd.f32 %v6873_v0, %v1278_v2  ;;  %v1688_v63 = vld [vmem:[#allocation11 + $0x100] sm:$0xff]  ;;  %v1687_v1 = vld [vmem:[#allocation11 + $0xf8] sm:$0xff] }
 0x26f   : > { %v1370_v8 = vadd.f32 %v1361_v4, %v1277_v3  ;;  %v1686_v3 = vld [vmem:[#allocation11 + $0xf0] sm:$0xff]  ;;  %v1685_v4 = vld [vmem:[#allocation11 + $0xe8] sm:$0xff] }
 0x278   : > { %v6890_v7 = vpop.f32.mrf.mxu0 }
 0x279   : > { %v1464_v9 = vadd.f32 %v6890_v7, %v1371_v5  ;;  %v1684_v7 = vld [vmem:[#allocation11 + $0xe0] sm:$0xff] }
 0x27a   : > { %v1454_v11 = vpop.f32.mrf.mxu0 }
 0x27b   : > { %v1472_v12 = vmul.f32 %v6077_v6, %v1464_v9  ;;  %v1463_v13 = vadd.f32 %v1454_v11, %v1370_v8  ;;  %v2180_v8 = vld [vmem:[#allocation11 + $0x2f0] sm:$0xff]  ;;  %v1683_v9 = vld [vmem:[#allocation11 + $0xd8] sm:$0xff] }
 0x27d   : > { %v1480_v16 = vadd.f32 %v6078_v10, %v1472_v12  ;;  %v1471_v15 = vmul.f32 %v6077_v6, %v1463_v13  ;;  %v1682_v12 = vld [vmem:[#allocation11 + $0xd0] sm:$0xff]  ;;  %v2178_v13 = vld [vmem:[#allocation11 + $0x2e0] sm:$0xff] }
 0x27f   : > { %v1482_v18 = vmax.f32 %v1480_v16, 0.0  ;;  %v1479_v19 = vadd.f32 %v6078_v10, %v1471_v15  ;;  %v2179_v10 = vld [vmem:[#allocation11 + $0x2e8] sm:$0xff]  ;;  %v2177_v16 = vld [vmem:[#allocation11 + $0x2d8] sm:$0xff]  ;;  %v1680_v15 = vld [vmem:[#allocation11 + $0xc0] sm:$0xff] }
 0x281   : > { %1486 = vst.msk [vmem:[#allocation2 + $0x8] sm:$0x3f] %vm1485_vm1, %v1482_v18  ;;  %v1481_v20 = vmax.f32 %v1479_v19, 0.0  ;;  %v1887_v18 = vld [vmem:[#allocation11 + $0x1d8] sm:$0xff]  ;;  %v2175_v19 = vld [vmem:[#allocation11 + $0x2c8] sm:$0xff] }
 0x283   : > { %1484 = vst.msk [vmem:[#allocation2] sm:$0xff] %vm1483_vm2, %v1481_v20  ;;  %v1886_v20 = vld [vmem:[#allocation11 + $0x1d0] sm:$0xff] }
 0x288   : > { %v1488_v21 = vld [vmem:[#allocation2 + $0x8] sm:$0xf] }
 0x289   : > { %1518 = vrot.lane.b32.xlu1 %v1488_v21, %s8075_s18  ;;  %v1778_v27 = vld [vmem:[#allocation2 + $0x9] sm:$0xf] }
 0x28a   : > { %v1487_v22 = vld [vmem:[#allocation2] sm:$0xff]  ;;  %v8516_v32 = vld [vmem:[#allocation2 + $0xa] sm:$0xf] }
 0x28b   : > { %1516 = vrot.lane.b32.xlu0 %v1487_v22, %s8075_s18  ;;  %6942 = vmatprep.mubr.msk.f32.mxu0 %vm1520_vm3, %v1487_v22  ;;  %v1777_v24 = vld [vmem:[#allocation2 + $0x1] sm:$0xff] }
 0x28c   : > { %6943 = vmatmul.mubr.msk.f32.vlgmr.msra.gmra.mxu0 %vm1520_vm3, %v1488_v21  ;;  %v8520_v34 = vld [vmem:[#allocation2 + $0x2] sm:$0xff] }
 0x28d   : > { %6973 = vmatpush3.msra.mxu0 %v8496_v29  ;;  %1694 = vrot.lane.b32.xlu1 %v1488_v21, %s8076_s25  ;;  %v1786_v29 = vld [vmem:[#allocation11 + $0x150] sm:$0xff]  ;;  %v2174_v21 = vld [vmem:[#allocation11 + $0x2c0] sm:$0xff] }
 0x28e   : > { %6974 = vmatprep.subr.mxu0 %v1790_v23  ;;  %6996 = vmatprep.mubr.msk.f32.mxu0 %vm1520_vm3, %v1777_v24 }
 0x28f   : > { %6975 = vmatpush3.msra.mxu0 %v1790_v23  ;;  %1692 = vrot.lane.b32.xlu0 %v1487_v22, %s8076_s25  ;;  %v1885_v22 = vld [vmem:[#allocation11 + $0x1c8] sm:$0xff]  ;;  %v2173_v23 = vld [vmem:[#allocation11 + $0x2b8] sm:$0xff] }
 0x290   : > { %6976 = vmatprep.subr.mxu0 %v1789_v25 }
 0x291   : > { %6977 = vmatpush3.msra.mxu0 %v1789_v25  ;;  %1890 = vrot.lane.b32.xlu1 %v1778_v27, %s8075_s18  ;;  %v2172_v25 = vld [vmem:[#allocation11 + $0x2b0] sm:$0xff] }
 0x292   : > { %6978 = vmatprep.subr.mxu0 %v1788_v26 }
 0x293   : > { %6979 = vmatpush3.msra.mxu0 %v1788_v26  ;;  %1888 = vrot.lane.b32.xlu0 %v1777_v24, %s8075_s18  ;;  %v1883_v26 = vld [vmem:[#allocation11 + $0x1b8] sm:$0xff] }
 0x294   : > { %6980 = vmatprep.subr.mxu0 %v1787_v28 }
 0x295   : > { %6981 = vmatpush3.msra.mxu0 %v1787_v28  ;;  %1988 = vrot.lane.b32.xlu1 %v1778_v27, %s8076_s25  ;;  %v1882_v28 = vld [vmem:[#allocation11 + $0x1b0] sm:$0xff] }
 0x296   : > { %6982 = vmatprep.subr.mxu0 %v1786_v29 }
 0x297   : > { %6983 = vmatpush3.msra.mxu0 %v1786_v29  ;;  %1986 = vrot.lane.b32.xlu0 %v1777_v24, %s8076_s25  ;;  %v1884_v24 = vld [vmem:[#allocation11 + $0x1c0] sm:$0xff] }
 0x298   : > { %6984 = vmatprep.subr.mxu0 %v1785_v30  ;;  %v2170_v29 = vld [vmem:[#allocation11 + $0x2a0] sm:$0xff] }
 0x299   : > { %6985 = vmatpush3.msra.mxu0 %v1785_v30  ;;  %2184 = vrot.lane.b32.xlu1 %v8516_v32, %s8075_s18  ;;  %v1881_v30 = vld [vmem:[#allocation11 + $0x1a8] sm:$0xff] }
 0x29a   : > { %6986 = vmatprep.subr.mxu0 %v1784_v31 }
 0x29b   : > { %6987 = vmatpush3.msra.mxu0 %v1784_v31  ;;  %2182 = vrot.lane.b32.xlu0 %v8520_v34, %s8075_s18  ;;  %v1880_v31 = vld [vmem:[#allocation11 + $0x1a0] sm:$0xff] }
 0x29c   : > { %6988 = vmatprep.subr.mxu0 %v1783_v33 }
 0x29d   : > { %6989 = vmatpush3.msra.mxu0 %v1783_v33  ;;  %2282 = vrot.lane.b32.xlu1 %v8516_v32, %s8076_s25  ;;  %v2401_v33 = vld [vmem:[#allocation5 + $0x68] sm:$0xff] }
 0x29e   : > { %6990 = vmatprep.subr.mxu0 %v1782_v35 }
 0x29f   : > { %6991 = vmatpush3.msra.mxu0 %v1782_v35  ;;  %2280 = vrot.lane.b32.xlu0 %v8520_v34, %s8076_s25 }
 0x2a0   : > { %6992 = vmatprep.subr.mxu0 %v1781_v36 }
 0x2a1   : > { %6993 = vmatpush3.msra.mxu0 %v1781_v36  ;;  %2406 = vrot.lane.b32.xlu1 %v8529_v37, %s8074_s1  ;;  %v1879_v36 = vld [vmem:[#allocation11 + $0x198] sm:$0xff] }
 0x2a2   : > { %6994 = vmatprep.subr.mxu0 %v1780_v38 }
 0x2a3   : > { %6995 = vmatpush3.msra.mxu0 %v1780_v38  ;;  %2404 = vrot.lane.b32.xlu0 %v8536_v39, %s8074_s1  ;;  %v2400_v38 = vld [vmem:[#allocation5 + $0x60] sm:$0xff] }
 0x2a4   : > { %6997 = vmatmul.mubr.msk.f32.vlgmr.msra.gmra.mxu0 %vm1520_vm3, %v1778_v27  ;;  %7026 = vmatprep.subr.mxu0 %v1985_v40  ;;  %v2171_v27 = vld [vmem:[#allocation11 + $0x2a8] sm:$0xff] }
 0x2a5   : > { %7027 = vmatpush3.msra.mxu0 %v1985_v40  ;;  %2575 = vrot.lane.b32.xlu1 %v8529_v37, %s8075_s18  ;;  %v1878_v40 = vld [vmem:[#allocation11 + $0x190] sm:$0xff] }
 0x2a6   : > { %7028 = vmatprep.subr.mxu0 %v1984_v41 }
 0x2a7   : > { %7029 = vmatpush3.msra.mxu0 %v1984_v41  ;;  %2573 = vrot.lane.b32.xlu0 %v8536_v39, %s8075_s18  ;;  %v2399_v41 = vld [vmem:[#allocation5 + $0x58] sm:$0xff] }
 0x2a8   : > { %7030 = vmatprep.subr.mxu0 %v1983_v42 }
 0x2a9   : > { %7031 = vmatpush3.msra.mxu0 %v1983_v42  ;;  %2759 = vrot.lane.b32.xlu1 %v8548_v43, %s8074_s1  ;;  %v1877_v42 = vld [vmem:[#allocation11 + $0x188] sm:$0xff] }
 0x2aa   : > { %7032 = vmatprep.subr.mxu0 %v1982_v44 }
 0x2ab   : > { %7033 = vmatpush3.msra.mxu0 %v1982_v44  ;;  %2757 = vrot.lane.b32.xlu0 %v8555_v45, %s8074_s1  ;;  %v2398_v44 = vld [vmem:[#allocation5 + $0x50] sm:$0xff] }
 0x2ac   : > { %7034 = vmatprep.subr.mxu0 %v1981_v46 }
 0x2ad   : > { %7035 = vmatpush3.msra.mxu0 %v1981_v46  ;;  %2851 = vrot.lane.b32.xlu1 %v8548_v43, %s8075_s18  ;;  %v1876_v46 = vld [vmem:[#allocation11 + $0x180] sm:$0xff] }
 0x2ae   : > { %7036 = vmatprep.subr.mxu0 %v1980_v47 }
 0x2af   : > { %7037 = vmatpush3.msra.mxu0 %v1980_v47  ;;  %2849 = vrot.lane.b32.xlu0 %v8555_v45, %s8075_s18  ;;  %v2397_v47 = vld [vmem:[#allocation5 + $0x48] sm:$0xff] }
 0x2b0   : > { %7038 = vmatprep.subr.mxu0 %v1979_v48 }
 0x2b1   : > { %7039 = vmatpush3.msra.mxu0 %v1979_v48  ;;  %3035 = vrot.lane.b32.xlu1 %v8566_v49, %s8074_s1  ;;  %v2085_v48 = vld [vmem:[#allocation11 + $0x298] sm:$0xff] }
 0x2b2   : > { %7040 = vmatprep.subr.mxu0 %v1978_v50 }
 0x2b3   : > { %7041 = vmatpush3.msra.mxu0 %v1978_v50  ;;  %3033 = vrot.lane.b32.xlu0 %v8573_v51, %s8074_s1 }
 0x2b4   : > { %7042 = vmatprep.subr.mxu0 %v1977_v52 }
 0x2b5   : > { %7043 = vmatpush3.msra.mxu0 %v1977_v52  ;;  %3127 = vrot.lane.b32.xlu1 %v8566_v49, %s8075_s18  ;;  %v2084_v52 = vld [vmem:[#allocation11 + $0x290] sm:$0xff] }
 0x2b6   : > { %7044 = vmatprep.subr.mxu0 %v1976_v53 }
 0x2b7   : > { %7045 = vmatpush3.msra.mxu0 %v1976_v53  ;;  %3125 = vrot.lane.b32.xlu0 %v8573_v51, %s8075_s18  ;;  %v2396_v53 = vld [vmem:[#allocation5 + $0x40] sm:$0xff] }
 0x2b8   : > { %7046 = vmatprep.subr.mxu0 %v1975_v54 }
 0x2b9   : > { %7047 = vmatpush3.msra.mxu0 %v1975_v54 }
 0x2ba   : > { %7048 = vmatprep.subr.mxu0 %v1974_v55 }
 0x2bb   : > { %7049 = vmatpush3.msra.mxu0 %v1974_v55  ;;  %v2083_v55 = vld [vmem:[#allocation11 + $0x288] sm:$0xff] }
 0x2bc   : > { %7080 = vmatprep.subr.mxu0 %v2181_v56 }
 0x2fb   : > { %v1519_v57 = vpop.permute.xlu1 %1518 }
 0x2fd   : > { %v1517_v58 = vpop.permute.xlu0 %1516 }
 0x2fe   : > { %6915 = vmatprep.mubr.msk.f32.mxu1 %vm1520_vm3, %v1517_v58 }
 0x2ff   : > { %v8584_v60 = vpop.permute.xlu1 %1694  ;;  %6916 = vmatmul.mubr.msk.f32.vlgmr.msra.gmra.mxu1 %vm1520_vm3, %v1519_v57  ;;  %v2082_v57 = vld [vmem:[#allocation11 + $0x280] sm:$0xff] }
 0x300   : > { %6946 = vmatpush3.msra.mxu1 %v8499_v17  ;;  %v2176_v17 = vld [vmem:[#allocation11 + $0x2d0] sm:$0xff] }
 0x301   : > { %6947 = vmatprep.subr.mxu1 %v1690_v59  ;;  %v1693_v62 = vpop.permute.xlu0 %1692 }
 0x302   : > { %6948 = vmatpush3.msra.mxu1 %v1690_v59  ;;  %6969 = vmatprep.mubr.msk.f32.mxu1 %vm1520_vm3, %v1693_v62  ;;  %v2572_v59 = vld [vmem:[#allocation5 + $0xa0] sm:$0xff]  ;;  %v2571_v62 = vld [vmem:[#allocation5 + $0x98] sm:$0xff] }
 0x303   : > { %6949 = vmatprep.subr.mxu1 %v1689_v61  ;;  %v8589_v0 = vpop.permute.xlu1 %1890 }
 0x304   : > { %6950 = vmatpush3.msra.mxu1 %v1689_v61 }
 0x305   : > { %6951 = vmatprep.subr.mxu1 %v1688_v63  ;;  %v1889_v2 = vpop.permute.xlu0 %1888 }
 0x306   : > { %6952 = vmatpush3.msra.mxu1 %v1688_v63  ;;  %v2079_v63 = vld [vmem:[#allocation11 + $0x268] sm:$0xff] }
 0x307   : > { %6953 = vmatprep.subr.mxu1 %v1687_v1  ;;  %v1989_v6 = vpop.permute.xlu1 %1988 }
 0x308   : > { %6954 = vmatpush3.msra.mxu1 %v1687_v1  ;;  %v2078_v1 = vld [vmem:[#allocation11 + $0x260] sm:$0xff] }
 0x309   : > { %6955 = vmatprep.subr.mxu1 %v1686_v3  ;;  %v1987_v5 = vpop.permute.xlu0 %1986 }
 0x30a   : > { %6956 = vmatpush3.msra.mxu1 %v1686_v3  ;;  %7050 = vmatprep.mubr.msk.f32.mxu0 %vm1520_vm3, %v1987_v5  ;;  %v2077_v3 = vld [vmem:[#allocation11 + $0x258] sm:$0xff]  ;;  %v2076_v5 = vld [vmem:[#allocation11 + $0x250] sm:$0xff] }
 0x30b   : > { %6957 = vmatprep.subr.mxu1 %v1685_v4  ;;  %7051 = vmatmul.mubr.msk.f32.vlgmr.msra.gmra.mxu0 %vm1520_vm3, %v1989_v6  ;;  %v2185_v35 = vpop.permute.xlu1 %2184  ;;  %v2567_v6 = vld [vmem:[#allocation5 + $0x78] sm:$0xff] }
 0x30c   : > { %6958 = vmatpush3.msra.mxu1 %v1685_v4  ;;  %7081 = vmatpush3.msra.mxu0 %v2181_v56  ;;  %v2395_v56 = vld [vmem:[#allocation5 + $0x38] sm:$0xff]  ;;  %v2568_v4 = vld [vmem:[#allocation5 + $0x80] sm:$0xff] }
 0x30d   : > { %6959 = vmatprep.subr.mxu1 %v1684_v7  ;;  %7082 = vmatprep.subr.mxu0 %v2180_v8  ;;  %v2183_v11 = vpop.permute.xlu0 %2182 }
 0x30e   : > { %6960 = vmatpush3.msra.mxu1 %v1684_v7  ;;  %7083 = vmatpush3.msra.mxu0 %v2180_v8  ;;  %v2075_v7 = vld [vmem:[#allocation11 + $0x248] sm:$0xff]  ;;  %v2566_v8 = vld [vmem:[#allocation5 + $0x70] sm:$0xff] }
 0x30f   : > { %6961 = vmatprep.subr.mxu1 %v1683_v9  ;;  %7084 = vmatprep.subr.mxu0 %v2179_v10  ;;  %v8602_v54 = vpop.permute.xlu1 %2282 }
 0x310   : > { %7104 = vmatprep.mubr.msk.f32.mxu0 %vm1520_vm3, %v2183_v11  ;;  %6962 = vmatpush3.msra.mxu1 %v1683_v9  ;;  %v2074_v9 = vld [vmem:[#allocation11 + $0x240] sm:$0xff]  ;;  %v2756_v11 = vld [vmem:[#allocation5 + $0x110] sm:$0xff] }
 0x311   : > { %7085 = vmatpush3.msra.mxu0 %v2179_v10  ;;  %6963 = vmatprep.subr.mxu1 %v1682_v12  ;;  %v8598_v50 = vpop.permute.xlu0 %2280 }
 0x312   : > { %7086 = vmatprep.subr.mxu0 %v2178_v13  ;;  %6964 = vmatpush3.msra.mxu1 %v1682_v12  ;;  %v2279_v12 = vld [vmem:[#allocation11 + $0x358] sm:$0xff] }
 0x313   : > { %7087 = vmatpush3.msra.mxu0 %v2178_v13  ;;  %6965 = vmatprep.subr.mxu1 %v1681_v14  ;;  %v2407_v61 = vpop.permute.xlu1 %2406  ;;  %v2278_v13 = vld [vmem:[#allocation11 + $0x350] sm:$0xff] }
 0x314   : > { %7088 = vmatprep.subr.mxu0 %v2177_v16  ;;  %6966 = vmatpush3.msra.mxu1 %v1681_v14 }
 0x315   : > { %7089 = vmatpush3.msra.mxu0 %v2177_v16  ;;  %6967 = vmatprep.subr.mxu1 %v1680_v15  ;;  %v2405_v58 = vpop.permute.xlu0 %2404  ;;  %v2277_v16 = vld [vmem:[#allocation11 + $0x348] sm:$0xff] }
 0x316   : > { %7090 = vmatprep.subr.mxu0 %v2176_v17  ;;  %6968 = vmatpush3.msra.mxu1 %v1680_v15  ;;  %v2755_v15 = vld [vmem:[#allocation5 + $0x108] sm:$0xff] }
 0x317   : > { %7091 = vmatpush3.msra.mxu0 %v2176_v17  ;;  %6970 = vmatmul.mubr.msk.f32.vlgmr.msra.gmra.mxu1 %vm1520_vm3, %v8584_v60  ;;  %v2081_v60 = vld [vmem:[#allocation11 + $0x278] sm:$0xff]  ;;  %v2576_v14 = vpop.permute.xlu1 %2575  ;;  %v2276_v17 = vld [vmem:[#allocation11 + $0x340] sm:$0xff] }
 0x318   : > { %6999 = vmatprep.subr.mxu1 %v1887_v18  ;;  %7092 = vmatprep.subr.mxu0 %v2175_v19 }
 0x319   : > { %7000 = vmatpush3.msra.mxu1 %v1887_v18  ;;  %7023 = vmatprep.mubr.msk.f32.mxu1 %vm1520_vm3, %v1889_v2  ;;  %v2569_v2 = vld [vmem:[#allocation5 + $0x88] sm:$0xff]  ;;  %v2574_v10 = vpop.permute.xlu0 %2573  ;;  %v2754_v18 = vld [vmem:[#allocation5 + $0x100] sm:$0xff] }
 0x31a   : > { %7093 = vmatpush3.msra.mxu0 %v2175_v19  ;;  %7001 = vmatprep.subr.mxu1 %v1886_v20  ;;  %v2275_v19 = vld [vmem:[#allocation11 + $0x338] sm:$0xff] }
 0x31b   : > { %7094 = vmatprep.subr.mxu0 %v2174_v21  ;;  %7002 = vmatpush3.msra.mxu1 %v1886_v20  ;;  %v2274_v20 = vld [vmem:[#allocation11 + $0x330] sm:$0xff] }
 0x31c   : > { %7095 = vmatpush3.msra.mxu0 %v2174_v21  ;;  %7003 = vmatprep.subr.mxu1 %v1885_v22  ;;  %v2752_v21 = vld [vmem:[#allocation5 + $0xf0] sm:$0xff] }
 0x31d   : > { %7096 = vmatprep.subr.mxu0 %v2173_v23  ;;  %7004 = vmatpush3.msra.mxu1 %v1885_v22  ;;  %v2273_v22 = vld [vmem:[#allocation11 + $0x328] sm:$0xff] }
 0x31e   : > { %7097 = vmatpush3.msra.mxu0 %v2173_v23  ;;  %7005 = vmatprep.subr.mxu1 %v1884_v24  ;;  %v2751_v23 = vld [vmem:[#allocation5 + $0xe8] sm:$0xff] }
 0x31f   : > { %7098 = vmatprep.subr.mxu0 %v2172_v25  ;;  %7006 = vmatpush3.msra.mxu1 %v1884_v24  ;;  %v2272_v24 = vld [vmem:[#allocation11 + $0x320] sm:$0xff] }
 0x320   : > { %7099 = vmatpush3.msra.mxu0 %v2172_v25  ;;  %7007 = vmatprep.subr.mxu1 %v1883_v26  ;;  %v2750_v25 = vld [vmem:[#allocation5 + $0xe0] sm:$0xff] }
 0x321   : > { %7100 = vmatprep.subr.mxu0 %v2171_v27  ;;  %7008 = vmatpush3.msra.mxu1 %v1883_v26  ;;  %v2271_v26 = vld [vmem:[#allocation11 + $0x318] sm:$0xff] }
 0x322   : > { %7101 = vmatpush3.msra.mxu0 %v2171_v27  ;;  %7009 = vmatprep.subr.mxu1 %v1882_v28  ;;  %v2758_v27 = vpop.permute.xlu0 %2757 }
 0x323   : > { %7102 = vmatprep.subr.mxu0 %v2170_v29  ;;  %7010 = vmatpush3.msra.mxu1 %v1882_v28  ;;  %v2942_v28 = vld [vmem:[#allocation5 + $0x180] sm:$0xff] }
 0x324   : > { %7103 = vmatpush3.msra.mxu0 %v2170_v29  ;;  %7011 = vmatprep.subr.mxu1 %v1881_v30  ;;  %v2270_v29 = vld [vmem:[#allocation11 + $0x310] sm:$0xff] }
 0x325   : > { %7105 = vmatmul.mubr.msk.f32.vlgmr.msra.gmra.mxu0 %vm1520_vm3, %v2185_v35  ;;  %7012 = vmatpush3.msra.mxu1 %v1881_v30  ;;  %v2760_v30 = vpop.permute.xlu1 %2759  ;;  %v2268_v35 = vld [vmem:[#allocation11 + $0x300] sm:$0xff] }
 0x326   : > { %7013 = vmatprep.subr.mxu1 %v1880_v31  ;;  %7134 = vmatprep.subr.mxu0 %v2401_v33 }
 0x327   : > { %7014 = vmatpush3.msra.mxu1 %v1880_v31  ;;  %7135 = vmatpush3.msra.mxu0 %v2401_v33  ;;  %v2269_v31 = vld [vmem:[#allocation11 + $0x308] sm:$0xff]  ;;  %v2941_v33 = vld [vmem:[#allocation5 + $0x178] sm:$0xff] }
 0x328   : > { %7015 = vmatprep.subr.mxu1 %v1879_v36  ;;  %7136 = vmatprep.subr.mxu0 %v2400_v38 }
 0x329   : > { %7016 = vmatpush3.msra.mxu1 %v1879_v36  ;;  %7137 = vmatpush3.msra.mxu0 %v2400_v38  ;;  %v2940_v36 = vld [vmem:[#allocation5 + $0x170] sm:$0xff] }
 0x32a   : > { %7017 = vmatprep.subr.mxu1 %v1878_v40  ;;  %7138 = vmatprep.subr.mxu0 %v2399_v41  ;;  %v2394_v38 = vld [vmem:[#allocation5 + $0x30] sm:$0xff] }
 0x32b   : > { %7018 = vmatpush3.msra.mxu1 %v1878_v40  ;;  %7139 = vmatpush3.msra.mxu0 %v2399_v41  ;;  %v2393_v40 = vld [vmem:[#allocation5 + $0x28] sm:$0xff] }
 0x32c   : > { %7019 = vmatprep.subr.mxu1 %v1877_v42  ;;  %7140 = vmatprep.subr.mxu0 %v2398_v44  ;;  %v2939_v41 = vld [vmem:[#allocation5 + $0x168] sm:$0xff] }
 0x32d   : > { %7020 = vmatpush3.msra.mxu1 %v1877_v42  ;;  %7141 = vmatpush3.msra.mxu0 %v2398_v44  ;;  %v2392_v42 = vld [vmem:[#allocation5 + $0x20] sm:$0xff] }
 0x32e   : > { %7021 = vmatprep.subr.mxu1 %v1876_v46  ;;  %7142 = vmatprep.subr.mxu0 %v2397_v47  ;;  %v2938_v44 = vld [vmem:[#allocation5 + $0x160] sm:$0xff] }
 0x32f   : > { %7022 = vmatpush3.msra.mxu1 %v1876_v46  ;;  %7143 = vmatpush3.msra.mxu0 %v2397_v47  ;;  %v2391_v46 = vld [vmem:[#allocation5 + $0x18] sm:$0xff] }
 0x330   : > { %7024 = vmatmul.mubr.msk.f32.vlgmr.msra.gmra.mxu1 %vm1520_vm3, %v8589_v0  ;;  %7053 = vmatprep.subr.mxu1 %v2085_v48  ;;  %v2570_v0 = vld [vmem:[#allocation5 + $0x90] sm:$0xff]  ;;  %v2937_v47 = vld [vmem:[#allocation5 + $0x158] sm:$0xff] }
 0x331   : > { %7054 = vmatpush3.msra.mxu1 %v2085_v48  ;;  %7077 = vmatprep.mubr.msk.f32.mxu1 %vm1520_vm3, %v8520_v34  ;;  %v2080_v34 = vld [vmem:[#allocation11 + $0x270] sm:$0xff] }
 0x332   : > { %7055 = vmatprep.subr.mxu1 %v2084_v52  ;;  %7144 = vmatprep.subr.mxu0 %v2396_v53  ;;  %v2390_v48 = vld [vmem:[#allocation5 + $0x10] sm:$0xff] }
 0x333   : > { %7056 = vmatpush3.msra.mxu1 %v2084_v52  ;;  %7145 = vmatpush3.msra.mxu0 %v2396_v53  ;;  %v2389_v52 = vld [vmem:[#allocation5 + $0x8] sm:$0xff]  ;;  %v2388_v53 = vld [vmem:[#allocation5] sm:$0xff] }
 0x334   : > { %7057 = vmatprep.subr.mxu1 %v2083_v55  ;;  %7146 = vmatprep.subr.mxu0 %v2395_v56 }
 0x335   : > { %7058 = vmatpush3.msra.mxu1 %v2083_v55  ;;  %7147 = vmatpush3.msra.mxu0 %v2395_v56  ;;  %v2665_v55 = vld [vmem:[#allocation5 + $0xd0] sm:$0xff]  ;;  %v3123_v56 = vld [vmem:[#allocation5 + $0x1e8] sm:$0xff] }
 0x336   : > { %7059 = vmatprep.subr.mxu1 %v2082_v57  ;;  %7148 = vmatprep.mubr.msk.f32.mxu0 %vm655_vm0, %v2405_v58  ;;  %v2663_v58 = vld [vmem:[#allocation5 + $0xc0] sm:$0xff] }
 0x337   : > { %7060 = vmatpush3.msra.mxu1 %v2082_v57  ;;  %7168 = vmatprep.subr.mxu0 %v2572_v59  ;;  %v2664_v57 = vld [vmem:[#allocation5 + $0xc8] sm:$0xff] }
 0x338   : > { %7061 = vmatprep.subr.mxu1 %v2081_v60  ;;  %7149 = vmatmul.mubr.msk.f32.vlgmr.msra.gmra.mxu0 %vm655_vm0, %v2407_v61  ;;  %v2662_v61 = vld [vmem:[#allocation5 + $0xb8] sm:$0xff] }
 0x339   : > { %7062 = vmatpush3.msra.mxu1 %v2081_v60  ;;  %7169 = vmatpush3.msra.mxu0 %v2572_v59  ;;  %v2850_v59 = vpop.permute.xlu0 %2849  ;;  %v2852_v60 = vpop.permute.xlu1 %2851 }
 0x33a   : > { %7063 = vmatprep.subr.mxu1 %v2080_v34  ;;  %7170 = vmatprep.subr.mxu0 %v2571_v62 }
 0x33b   : > { %7064 = vmatpush3.msra.mxu1 %v2080_v34  ;;  %7171 = vmatpush3.msra.mxu0 %v2571_v62  ;;  %v2661_v34 = vld [vmem:[#allocation5 + $0xb0] sm:$0xff]  ;;  %v3119_v62 = vld [vmem:[#allocation5 + $0x1c8] sm:$0xff] }
 0x33c   : > { %7065 = vmatprep.subr.mxu1 %v2079_v63  ;;  %7172 = vmatprep.subr.mxu0 %v2570_v0 }
 0x33d   : > { %7066 = vmatpush3.msra.mxu1 %v2079_v63  ;;  %7173 = vmatpush3.msra.mxu0 %v2570_v0  ;;  %v8628_v63 = vpop.permute.xlu1 %3035  ;;  %v2660_v0 = vld [vmem:[#allocation5 + $0xa8] sm:$0xff] }
 0x33e   : > { %7067 = vmatprep.subr.mxu1 %v2078_v1  ;;  %7174 = vmatprep.subr.mxu0 %v2569_v2 }
 0x33f   : > { %7068 = vmatpush3.msra.mxu1 %v2078_v1  ;;  %7175 = vmatpush3.msra.mxu0 %v2569_v2  ;;  %v3118_v1 = vld [vmem:[#allocation5 + $0x1c0] sm:$0xff]  ;;  %v2848_v2 = vld [vmem:[#allocation5 + $0x148] sm:$0xff] }
 0x340   : > { %7069 = vmatprep.subr.mxu1 %v2077_v3  ;;  %7176 = vmatprep.subr.mxu0 %v2568_v4 }
 0x341   : > { %7070 = vmatpush3.msra.mxu1 %v2077_v3  ;;  %7177 = vmatpush3.msra.mxu0 %v2568_v4  ;;  %v2847_v3 = vld [vmem:[#allocation5 + $0x140] sm:$0xff] }
 0x342   : > { %7071 = vmatprep.subr.mxu1 %v2076_v5  ;;  %7178 = vmatprep.subr.mxu0 %v2567_v6 }
 0x343   : > { %7072 = vmatpush3.msra.mxu1 %v2076_v5  ;;  %7179 = vmatpush3.msra.mxu0 %v2567_v6  ;;  %v3128_v5 = vpop.permute.xlu1 %3127  ;;  %v2846_v6 = vld [vmem:[#allocation5 + $0x138] sm:$0xff] }
 0x344   : > { %7073 = vmatprep.subr.mxu1 %v2075_v7  ;;  %7180 = vmatprep.subr.mxu0 %v2566_v8 }
 0x345   : > { %7074 = vmatpush3.msra.mxu1 %v2075_v7  ;;  %7181 = vmatpush3.msra.mxu0 %v2566_v8  ;;  %v2845_v7 = vld [vmem:[#allocation5 + $0x130] sm:$0xff]  ;;  %v2844_v8 = vld [vmem:[#allocation5 + $0x128] sm:$0xff] }
 0x346   : > { %7075 = vmatprep.subr.mxu1 %v2074_v9  ;;  %7182 = vmatprep.mubr.msk.f32.mxu0 %vm655_vm0, %v2574_v10  ;;  %v3032_v10 = vld [vmem:[#allocation5 + $0x1b8] sm:$0xff] }
 0x347   : > { %7076 = vmatpush3.msra.mxu1 %v2074_v9  ;;  %7202 = vmatprep.subr.mxu0 %v2756_v11  ;;  %v2843_v9 = vld [vmem:[#allocation5 + $0x120] sm:$0xff] }
 0x348   : > { %7078 = vmatmul.mubr.msk.f32.vlgmr.msra.gmra.mxu1 %vm1520_vm3, %v8516_v32  ;;  %7107 = vmatprep.subr.mxu1 %v2279_v12  ;;  %v2753_v32 = vld [vmem:[#allocation5 + $0xf8] sm:$0xff] }
 0x349   : > { %7108 = vmatpush3.msra.mxu1 %v2279_v12  ;;  %7131 = vmatprep.mubr.msk.f32.mxu1 %vm1520_vm3, %v8598_v50  ;;  %v2936_v50 = vld [vmem:[#allocation5 + $0x150] sm:$0xff]  ;;  %v3030_v12 = vld [vmem:[#allocation5 + $0x1a8] sm:$0xff] }
 0x34a   : > { %7109 = vmatprep.subr.mxu1 %v2278_v13  ;;  %7183 = vmatmul.mubr.msk.f32.vlgmr.msra.gmra.mxu0 %vm655_vm0, %v2576_v14  ;;  %v3028_v14 = vld [vmem:[#allocation5 + $0x198] sm:$0xff] }
 0x34b   : > { %7110 = vmatpush3.msra.mxu1 %v2278_v13  ;;  %7203 = vmatpush3.msra.mxu0 %v2756_v11  ;;  %v3031_v11 = vld [vmem:[#allocation5 + $0x1b0] sm:$0xff]  ;;  %v3029_v13 = vld [vmem:[#allocation5 + $0x1a0] sm:$0xff] }
 0x34c   : > { %7111 = vmatprep.subr.mxu1 %v2277_v16  ;;  %7204 = vmatprep.subr.mxu0 %v2755_v15 }
 0x34d   : > { %7112 = vmatpush3.msra.mxu1 %v2277_v16  ;;  %7205 = vmatpush3.msra.mxu0 %v2755_v15  ;;  %v3027_v16 = vld [vmem:[#allocation5 + $0x190] sm:$0xff]  ;;  %v3026_v15 = vld [vmem:[#allocation5 + $0x188] sm:$0xff] }
 0x34e   : > { %7113 = vmatprep.subr.mxu1 %v2276_v17  ;;  %7206 = vmatprep.subr.mxu0 %v2754_v18 }
 0x34f   : > { %7114 = vmatpush3.msra.mxu1 %v2276_v17  ;;  %7207 = vmatpush3.msra.mxu0 %v2754_v18  ;;  %v3231_v17 = vld [vmem:[#allocation11 + $0x58] sm:$0xff]  ;;  %v3230_v18 = vld [vmem:[#allocation11 + $0x50] sm:$0xff] }
 0x350   : > { %7115 = vmatprep.subr.mxu1 %v2275_v19  ;;  %7208 = vmatprep.subr.mxu0 %v2753_v32 }
 0x351   : > { %7116 = vmatpush3.msra.mxu1 %v2275_v19  ;;  %7209 = vmatpush3.msra.mxu0 %v2753_v32  ;;  %v3229_v19 = vld [vmem:[#allocation11 + $0x48] sm:$0xff]  ;;  %v3228_v32 = vld [vmem:[#allocation11 + $0x40] sm:$0xff] }
 0x352   : > { %7117 = vmatprep.subr.mxu1 %v2274_v20  ;;  %7210 = vmatprep.subr.mxu0 %v2752_v21 }
 0x353   : > { %7118 = vmatpush3.msra.mxu1 %v2274_v20  ;;  %7211 = vmatpush3.msra.mxu0 %v2752_v21  ;;  %v3227_v20 = vld [vmem:[#allocation11 + $0x38] sm:$0xff]  ;;  %v3226_v21 = vld [vmem:[#allocation11 + $0x30] sm:$0xff] }
 0x354   : > { %7119 = vmatprep.subr.mxu1 %v2273_v22  ;;  %7212 = vmatprep.subr.mxu0 %v2751_v23 }
 0x355   : > { %7120 = vmatpush3.msra.mxu1 %v2273_v22  ;;  %7213 = vmatpush3.msra.mxu0 %v2751_v23  ;;  %v3225_v22 = vld [vmem:[#allocation11 + $0x28] sm:$0xff]  ;;  %v3224_v23 = vld [vmem:[#allocation11 + $0x20] sm:$0xff] }
 0x356   : > { %7121 = vmatprep.subr.mxu1 %v2272_v24  ;;  %7214 = vmatprep.subr.mxu0 %v2750_v25 }
 0x357   : > { %7122 = vmatpush3.msra.mxu1 %v2272_v24  ;;  %7215 = vmatpush3.msra.mxu0 %v2750_v25  ;;  %v3223_v24 = vld [vmem:[#allocation11 + $0x18] sm:$0xff]  ;;  %v3222_v25 = vld [vmem:[#allocation11 + $0x10] sm:$0xff] }
 0x358   : > { %7123 = vmatprep.subr.mxu1 %v2271_v26  ;;  %7216 = vmatprep.mubr.msk.f32.mxu0 %vm655_vm0, %v2758_v27  ;;  %v3220_v27 = vld [vmem:[#allocation11] sm:$0xff] }
 0x359   : > { %7124 = vmatpush3.msra.mxu1 %v2271_v26  ;;  %7236 = vmatprep.subr.mxu0 %v2942_v28  ;;  %v3221_v26 = vld [vmem:[#allocation11 + $0x8] sm:$0xff] }
 0x35a   : > { %7125 = vmatprep.subr.mxu1 %v2270_v29  ;;  %7217 = vmatmul.mubr.msk.f32.vlgmr.msra.gmra.mxu0 %vm655_vm0, %v2760_v30  ;;  %v3243_v30 = vld [vmem:[#allocation11 + $0xb8] sm:$0xff] }
 0x35b   : > { %7126 = vmatpush3.msra.mxu1 %v2270_v29  ;;  %7237 = vmatpush3.msra.mxu0 %v2942_v28  ;;  %v8639_v28 = vld [vmem:[#allocation11 + $0x178] sm:$0xff] }
 0x35c   : > { %7127 = vmatprep.subr.mxu1 %v2269_v31  ;;  %7238 = vmatprep.subr.mxu0 %v2941_v33 }
 0x35d   : > { %7128 = vmatpush3.msra.mxu1 %v2269_v31  ;;  %7239 = vmatpush3.msra.mxu0 %v2941_v33  ;;  %v3242_v31 = vld [vmem:[#allocation11 + $0xb0] sm:$0xff] }
 0x35e   : > { %7129 = vmatprep.subr.mxu1 %v2268_v35  ;;  %7240 = vmatprep.subr.mxu0 %v2940_v36 }
 0x35f   : > { %7130 = vmatpush3.msra.mxu1 %v2268_v35  ;;  %7241 = vmatpush3.msra.mxu0 %v2940_v36  ;;  %v3241_v35 = vld [vmem:[#allocation11 + $0xa8] sm:$0xff]  ;;  %v6944_v36 = vpop.f32.mrf.mxu0 }
 0x360   : > { %7132 = vmatmul.mubr.msk.f32.vlgmr.msra.gmra.mxu1 %vm1520_vm3, %v8602_v54  ;;  %7151 = vmatprep.subr.mxu1 %v2394_v38  ;;  %v2666_v54 = vld [vmem:[#allocation5 + $0xd8] sm:$0xff] }
 0x361   : > { %7152 = vmatpush3.msra.mxu1 %v2394_v38  ;;  %7165 = vmatprep.mubr.msk.f32.mxu1 %vm655_vm0, %v8536_v39  ;;  %v3124_v39 = vld [vmem:[#allocation5 + $0x1f0] sm:$0xff] }
 0x362   : > { %7153 = vmatprep.subr.mxu1 %v2393_v40  ;;  %7242 = vmatprep.subr.mxu0 %v2939_v41 }
 0x363   : > { %7154 = vmatpush3.msra.mxu1 %v2393_v40  ;;  %7243 = vmatpush3.msra.mxu0 %v2939_v41  ;;  %v3240_v40 = vld [vmem:[#allocation11 + $0xa0] sm:$0xff]  ;;  %v3239_v41 = vld [vmem:[#allocation11 + $0x98] sm:$0xff] }
 0x364   : > { %7155 = vmatprep.subr.mxu1 %v2392_v42  ;;  %7244 = vmatprep.subr.mxu0 %v2938_v44 }
 0x365   : > { %7156 = vmatpush3.msra.mxu1 %v2392_v42  ;;  %7245 = vmatpush3.msra.mxu0 %v2938_v44  ;;  %v1670_v44 = vpop.f32.mrf.mxu0 }
 0x366   : > { %7157 = vmatprep.subr.mxu1 %v2391_v46  ;;  %7246 = vmatprep.subr.mxu0 %v2937_v47 }
 0x367   : > { %7158 = vmatpush3.msra.mxu1 %v2391_v46  ;;  %7247 = vmatpush3.msra.mxu0 %v2937_v47  ;;  %v3238_v47 = vld [vmem:[#allocation11 + $0x90] sm:$0xff] }
 0x368   : > { %7159 = vmatprep.subr.mxu1 %v2390_v48  ;;  %7248 = vmatprep.subr.mxu0 %v2936_v50 }
 0x369   : > { %7160 = vmatpush3.msra.mxu1 %v2390_v48  ;;  %7249 = vmatpush3.msra.mxu0 %v2936_v50 }
 0x36a   : > { %7161 = vmatprep.subr.mxu1 %v2389_v52  ;;  %7250 = vmatprep.mubr.msk.f32.mxu0 %vm655_vm0, %v8573_v51  ;;  %v3122_v51 = vld [vmem:[#allocation5 + $0x1e0] sm:$0xff] }
 0x36b   : > { %7162 = vmatpush3.msra.mxu1 %v2389_v52  ;;  %7270 = vmatprep.subr.mxu0 %v3124_v39  ;;  %v6998_v52 = vpop.f32.mrf.mxu0 }
 0x36c   : > { %7163 = vmatprep.subr.mxu1 %v2388_v53  ;;  %7251 = vmatmul.mubr.msk.f32.vlgmr.msra.gmra.mxu0 %vm655_vm0, %v8566_v49  ;;  %v3121_v49 = vld [vmem:[#allocation5 + $0x1d8] sm:$0xff] }
 0x36d   : > { %7164 = vmatpush3.msra.mxu1 %v2388_v53  ;;  %7271 = vmatpush3.msra.mxu0 %v3124_v39  ;;  %v3237_v53 = vld [vmem:[#allocation11 + $0x88] sm:$0xff] }
 0x36e   : > { %7166 = vmatmul.mubr.msk.f32.vlgmr.msra.gmra.mxu1 %vm655_vm0, %v8529_v37  ;;  %7185 = vmatprep.subr.mxu1 %v2666_v54  ;;  %v3120_v37 = vld [vmem:[#allocation5 + $0x1d0] sm:$0xff] }
 0x36f   : > { %7186 = vmatpush3.msra.mxu1 %v2666_v54  ;;  %7199 = vmatprep.mubr.msk.f32.mxu1 %vm655_vm0, %v8555_v45  ;;  %v3034_v45 = vpop.permute.xlu0 %3033 }
 0x370   : > { %7187 = vmatprep.subr.mxu1 %v2665_v55  ;;  %7272 = vmatprep.subr.mxu0 %v3123_v56 }
 0x371   : > { %7188 = vmatpush3.msra.mxu1 %v2665_v55  ;;  %7273 = vmatpush3.msra.mxu0 %v3123_v56  ;;  %v3236_v55 = vld [vmem:[#allocation11 + $0x80] sm:$0xff] }
 0x372   : > { %7189 = vmatprep.subr.mxu1 %v2664_v57  ;;  %7274 = vmatprep.subr.mxu0 %v3122_v51 }
 0x373   : > { %7190 = vmatpush3.msra.mxu1 %v2664_v57  ;;  %7275 = vmatpush3.msra.mxu0 %v3122_v51  ;;  %v3126_v4 = vpop.permute.xlu0 %3125  ;;  %v1864_v57 = vpop.f32.mrf.mxu0 }
 0x374   : > { %7191 = vmatprep.subr.mxu1 %v2663_v58  ;;  %7276 = vmatprep.subr.mxu0 %v3121_v49 }
 0x375   : > { %7192 = vmatpush3.msra.mxu1 %v2663_v58  ;;  %7277 = vmatpush3.msra.mxu0 %v3121_v49  ;;  %v3235_v58 = vld [vmem:[#allocation11 + $0x78] sm:$0xff] }
 0x376   : > { %7193 = vmatprep.subr.mxu1 %v2662_v61  ;;  %7278 = vmatprep.subr.mxu0 %v3120_v37 }
 0x377   : > { %7194 = vmatpush3.msra.mxu1 %v2662_v61  ;;  %7279 = vmatpush3.msra.mxu0 %v3120_v37  ;;  %v3234_v37 = vld [vmem:[#allocation11 + $0x70] sm:$0xff] }
 0x378   : > { %7195 = vmatprep.subr.mxu1 %v2661_v34  ;;  %7280 = vmatprep.subr.mxu0 %v3119_v62 }
 0x379   : > { %7196 = vmatpush3.msra.mxu1 %v2661_v34  ;;  %7281 = vmatpush3.msra.mxu0 %v3119_v62 }
 0x37a   : > { %7197 = vmatprep.subr.mxu1 %v2660_v0  ;;  %7282 = vmatprep.subr.mxu0 %v3118_v1 }
 0x37b   : > { %7198 = vmatpush3.msra.mxu1 %v2660_v0  ;;  %7283 = vmatpush3.msra.mxu0 %v3118_v1 }
 0x37c   : > { %7200 = vmatmul.mubr.msk.f32.vlgmr.msra.gmra.mxu1 %vm655_vm0, %v8548_v43  ;;  %7219 = vmatprep.subr.mxu1 %v2848_v2  ;;  %v2842_v43 = vld [vmem:[#allocation5 + $0x118] sm:$0xff] }
 0x37d   : > { %7220 = vmatpush3.msra.mxu1 %v2848_v2  ;;  %7233 = vmatprep.mubr.msk.f32.mxu1 %vm655_vm0, %v2850_v59 }
 0x37e   : > { %7221 = vmatprep.subr.mxu1 %v2847_v3  ;;  %7284 = vmatprep.mubr.msk.f32.mxu0 %vm655_vm0, %v3126_v4 }
 0x37f   : > { %7222 = vmatpush3.msra.mxu1 %v2847_v3  ;;  %7285 = vmatmul.mubr.msk.f32.vlgmr.msra.gmra.mxu0 %vm655_vm0, %v3128_v5 }
 0x380   : > { %7223 = vmatprep.subr.mxu1 %v2846_v6  ;;  %7314 = vmatprep.subr.mxu0 %v3231_v17 }
 0x381   : > { %7224 = vmatpush3.msra.mxu1 %v2846_v6  ;;  %7315 = vmatpush3.msra.mxu0 %v3231_v17 }
 0x382   : > { %7225 = vmatprep.subr.mxu1 %v2845_v7  ;;  %7316 = vmatprep.subr.mxu0 %v3230_v18 }
 0x383   : > { %7226 = vmatpush3.msra.mxu1 %v2845_v7  ;;  %7317 = vmatpush3.msra.mxu0 %v3230_v18  ;;  %v8642_v7 = vld [vmem:[#allocation13] ss:$0 sm:$0xff] }
 0x384   : > { %7227 = vmatprep.subr.mxu1 %v2844_v8  ;;  %7318 = vmatprep.subr.mxu0 %v3229_v19 }
 0x385   : > { %7228 = vmatpush3.msra.mxu1 %v2844_v8  ;;  %7319 = vmatpush3.msra.mxu0 %v3229_v19 }
 0x386   : > { %7229 = vmatprep.subr.mxu1 %v2843_v9  ;;  %7320 = vmatprep.subr.mxu0 %v3228_v32 }
 0x387   : > { %7230 = vmatpush3.msra.mxu1 %v2843_v9  ;;  %7321 = vmatpush3.msra.mxu0 %v3228_v32 }
 0x388   : > { %7231 = vmatprep.subr.mxu1 %v2842_v43  ;;  %7322 = vmatprep.subr.mxu0 %v3227_v20 }
 0x389   : > { %7232 = vmatpush3.msra.mxu1 %v2842_v43  ;;  %7323 = vmatpush3.msra.mxu0 %v3227_v20 }
 0x38a   : > { %7234 = vmatmul.mubr.msk.f32.vlgmr.msra.gmra.mxu1 %vm655_vm0, %v2852_v60  ;;  %7253 = vmatprep.subr.mxu1 %v3032_v10 }
 0x38b   : > { %7254 = vmatpush3.msra.mxu1 %v3032_v10  ;;  %7267 = vmatprep.mubr.msk.f32.mxu1 %vm655_vm0, %v3034_v45  ;;  %v3233_v45 = vld [vmem:[#allocation11 + $0x68] sm:$0xff]  ;;  %v8644_v10 = vld [vmem:[#allocation14] ss:$0 sm:$0xff] }
 0x38c   : > { %7255 = vmatprep.subr.mxu1 %v3031_v11  ;;  %7324 = vmatprep.subr.mxu0 %v3226_v21 }
 0x38d   : > { %7256 = vmatpush3.msra.mxu1 %v3031_v11  ;;  %7325 = vmatpush3.msra.mxu0 %v3226_v21 }
 0x38e   : > { %7257 = vmatprep.subr.mxu1 %v3030_v12  ;;  %7326 = vmatprep.subr.mxu0 %v3225_v22 }
 0x38f   : > { %7258 = vmatpush3.msra.mxu1 %v3030_v12  ;;  %7327 = vmatpush3.msra.mxu0 %v3225_v22 }
 0x390   : > { %7259 = vmatprep.subr.mxu1 %v3029_v13  ;;  %7328 = vmatprep.subr.mxu0 %v3224_v23 }
 0x391   : > { %7260 = vmatpush3.msra.mxu1 %v3029_v13  ;;  %7329 = vmatpush3.msra.mxu0 %v3224_v23 }
 0x392   : > { %7261 = vmatprep.subr.mxu1 %v3028_v14  ;;  %7330 = vmatprep.subr.mxu0 %v3223_v24 }
 0x393   : > { %7262 = vmatpush3.msra.mxu1 %v3028_v14  ;;  %7331 = vmatpush3.msra.mxu0 %v3223_v24 }
 0x394   : > { %7263 = vmatprep.subr.mxu1 %v3027_v16  ;;  %7332 = vmatprep.subr.mxu0 %v3222_v25 }
 0x395   : > { %7264 = vmatpush3.msra.mxu1 %v3027_v16  ;;  %7333 = vmatpush3.msra.mxu0 %v3222_v25 }
 0x396   : > { %7265 = vmatprep.subr.mxu1 %v3026_v15  ;;  %7334 = vmatprep.subr.mxu0 %v3221_v26 }
 0x397   : > { %7266 = vmatpush3.msra.mxu1 %v3026_v15  ;;  %7335 = vmatpush3.msra.mxu0 %v3221_v26 }
 0x398   : > { %7268 = vmatmul.mubr.msk.f32.vlgmr.msra.gmra.mxu1 %vm655_vm0, %v8628_v63  ;;  %7336 = vmatprep.subr.mxu0 %v3220_v27 }
 0x399   : > { %7337 = vmatpush3.msra.mxu0 %v3220_v27  ;;  %7287 = vmatprep.subr.mxu1 %v3243_v30 }
 0x39a   : > { %7368 = vmatprep.subr.mxu0 %v8639_v28  ;;  %7288 = vmatpush3.msra.mxu1 %v3243_v30 }
 0x39b   : > { %7289 = vmatprep.subr.mxu1 %v3242_v31 }
 0x39c   : > { %7290 = vmatpush3.msra.mxu1 %v3242_v31 }
 0x39d   : > { %7291 = vmatprep.subr.mxu1 %v3241_v35 }
 0x39e   : > { %7292 = vmatpush3.msra.mxu1 %v3241_v35 }
 0x39f   : > { %7293 = vmatprep.subr.mxu1 %v3240_v40 }
 0x3a0   : > { %7294 = vmatpush3.msra.mxu1 %v3240_v40 }
 0x3a1   : > { %7295 = vmatprep.subr.mxu1 %v3239_v41 }
 0x3a2   : > { %7296 = vmatpush3.msra.mxu1 %v3239_v41 }
 0x3a3   : > { %7297 = vmatprep.subr.mxu1 %v3238_v47 }
 0x3a4   : > { %7298 = vmatpush3.msra.mxu1 %v3238_v47 }
 0x3a5   : > { %7299 = vmatprep.subr.mxu1 %v3237_v53 }
 0x3a6   : > { %7300 = vmatpush3.msra.mxu1 %v3237_v53 }
 0x3a7   : > { %7301 = vmatprep.subr.mxu1 %v3236_v55 }
 0x3a8   : > { %7302 = vmatpush3.msra.mxu1 %v3236_v55 }
 0x3a9   : > { %7303 = vmatprep.subr.mxu1 %v3235_v58 }
 0x3aa   : > { %7304 = vmatpush3.msra.mxu1 %v3235_v58  ;;  %v7678_v58 = vld [vmem:[#allocation8] ss:$0 sm:$0xff] }
 0x3ab   : > { %7305 = vmatprep.subr.mxu1 %v3234_v37 }
 0x3ac   : > { %7306 = vmatpush3.msra.mxu1 %v3234_v37 }
 0x3ad   : > { %7307 = vmatprep.subr.mxu1 %v3233_v45 }
 0x3ae   : > { %7308 = vmatpush3.msra.mxu1 %v3233_v45  ;;  %v8652_v45 = vld [vmem:[#allocation11 + $0x118] sm:$0xff] }
 0x3bf   : > { %v6917_v29 = vpop.f32.mrf.mxu1 }
 0x3c0   : > { %v1676_v42 = vadd.f32 %v6944_v36, %v6917_v29 }
 0x3c1   : > { %v1591_v33 = vpop.f32.mrf.mxu1 }
 0x3c2   : > { %v1671_v48 = vadd.f32 %v1670_v44, %v1591_v33 }
 0x3cb   : > { %v7052_v60 = vpop.f32.mrf.mxu0 }
 0x3cd   : > { %v2060_v63 = vpop.f32.mrf.mxu0 }
 0x3d7   : > { %v6971_v38 = vpop.f32.mrf.mxu1 }
 0x3d8   : > { %v1776_v50 = vadd.f32 %v6971_v38, %v1676_v42 }
 0x3d9   : > { %v1766_v46 = vpop.f32.mrf.mxu1 }
 0x3da   : > { %v1775_v54 = vadd.f32 %v1766_v46, %v1671_v48  ;;  %v1874_v56 = vadd.f32 %v6998_v52, %v1776_v50 }
 0x3dc   : > { %v1873_v49 = vadd.f32 %v1864_v57, %v1775_v54 }
 0x3e5   : > { %v7106_v3 = vpop.f32.mrf.mxu0 }
 0x3e7   : > { %v2256_v6 = vpop.f32.mrf.mxu0 }
 0x3f0   : > { %v7025_v39 = vpop.f32.mrf.mxu1 }
 0x3f1   : > { %v1972_v59 = vadd.f32 %v7025_v39, %v1874_v56 }
 0x3f2   : > { %v1962_v51 = vpop.f32.mrf.mxu1 }
 0x3f3   : > { %v1971_v34 = vadd.f32 %v1962_v51, %v1873_v49  ;;  %v2070_v62 = vadd.f32 %v7052_v60, %v1972_v59  ;;  %v3232_v60 = vld [vmem:[#allocation11 + $0x60] sm:$0xff] }
 0x3f4   : > { %7309 = vmatprep.subr.mxu1 %v3232_v60 }
 0x3f5   : > { %v2069_v2 = vadd.f32 %v2060_v63, %v1971_v34  ;;  %7310 = vmatpush3.msra.mxu1 %v3232_v60  ;;  %v3899_v60 = vld [vmem:[#allocation11 + $0x2d0] sm:$0xff] }
 0x3f6   : > { %7341 = vmatprep.subr.mxu1 %v8652_v45 }
 0x3f8   : > { %v7150_v19 = vpop.f32.mrf.mxu0 }
 0x3fa   : > { %v2478_v20 = vpop.f32.mrf.mxu0 }
 0x408   : > { %v7079_v61 = vpop.f32.mrf.mxu1 }
 0x409   : > { %v2168_v1 = vadd.f32 %v7079_v61, %v2070_v62  ;;  %v7679_v61 = vld [vmem:[#allocation10] ss:$0 sm:$0xff] }
 0x40a   : > { %v2158_v0 = vpop.f32.mrf.mxu1  ;;  %v7184_v21 = vpop.f32.mrf.mxu0 }
 0x40b   : > { %v2167_v4 = vadd.f32 %v2158_v0, %v2069_v2  ;;  %v2266_v5 = vadd.f32 %v7106_v3, %v2168_v1  ;;  %v3517_v3 = vld [vmem:[#allocation11 + $0x170] sm:$0xff] }
 0x40c   : > { %v2647_v26 = vpop.f32.mrf.mxu0 }
 0x40d   : > { %v2265_v43 = vadd.f32 %v2256_v6, %v2167_v4  ;;  %v3515_v6 = vld [vmem:[#allocation11 + $0x160] sm:$0xff] }
 0x41a   : > { %v7218_v29 = vpop.f32.mrf.mxu0 }
 0x41c   : > { %v2831_v38 = vpop.f32.mrf.mxu0 }
 0x420   : > { %v7133_v8 = vpop.f32.mrf.mxu1 }
 0x421   : > { %v2364_v9 = vadd.f32 %v7133_v8, %v2266_v5  ;;  %v3516_v5 = vld [vmem:[#allocation11 + $0x168] sm:$0xff] }
 0x422   : > { %v2354_v11 = vpop.f32.mrf.mxu1 }
 0x423   : > { %v2372_v12 = vmul.f32 %v8642_v7, %v2364_v9  ;;  %v2363_v13 = vadd.f32 %v2354_v11, %v2265_v43  ;;  %v3514_v9 = vld [vmem:[#allocation11 + $0x158] sm:$0xff]  ;;  %v3512_v43 = vld [vmem:[#allocation11 + $0x148] sm:$0xff]  ;;  %v3511_v11 = vld [vmem:[#allocation11 + $0x140] sm:$0xff] }
 0x425   : > { %v2380_v14 = vadd.f32 %v8644_v10, %v2372_v12  ;;  %v2371_v16 = vmul.f32 %v8642_v7, %v2363_v13  ;;  %v3510_v13 = vld [vmem:[#allocation11 + $0x138] sm:$0xff] }
 0x427   : > { %v2382_v15 = vmax.f32 %v2380_v14, 0.0  ;;  %v2379_v17 = vadd.f32 %v8644_v10, %v2371_v16  ;;  %v3509_v16 = vld [vmem:[#allocation11 + $0x130] sm:$0xff] }
 0x429   : > { %2385 = vst.msk [vmem:[#allocation3 + $0x8] sm:$0xf] %vm2384_vm4, %v2382_v15  ;;  %v2381_v18 = vmax.f32 %v2379_v17, 0.0  ;;  %v3508_v15 = vld [vmem:[#allocation11 + $0x128] sm:$0xff]  ;;  %v3507_v17 = vld [vmem:[#allocation11 + $0x120] sm:$0xff] }
 0x42b   : > { %2383 = vst.msk [vmem:[#allocation3] sm:$0xff] %vm1520_vm3, %v2381_v18  ;;  %v3710_v18 = vld [vmem:[#allocation11 + $0x238] sm:$0xff] }
 0x42c   : > { %v7252_v41 = vpop.f32.mrf.mxu0 }
 0x42e   : > { %v7167_v32 = vpop.f32.mrf.mxu1  ;;  %v3015_v48 = vpop.f32.mrf.mxu0 }
 0x42f   : > { %v2563_v23 = vadd.f32 %v7167_v32, %v7150_v19  ;;  %v3709_v19 = vld [vmem:[#allocation11 + $0x230] sm:$0xff]  ;;  %v3708_v32 = vld [vmem:[#allocation11 + $0x228] sm:$0xff] }
 0x430   : > { %v2557_v22 = vpop.f32.mrf.mxu1 }
 0x431   : > { %v2558_v25 = vadd.f32 %v2557_v22, %v2478_v20  ;;  %v2657_v27 = vadd.f32 %v7184_v21, %v2563_v23  ;;  %v3707_v20 = vld [vmem:[#allocation11 + $0x220] sm:$0xff]  ;;  %v3706_v21 = vld [vmem:[#allocation11 + $0x218] sm:$0xff]  ;;  %v3705_v22 = vld [vmem:[#allocation11 + $0x210] sm:$0xff] }
 0x432   : > { %v3704_v23 = vld [vmem:[#allocation11 + $0x208] sm:$0xff] }
 0x433   : > { %v2656_v31 = vadd.f32 %v2647_v26, %v2558_v25  ;;  %v3702_v25 = vld [vmem:[#allocation11 + $0x1f8] sm:$0xff]  ;;  %v3701_v26 = vld [vmem:[#allocation11 + $0x1f0] sm:$0xff] }
 0x43c   : > { %v7201_v24 = vpop.f32.mrf.mxu1 }
 0x43d   : > { %v2749_v33 = vadd.f32 %v7201_v24, %v2657_v27  ;;  %v3703_v24 = vld [vmem:[#allocation11 + $0x200] sm:$0xff]  ;;  %v3700_v27 = vld [vmem:[#allocation11 + $0x1e8] sm:$0xff] }
 0x43e   : > { %v2739_v30 = vpop.f32.mrf.mxu1 }
 0x43f   : > { %v2748_v36 = vadd.f32 %v2739_v30, %v2656_v31  ;;  %v2841_v40 = vadd.f32 %v7218_v29, %v2749_v33  ;;  %v7286_v39 = vpop.f32.mrf.mxu0  ;;  %v3699_v29 = vld [vmem:[#allocation11 + $0x1e0] sm:$0xff]  ;;  %v3904_v30 = vld [vmem:[#allocation11 + $0x2f8] sm:$0xff] }
 0x441   : > { %v2840_v44 = vadd.f32 %v2831_v38, %v2748_v36  ;;  %v3199_v51 = vpop.f32.mrf.mxu0  ;;  %v3417_v38 = vld [vmem:[#allocation11 + $0x108] sm:$0xff] }
 0x44a   : > { %v7235_v35 = vpop.f32.mrf.mxu1 }
 0x44b   : > { %v2933_v46 = vadd.f32 %v7235_v35, %v2841_v40  ;;  %v3418_v35 = vld [vmem:[#allocation11 + $0x110] sm:$0xff] }
 0x44c   : > { %v2923_v42 = vpop.f32.mrf.mxu1 }
 0x44d   : > { %v2932_v47 = vadd.f32 %v2923_v42, %v2840_v44  ;;  %v3025_v50 = vadd.f32 %v7252_v41, %v2933_v46  ;;  %v3416_v41 = vld [vmem:[#allocation11 + $0x100] sm:$0xff]  ;;  %v3415_v44 = vld [vmem:[#allocation11 + $0xf8] sm:$0xff] }
 0x44f   : > { %v3024_v53 = vadd.f32 %v3015_v48, %v2932_v47  ;;  %v3414_v47 = vld [vmem:[#allocation11 + $0xf0] sm:$0xff]  ;;  %v3413_v48 = vld [vmem:[#allocation11 + $0xe8] sm:$0xff] }
 0x458   : > { %v7269_v52 = vpop.f32.mrf.mxu1 }
 0x459   : > { %v3117_v54 = vadd.f32 %v7269_v52, %v3025_v50 }
 0x45a   : > { %v3107_v55 = vpop.f32.mrf.mxu1 }
 0x45b   : > { %v3209_v56 = vadd.f32 %v7286_v39, %v3117_v54  ;;  %v3116_v57 = vadd.f32 %v3107_v55, %v3024_v53  ;;  %v3412_v39 = vld [vmem:[#allocation11 + $0xe0] sm:$0xff]  ;;  %v3903_v53 = vld [vmem:[#allocation11 + $0x2f0] sm:$0xff]  ;;  %v3411_v54 = vld [vmem:[#allocation11 + $0xd8] sm:$0xff] }
 0x45c   : > { %v3902_v55 = vld [vmem:[#allocation11 + $0x2e8] sm:$0xff] }
 0x45d   : > { %v3211_v59 = vmul.f32 %v7678_v58, %v3209_v56  ;;  %v3208_v49 = vadd.f32 %v3199_v51, %v3116_v57  ;;  %v3410_v57 = vld [vmem:[#allocation11 + $0xd0] sm:$0xff]  ;;  %v3901_v51 = vld [vmem:[#allocation11 + $0x2e0] sm:$0xff] }
 0x45f   : > { %v3213_v37 = vadd.f32 %v7679_v61, %v3211_v59  ;;  %v3210_v34 = vmul.f32 %v7678_v58, %v3208_v49  ;;  %v3409_v58 = vld [vmem:[#allocation11 + $0xc8] sm:$0xff]  ;;  %v3900_v59 = vld [vmem:[#allocation11 + $0x2d8] sm:$0xff]  ;;  %v3408_v49 = vld [vmem:[#allocation11 + $0xc0] sm:$0xff] }
 0x461   : > { %v3215_v62 = vmax.f32 %v3213_v37, 0.0  ;;  %v3212_v63 = vadd.f32 %v7679_v61, %v3210_v34  ;;  %v3613_v61 = vld [vmem:[#allocation11 + $0x1d8] sm:$0xff]  ;;  %v3898_v37 = vld [vmem:[#allocation11 + $0x2c8] sm:$0xff]  ;;  %v3612_v34 = vld [vmem:[#allocation11 + $0x1d0] sm:$0xff] }
 0x463   : > { %3217 = vst.msk [vmem:[#allocation2 + $0x16] sm:$0x3f] %vm1485_vm1, %v3215_v62  ;;  %v3214_v0 = vmax.f32 %v3212_v63, 0.0  ;;  %v3611_v62 = vld [vmem:[#allocation11 + $0x1c8] sm:$0xff]  ;;  %v3896_v63 = vld [vmem:[#allocation11 + $0x2b8] sm:$0xff] }
 0x465   : > { %3216 = vst.msk [vmem:[#allocation2 + $0xe] sm:$0xff] %vm1483_vm2, %v3214_v0  ;;  %v3610_v0 = vld [vmem:[#allocation11 + $0x1c0] sm:$0xff] }
 0x46a   : > { %v3219_v1 = vld [vmem:[#allocation2 + $0x16] sm:$0xf] }
 0x46b   : > { %3248 = vrot.lane.b32.xlu1 %v3219_v1, %s8075_s18  ;;  %v3506_v8 = vld [vmem:[#allocation2 + $0x17] sm:$0xf] }
 0x46c   : > { %v3218_v2 = vld [vmem:[#allocation2 + $0xe] sm:$0xff]  ;;  %v8669_v12 = vld [vmem:[#allocation2 + $0x18] sm:$0xf] }
 0x46d   : > { %3246 = vrot.lane.b32.xlu0 %v3218_v2, %s8075_s18  ;;  %7338 = vmatprep.mubr.msk.f32.mxu0 %vm1520_vm3, %v3218_v2  ;;  %v3505_v4 = vld [vmem:[#allocation2 + $0xf] sm:$0xff] }
 0x46e   : > { %7339 = vmatmul.mubr.msk.f32.vlgmr.msra.gmra.mxu0 %vm1520_vm3, %v3219_v1  ;;  %v8673_v14 = vld [vmem:[#allocation2 + $0x10] sm:$0xff] }
 0x46f   : > { %7369 = vmatpush3.msra.mxu0 %v8639_v28  ;;  %3422 = vrot.lane.b32.xlu1 %v3219_v1, %s8076_s25  ;;  %v3513_v28 = vld [vmem:[#allocation11 + $0x150] sm:$0xff] }
 0x470   : > { %7370 = vmatprep.subr.mxu0 %v3517_v3  ;;  %7392 = vmatprep.mubr.msk.f32.mxu0 %vm1520_vm3, %v3505_v4  ;;  %v3895_v1 = vld [vmem:[#allocation11 + $0x2b0] sm:$0xff] }
 0x471   : > { %7371 = vmatpush3.msra.mxu0 %v3517_v3  ;;  %3420 = vrot.lane.b32.xlu0 %v3218_v2, %s8076_s25  ;;  %v3609_v2 = vld [vmem:[#allocation11 + $0x1b8] sm:$0xff]  ;;  %v3894_v3 = vld [vmem:[#allocation11 + $0x2a8] sm:$0xff] }
 0x472   : > { %7372 = vmatprep.subr.mxu0 %v3516_v5 }
 0x473   : > { %7373 = vmatpush3.msra.mxu0 %v3516_v5  ;;  %3616 = vrot.lane.b32.xlu1 %v3506_v8, %s8075_s18  ;;  %v3893_v5 = vld [vmem:[#allocation11 + $0x2a0] sm:$0xff] }
 0x474   : > { %7374 = vmatprep.subr.mxu0 %v3515_v6 }
 0x475   : > { %7375 = vmatpush3.msra.mxu0 %v3515_v6  ;;  %3614 = vrot.lane.b32.xlu0 %v3505_v4, %s8075_s18  ;;  %v3607_v6 = vld [vmem:[#allocation11 + $0x1a8] sm:$0xff] }
 0x476   : > { %7376 = vmatprep.subr.mxu0 %v3514_v9 }
 0x477   : > { %7377 = vmatpush3.msra.mxu0 %v3514_v9  ;;  %3713 = vrot.lane.b32.xlu1 %v3506_v8, %s8076_s25 }
 0x478   : > { %7378 = vmatprep.subr.mxu0 %v3513_v28 }
 0x479   : > { %7379 = vmatpush3.msra.mxu0 %v3513_v28  ;;  %3711 = vrot.lane.b32.xlu0 %v3505_v4, %s8076_s25  ;;  %v3608_v4 = vld [vmem:[#allocation11 + $0x1b0] sm:$0xff]  ;;  %v3605_v28 = vld [vmem:[#allocation11 + $0x198] sm:$0xff] }
 0x47a   : > { %7380 = vmatprep.subr.mxu0 %v3512_v43 }
 0x47b   : > { %7381 = vmatpush3.msra.mxu0 %v3512_v43  ;;  %3907 = vrot.lane.b32.xlu1 %v8669_v12, %s8075_s18  ;;  %v3604_v43 = vld [vmem:[#allocation11 + $0x190] sm:$0xff] }
 0x47c   : > { %7382 = vmatprep.subr.mxu0 %v3511_v11 }
 0x47d   : > { %7383 = vmatpush3.msra.mxu0 %v3511_v11  ;;  %3905 = vrot.lane.b32.xlu0 %v8673_v14, %s8075_s18  ;;  %v3603_v11 = vld [vmem:[#allocation11 + $0x188] sm:$0xff] }
 0x47e   : > { %7384 = vmatprep.subr.mxu0 %v3510_v13 }
 0x47f   : > { %7385 = vmatpush3.msra.mxu0 %v3510_v13  ;;  %4004 = vrot.lane.b32.xlu1 %v8669_v12, %s8076_s25  ;;  %v3602_v13 = vld [vmem:[#allocation11 + $0x180] sm:$0xff] }
 0x480   : > { %7386 = vmatprep.subr.mxu0 %v3509_v16 }
 0x481   : > { %7387 = vmatpush3.msra.mxu0 %v3509_v16  ;;  %4002 = vrot.lane.b32.xlu0 %v8673_v14, %s8076_s25  ;;  %v3809_v16 = vld [vmem:[#allocation11 + $0x298] sm:$0xff] }
 0x482   : > { %7388 = vmatprep.subr.mxu0 %v3508_v15 }
 0x483   : > { %7389 = vmatpush3.msra.mxu0 %v3508_v15  ;;  %v3808_v15 = vld [vmem:[#allocation11 + $0x290] sm:$0xff] }
 0x484   : > { %7390 = vmatprep.subr.mxu0 %v3507_v17 }
 0x485   : > { %7391 = vmatpush3.msra.mxu0 %v3507_v17  ;;  %v3807_v17 = vld [vmem:[#allocation11 + $0x288] sm:$0xff] }
 0x486   : > { %7393 = vmatmul.mubr.msk.f32.vlgmr.msra.gmra.mxu0 %vm1520_vm3, %v3506_v8  ;;  %7422 = vmatprep.subr.mxu0 %v3710_v18  ;;  %v3606_v8 = vld [vmem:[#allocation11 + $0x1a0] sm:$0xff] }
 0x487   : > { %7423 = vmatpush3.msra.mxu0 %v3710_v18  ;;  %v3806_v18 = vld [vmem:[#allocation11 + $0x280] sm:$0xff] }
 0x488   : > { %7424 = vmatprep.subr.mxu0 %v3709_v19 }
 0x489   : > { %7425 = vmatpush3.msra.mxu0 %v3709_v19  ;;  %v3805_v19 = vld [vmem:[#allocation11 + $0x278] sm:$0xff] }
 0x48a   : > { %7426 = vmatprep.subr.mxu0 %v3708_v32 }
 0x48b   : > { %7427 = vmatpush3.msra.mxu0 %v3708_v32  ;;  %v3804_v32 = vld [vmem:[#allocation11 + $0x270] sm:$0xff] }
 0x48c   : > { %7428 = vmatprep.subr.mxu0 %v3707_v20 }
 0x48d   : > { %7429 = vmatpush3.msra.mxu0 %v3707_v20  ;;  %v3803_v20 = vld [vmem:[#allocation11 + $0x268] sm:$0xff] }
 0x48e   : > { %7430 = vmatprep.subr.mxu0 %v3706_v21 }
 0x48f   : > { %7431 = vmatpush3.msra.mxu0 %v3706_v21  ;;  %v3802_v21 = vld [vmem:[#allocation11 + $0x260] sm:$0xff] }
 0x490   : > { %7432 = vmatprep.subr.mxu0 %v3705_v22 }
 0x491   : > { %7433 = vmatpush3.msra.mxu0 %v3705_v22  ;;  %v3801_v22 = vld [vmem:[#allocation11 + $0x258] sm:$0xff] }
 0x492   : > { %7434 = vmatprep.subr.mxu0 %v3704_v23 }
 0x493   : > { %7435 = vmatpush3.msra.mxu0 %v3704_v23  ;;  %v3799_v23 = vld [vmem:[#allocation11 + $0x248] sm:$0xff] }
 0x494   : > { %7436 = vmatprep.subr.mxu0 %v3703_v24 }
 0x495   : > { %7437 = vmatpush3.msra.mxu0 %v3703_v24  ;;  %v3798_v24 = vld [vmem:[#allocation11 + $0x240] sm:$0xff] }
 0x496   : > { %7438 = vmatprep.subr.mxu0 %v3702_v25 }
 0x497   : > { %7439 = vmatpush3.msra.mxu0 %v3702_v25  ;;  %v4001_v25 = vld [vmem:[#allocation11 + $0x358] sm:$0xff] }
 0x498   : > { %7440 = vmatprep.subr.mxu0 %v3701_v26 }
 0x499   : > { %7441 = vmatpush3.msra.mxu0 %v3701_v26  ;;  %v4000_v26 = vld [vmem:[#allocation11 + $0x350] sm:$0xff] }
 0x49a   : > { %7442 = vmatprep.subr.mxu0 %v3700_v27 }
 0x49b   : > { %7443 = vmatpush3.msra.mxu0 %v3700_v27 }
 0x49c   : > { %7444 = vmatprep.subr.mxu0 %v3699_v29 }
 0x49d   : > { %7445 = vmatpush3.msra.mxu0 %v3699_v29  ;;  %v3999_v29 = vld [vmem:[#allocation11 + $0x348] sm:$0xff] }
 0x49e   : > { %7476 = vmatprep.subr.mxu0 %v3904_v30 }
 0x4dd   : > { %v3249_v31 = vpop.permute.xlu1 %3248 }
 0x4df   : > { %v3247_v33 = vpop.permute.xlu0 %3246 }
 0x4e0   : > { %7311 = vmatprep.mubr.msk.f32.mxu1 %vm1520_vm3, %v3247_v33  ;;  %v3996_v33 = vld [vmem:[#allocation11 + $0x330] sm:$0xff] }
 0x4e1   : > { %v8683_v36 = vpop.permute.xlu1 %3422  ;;  %7312 = vmatmul.mubr.msk.f32.vlgmr.msra.gmra.mxu1 %vm1520_vm3, %v3249_v31  ;;  %v3997_v31 = vld [vmem:[#allocation11 + $0x338] sm:$0xff] }
 0x4e2   : > { %7342 = vmatpush3.msra.mxu1 %v8652_v45  ;;  %v3897_v45 = vld [vmem:[#allocation11 + $0x2c0] sm:$0xff] }
 0x4e3   : > { %7343 = vmatprep.subr.mxu1 %v3418_v35  ;;  %v3421_v40 = vpop.permute.xlu0 %3420 }
 0x4e4   : > { %7344 = vmatpush3.msra.mxu1 %v3418_v35  ;;  %7365 = vmatprep.mubr.msk.f32.mxu1 %vm1520_vm3, %v3421_v40  ;;  %v3995_v35 = vld [vmem:[#allocation11 + $0x328] sm:$0xff] }
 0x4e5   : > { %7345 = vmatprep.subr.mxu1 %v3417_v38  ;;  %v8688_v42 = vpop.permute.xlu1 %3616  ;;  %v3991_v40 = vld [vmem:[#allocation11 + $0x308] sm:$0xff] }
 0x4e6   : > { %7346 = vmatpush3.msra.mxu1 %v3417_v38  ;;  %v3992_v38 = vld [vmem:[#allocation11 + $0x310] sm:$0xff] }
 0x4e7   : > { %7347 = vmatprep.subr.mxu1 %v3416_v41  ;;  %v3615_v46 = vpop.permute.xlu0 %3614 }
 0x4e8   : > { %7348 = vmatpush3.msra.mxu1 %v3416_v41  ;;  %v3990_v41 = vld [vmem:[#allocation11 + $0x300] sm:$0xff] }
 0x4e9   : > { %7349 = vmatprep.subr.mxu1 %v3415_v44  ;;  %v3714_v52 = vpop.permute.xlu1 %3713 }
 0x4ea   : > { %7350 = vmatpush3.msra.mxu1 %v3415_v44  ;;  %v8077_v44 = vmov 0.0  }
 0x4eb   : > { %7351 = vmatprep.subr.mxu1 %v3414_v47  ;;  %v3712_v50 = vpop.permute.xlu0 %3711  ;;  %4095 = vst [vmem:[#allocation4] sm:$0xf] %v8077_v44 }
 0x4ec   : > { %7352 = vmatpush3.msra.mxu1 %v3414_v47  ;;  %7446 = vmatprep.mubr.msk.f32.mxu0 %vm1520_vm3, %v3712_v50 }
 0x4ed   : > { %7353 = vmatprep.subr.mxu1 %v3413_v48  ;;  %7447 = vmatmul.mubr.msk.f32.vlgmr.msra.gmra.mxu0 %vm1520_vm3, %v3714_v52  ;;  %v3908_v9 = vpop.permute.xlu1 %3907 }
 0x4ee   : > { %7354 = vmatpush3.msra.mxu1 %v3413_v48  ;;  %7477 = vmatpush3.msra.mxu0 %v3904_v30  ;;  %v3998_v30 = vld [vmem:[#allocation11 + $0x340] sm:$0xff] }
 0x4ef   : > { %7355 = vmatprep.subr.mxu1 %v3412_v39  ;;  %7478 = vmatprep.subr.mxu0 %v3903_v53  ;;  %v3906_v56 = vpop.permute.xlu0 %3905 }
 0x4f0   : > { %7356 = vmatpush3.msra.mxu1 %v3412_v39  ;;  %7479 = vmatpush3.msra.mxu0 %v3903_v53 }
 0x4f1   : > { %7357 = vmatprep.subr.mxu1 %v3411_v54  ;;  %7480 = vmatprep.subr.mxu0 %v3902_v55 }
 0x4f2   : > { %7500 = vmatprep.mubr.msk.f32.mxu0 %vm1520_vm3, %v3906_v56  ;;  %7358 = vmatpush3.msra.mxu1 %v3411_v54 }
 0x4f3   : > { %7481 = vmatpush3.msra.mxu0 %v3902_v55  ;;  %7359 = vmatprep.subr.mxu1 %v3410_v57  ;;  %v4003_v27 = vpop.permute.xlu0 %4002 }
 0x4f4   : > { %7482 = vmatprep.subr.mxu0 %v3901_v51  ;;  %7360 = vmatpush3.msra.mxu1 %v3410_v57 }
 0x4f5   : > { %7483 = vmatpush3.msra.mxu0 %v3901_v51  ;;  %7361 = vmatprep.subr.mxu1 %v3409_v58 }
 0x4f6   : > { %7484 = vmatprep.subr.mxu0 %v3900_v59  ;;  %7362 = vmatpush3.msra.mxu1 %v3409_v58 }
 0x4f7   : > { %7485 = vmatpush3.msra.mxu0 %v3900_v59  ;;  %7363 = vmatprep.subr.mxu1 %v3408_v49 }
 0x4f8   : > { %7486 = vmatprep.subr.mxu0 %v3899_v60  ;;  %7364 = vmatpush3.msra.mxu1 %v3408_v49 }
 0x4f9   : > { %7487 = vmatpush3.msra.mxu0 %v3899_v60  ;;  %7366 = vmatmul.mubr.msk.f32.vlgmr.msra.gmra.mxu1 %vm1520_vm3, %v8683_v36  ;;  %v3993_v36 = vld [vmem:[#allocation11 + $0x318] sm:$0xff] }
 0x4fa   : > { %7395 = vmatprep.subr.mxu1 %v3613_v61  ;;  %7488 = vmatprep.subr.mxu0 %v3898_v37 }
 0x4fb   : > { %7396 = vmatpush3.msra.mxu1 %v3613_v61  ;;  %7419 = vmatprep.mubr.msk.f32.mxu1 %vm1520_vm3, %v3615_v46 }
 0x4fc   : > { %7489 = vmatpush3.msra.mxu0 %v3898_v37  ;;  %7397 = vmatprep.subr.mxu1 %v3612_v34 }
 0x4fd   : > { %7490 = vmatprep.subr.mxu0 %v3897_v45  ;;  %7398 = vmatpush3.msra.mxu1 %v3612_v34 }
 0x4fe   : > { %7491 = vmatpush3.msra.mxu0 %v3897_v45  ;;  %7399 = vmatprep.subr.mxu1 %v3611_v62 }
 0x4ff   : > { %7492 = vmatprep.subr.mxu0 %v3896_v63  ;;  %7400 = vmatpush3.msra.mxu1 %v3611_v62 }
 0x500   : > { %7493 = vmatpush3.msra.mxu0 %v3896_v63  ;;  %7401 = vmatprep.subr.mxu1 %v3610_v0 }
 0x501   : > { %7494 = vmatprep.subr.mxu0 %v3895_v1  ;;  %7402 = vmatpush3.msra.mxu1 %v3610_v0 }
 0x502   : > { %7495 = vmatpush3.msra.mxu0 %v3895_v1  ;;  %7403 = vmatprep.subr.mxu1 %v3609_v2 }
 0x503   : > { %7496 = vmatprep.subr.mxu0 %v3894_v3  ;;  %7404 = vmatpush3.msra.mxu1 %v3609_v2 }
 0x504   : > { %7497 = vmatpush3.msra.mxu0 %v3894_v3  ;;  %7405 = vmatprep.subr.mxu1 %v3608_v4 }
 0x505   : > { %7498 = vmatprep.subr.mxu0 %v3893_v5  ;;  %7406 = vmatpush3.msra.mxu1 %v3608_v4 }
 0x506   : > { %7499 = vmatpush3.msra.mxu0 %v3893_v5  ;;  %7407 = vmatprep.subr.mxu1 %v3607_v6 }
 0x507   : > { %7501 = vmatmul.mubr.msk.f32.vlgmr.msra.gmra.mxu0 %vm1520_vm3, %v3908_v9  ;;  %7408 = vmatpush3.msra.mxu1 %v3607_v6 }
 0x508   : > { %7409 = vmatprep.subr.mxu1 %v3606_v8 }
 0x509   : > { %7410 = vmatpush3.msra.mxu1 %v3606_v8 }
 0x50a   : > { %7411 = vmatprep.subr.mxu1 %v3605_v28 }
 0x50b   : > { %7412 = vmatpush3.msra.mxu1 %v3605_v28 }
 0x50c   : > { %7413 = vmatprep.subr.mxu1 %v3604_v43 }
 0x50d   : > { %7414 = vmatpush3.msra.mxu1 %v3604_v43 }
 0x50e   : > { %7415 = vmatprep.subr.mxu1 %v3603_v11 }
 0x50f   : > { %7416 = vmatpush3.msra.mxu1 %v3603_v11 }
 0x510   : > { %7417 = vmatprep.subr.mxu1 %v3602_v13 }
 0x511   : > { %7418 = vmatpush3.msra.mxu1 %v3602_v13 }
 0x512   : > { %7420 = vmatmul.mubr.msk.f32.vlgmr.msra.gmra.mxu1 %vm1520_vm3, %v8688_v42  ;;  %7449 = vmatprep.subr.mxu1 %v3809_v16  ;;  %v4005_v42 = vpop.permute.xlu1 %4004 }
 0x513   : > { %7450 = vmatpush3.msra.mxu1 %v3809_v16  ;;  %7473 = vmatprep.mubr.msk.f32.mxu1 %vm1520_vm3, %v8673_v14  ;;  %v3800_v14 = vld [vmem:[#allocation11 + $0x250] sm:$0xff] }
 0x514   : > { %7451 = vmatprep.subr.mxu1 %v3808_v15 }
 0x515   : > { %7452 = vmatpush3.msra.mxu1 %v3808_v15 }
 0x516   : > { %7453 = vmatprep.subr.mxu1 %v3807_v17 }
 0x517   : > { %7454 = vmatpush3.msra.mxu1 %v3807_v17 }
 0x518   : > { %7455 = vmatprep.subr.mxu1 %v3806_v18 }
 0x519   : > { %7456 = vmatpush3.msra.mxu1 %v3806_v18 }
 0x51a   : > { %7457 = vmatprep.subr.mxu1 %v3805_v19 }
 0x51b   : > { %7458 = vmatpush3.msra.mxu1 %v3805_v19 }
 0x51c   : > { %7459 = vmatprep.subr.mxu1 %v3804_v32 }
 0x51d   : > { %7460 = vmatpush3.msra.mxu1 %v3804_v32 }
 0x51e   : > { %7461 = vmatprep.subr.mxu1 %v3803_v20 }
 0x51f   : > { %7462 = vmatpush3.msra.mxu1 %v3803_v20 }
 0x520   : > { %7463 = vmatprep.subr.mxu1 %v3802_v21 }
 0x521   : > { %7464 = vmatpush3.msra.mxu1 %v3802_v21 }
 0x522   : > { %7465 = vmatprep.subr.mxu1 %v3801_v22 }
 0x523   : > { %7466 = vmatpush3.msra.mxu1 %v3801_v22 }
 0x524   : > { %7467 = vmatprep.subr.mxu1 %v3800_v14 }
 0x525   : > { %7468 = vmatpush3.msra.mxu1 %v3800_v14 }
 0x526   : > { %7469 = vmatprep.subr.mxu1 %v3799_v23 }
 0x527   : > { %7470 = vmatpush3.msra.mxu1 %v3799_v23 }
 0x528   : > { %7471 = vmatprep.subr.mxu1 %v3798_v24 }
 0x529   : > { %7472 = vmatpush3.msra.mxu1 %v3798_v24 }
 0x52a   : > { %7474 = vmatmul.mubr.msk.f32.vlgmr.msra.gmra.mxu1 %vm1520_vm3, %v8669_v12  ;;  %7503 = vmatprep.subr.mxu1 %v4001_v25  ;;  %v3994_v12 = vld [vmem:[#allocation11 + $0x320] sm:$0xff] }
 0x52b   : > { %7504 = vmatpush3.msra.mxu1 %v4001_v25  ;;  %7527 = vmatprep.mubr.msk.f32.mxu1 %vm1520_vm3, %v4003_v27 }
 0x52c   : > { %7505 = vmatprep.subr.mxu1 %v4000_v26 }
 0x52d   : > { %7506 = vmatpush3.msra.mxu1 %v4000_v26 }
 0x52e   : > { %7507 = vmatprep.subr.mxu1 %v3999_v29  ;;  %v7340_v48 = vpop.f32.mrf.mxu0 }
 0x52f   : > { %7508 = vmatpush3.msra.mxu1 %v3999_v29 }
 0x530   : > { %7509 = vmatprep.subr.mxu1 %v3998_v30  ;;  %v3399_v39 = vpop.f32.mrf.mxu0 }
 0x531   : > { %7510 = vmatpush3.msra.mxu1 %v3998_v30 }
 0x532   : > { %7511 = vmatprep.subr.mxu1 %v3997_v31 }
 0x533   : > { %7512 = vmatpush3.msra.mxu1 %v3997_v31 }
 0x534   : > { %7513 = vmatprep.subr.mxu1 %v3996_v33 }
 0x535   : > { %7514 = vmatpush3.msra.mxu1 %v3996_v33 }
 0x536   : > { %7515 = vmatprep.subr.mxu1 %v3995_v35 }
 0x537   : > { %7516 = vmatpush3.msra.mxu1 %v3995_v35 }
 0x538   : > { %7517 = vmatprep.subr.mxu1 %v3994_v12 }
 0x539   : > { %7518 = vmatpush3.msra.mxu1 %v3994_v12 }
 0x53a   : > { %7519 = vmatprep.subr.mxu1 %v3993_v36 }
 0x53b   : > { %7520 = vmatpush3.msra.mxu1 %v3993_v36 }
 0x53c   : > { %7521 = vmatprep.subr.mxu1 %v3992_v38 }
 0x53d   : > { %7522 = vmatpush3.msra.mxu1 %v3992_v38 }
 0x53e   : > { %7523 = vmatprep.subr.mxu1 %v3991_v40 }
 0x53f   : > { %7524 = vmatpush3.msra.mxu1 %v3991_v40 }
 0x540   : > { %7525 = vmatprep.subr.mxu1 %v3990_v41 }
 0x541   : > { %7526 = vmatpush3.msra.mxu1 %v3990_v41 }
 0x542   : > { %7528 = vmatmul.mubr.msk.f32.vlgmr.msra.gmra.mxu1 %vm1520_vm3, %v4005_v42 }
 0x546   : > { %v7394_v56 = vpop.f32.mrf.mxu0 }
 0x548   : > { %v3591_v59 = vpop.f32.mrf.mxu0 }
 0x5a1   : > { %v7313_v46 = vpop.f32.mrf.mxu1 }
 0x5a2   : > { %v3405_v52 = vadd.f32 %v7340_v48, %v7313_v46 }
 0x5a3   : > { %v3320_v47 = vpop.f32.mrf.mxu1 }
 0x5a4   : > { %v3400_v54 = vadd.f32 %v3399_v39, %v3320_v47 }
 0x5ad   : > { %v7448_v37 = vpop.f32.mrf.mxu0 }
 0x5af   : > { %v3785_v63 = vpop.f32.mrf.mxu0 }
 0x5b9   : > { %v7367_v50 = vpop.f32.mrf.mxu1 }
 0x5ba   : > { %v3504_v55 = vadd.f32 %v7367_v50, %v3405_v52 }
 0x5bb   : > { %v3494_v53 = vpop.f32.mrf.mxu1 }
 0x5bc   : > { %v3503_v51 = vadd.f32 %v3494_v53, %v3400_v54  ;;  %v3601_v58 = vadd.f32 %v7394_v56, %v3504_v55 }
 0x5be   : > { %v3600_v61 = vadd.f32 %v3591_v59, %v3503_v51 }
 0x5c7   : > { %v7502_v3 = vpop.f32.mrf.mxu0 }
 0x5c9   : > { %v3979_v6 = vpop.f32.mrf.mxu0 }
 0x5d2   : > { %v7421_v57 = vpop.f32.mrf.mxu1 }
 0x5d3   : > { %v3698_v60 = vadd.f32 %v7421_v57, %v3601_v58 }
 0x5d4   : > { %v3688_v49 = vpop.f32.mrf.mxu1 }
 0x5d5   : > { %v3697_v45 = vadd.f32 %v3688_v49, %v3600_v61  ;;  %v3795_v62 = vadd.f32 %v7448_v37, %v3698_v60 }
 0x5d7   : > { %v3794_v2 = vadd.f32 %v3785_v63, %v3697_v45 }
 0x5ea   : > { %v7475_v34 = vpop.f32.mrf.mxu1 }
 0x5eb   : > { %v3892_v1 = vadd.f32 %v7475_v34, %v3795_v62 }
 0x5ec   : > { %v3882_v0 = vpop.f32.mrf.mxu1 }
 0x5ed   : > { %v3891_v4 = vadd.f32 %v3882_v0, %v3794_v2  ;;  %v3989_v5 = vadd.f32 %v7502_v3, %v3892_v1 }
 0x5ef   : > { %v3988_v28 = vadd.f32 %v3979_v6, %v3891_v4 }
 0x602   : > { %v7529_v8 = vpop.f32.mrf.mxu1 }
 0x603   : > { %v4086_v9 = vadd.f32 %v7529_v8, %v3989_v5 }
 0x604   : > { %v4076_v43 = vpop.f32.mrf.mxu1 }
 0x605   : > { %v4088_v11 = vmul.f32 %v8642_v7, %v4086_v9  ;;  %v4085_v13 = vadd.f32 %v4076_v43, %v3988_v28 }
 0x607   : > { %v4090_v16 = vadd.f32 %v8644_v10, %v4088_v11  ;;  %v4087_v15 = vmul.f32 %v8642_v7, %v4085_v13 }
 0x609   : > { %v4092_v17 = vmax.f32 %v4090_v16, 0.0  ;;  %v4089_v18 = vadd.f32 %v8644_v10, %v4087_v15 }
 0x60b   : > { %4094 = vst.msk [vmem:[#allocation3 + $0x14] sm:$0xf] %vm2384_vm4, %v4092_v17  ;;  %v4091_v19 = vmax.f32 %v4089_v18, 0.0 }
 0x60d   : > { %4093 = vst.msk [vmem:[#allocation3 + $0xc] sm:$0xff] %vm1520_vm3, %v4091_v19 }
 0x60e PF: > { %v4130_v32 = vld [vmem:[%s8399_s30 + $0x58] sm:$0xff]  ;;  %v4129_v20 = vld [vmem:[%s8399_s30 + $0x50] sm:$0xff]  ;;  %v4128_v21 = vld [vmem:[%s8399_s30 + $0x48] sm:$0xff]  ;;  %v8078_v10 = vmov 0.0   ;;  %vm4117_vm5 = vcmask 1040384   ;;  %vm4155_vm6 = vcmask 785408  }
 0x60f   : > { %v4154_v22 = vunpack.c.h.bf16 %v4130_v32  ;;  %v4153_v7 = vunpack.c.l.bf16 %v4130_v32  ;;  %v4152_v14 = vunpack.c.h.bf16 %v4129_v20  ;;  %4223 = vmatprep.mubr.f32.mxu1 %v8078_v10  ;;  %4458 = vmatprep.mubr.f32.mxu0 %v8078_v10  ;;  %v4151_v23 = vunpack.c.l.bf16 %v4129_v20  ;;  %v4127_v24 = vld [vmem:[%s8399_s30 + $0x40] sm:$0xff]  ;;  %v4126_v27 = vld [vmem:[%s8399_s30 + $0x38] sm:$0xff]  ;;  %v4125_v33 = vld [vmem:[%s8399_s30 + $0x30] sm:$0xff]  ;;  %p6279_p13 = scmp.ne.s32.totalorder %s8172_s14, 3 }
 0x610   : > { %v4150_v25 = vunpack.c.h.bf16 %v4128_v21  ;;  %v4149_v26 = vunpack.c.l.bf16 %v4128_v21  ;;  %v4148_v29 = vunpack.c.h.bf16 %v4127_v24  ;;  %v6160_v30 = vld [vmem:[%s8399_s30 + $0x118] sm:$0xff]  ;;  %v4147_v31 = vunpack.c.l.bf16 %v4127_v24  ;;  %v6159_v35 = vld [vmem:[%s8399_s30 + $0x110] sm:$0xff]  ;;  %v6158_v36 = vld [vmem:[%s8399_s30 + $0x108] sm:$0xff] }
 0x611   : > { %4167 = vmatprep.subr.mxu1 %v4154_v22  ;;  %v4146_v12 = vunpack.c.h.bf16 %v4126_v27  ;;  %v4145_v38 = vunpack.c.l.bf16 %v4126_v27  ;;  %v4124_v40 = vld [vmem:[%s8399_s30 + $0x28] sm:$0xff]  ;;  %v4390_v41 = vunpack.c.h.bf16 %v6160_v30  ;;  %v4389_v42 = vunpack.c.l.bf16 %v6160_v30  ;;  %v6157_v48 = vld [vmem:[%s8399_s30 + $0x100] sm:$0xff]  ;;  %v6156_v55 = vld [vmem:[%s8399_s30 + $0xf8] sm:$0xff] }
 0x612   : > { %4168 = vmatpush1.msra.mxu1 %v4153_v7  ;;  %v4144_v44 = vunpack.c.h.bf16 %v4125_v33  ;;  %v4388_v46 = vunpack.c.h.bf16 %v6159_v35  ;;  %v4387_v47 = vunpack.c.l.bf16 %v6159_v35  ;;  %v4143_v50 = vunpack.c.l.bf16 %v4125_v33  ;;  %v4123_v52 = vld [vmem:[%s8399_s30 + $0x20] sm:$0xff]  ;;  %v4122_v57 = vld [vmem:[%s8399_s30 + $0x18] sm:$0xff]  ;;  %v6155_v49 = vld [vmem:[%s8399_s30 + $0xf0] sm:$0xff] }
 0x613   : > { %4169 = vmatprep.subr.mxu1 %v4152_v14  ;;  %4402 = vmatprep.subr.mxu0 %v4390_v41  ;;  %v4386_v39 = vunpack.c.h.bf16 %v6158_v36  ;;  %v4142_v53 = vunpack.c.h.bf16 %v4124_v40  ;;  %v4385_v54 = vunpack.c.l.bf16 %v6158_v36  ;;  %v4141_v56 = vunpack.c.l.bf16 %v4124_v40  ;;  %v4121_v61 = vld [vmem:[%s8399_s30 + $0x10] sm:$0xff]  ;;  %v6154_v62 = vld [vmem:[%s8399_s30 + $0xe8] sm:$0xff]  ;;  %v6153_v5 = vld [vmem:[%s8399_s30 + $0xe0] sm:$0xff] }
 0x614   : > { %4170 = vmatpush1.msra.mxu1 %v4151_v23  ;;  %4403 = vmatpush1.msra.mxu0 %v4389_v42  ;;  %v4384_v51 = vunpack.c.h.bf16 %v6157_v48  ;;  %v4140_v58 = vunpack.c.h.bf16 %v4123_v52  ;;  %v4383_v59 = vunpack.c.l.bf16 %v6157_v48  ;;  %v4139_v60 = vunpack.c.l.bf16 %v4123_v52  ;;  %v4120_v0 = vld [vmem:[%s8399_s30 + $0x8] sm:$0xff]  ;;  %v8731_v3 = vld [vmem:[#allocation3 + $0xc] sm:$0xff]  ;;  %v4119_v8 = vld [vmem:[%s8399_s30] sm:$0xff] }
 0x615   : > { %4171 = vmatprep.subr.mxu1 %v4150_v25  ;;  %4404 = vmatprep.subr.mxu0 %v4388_v46  ;;  %v4382_v37 = vunpack.c.h.bf16 %v6156_v55  ;;  %v4138_v34 = vunpack.c.h.bf16 %v4122_v57  ;;  %v4381_v45 = vunpack.c.l.bf16 %v6156_v55  ;;  %v4137_v63 = vunpack.c.l.bf16 %v4122_v57  ;;  %v6152_v11 = vld [vmem:[%s8399_s30 + $0xd8] sm:$0xff]  ;;  %v8738_v19 = vld [vmem:[#allocation3] sm:$0xff]  ;;  %v6146_v21 = vld [vmem:[%s8399_s30 + $0xb0] sm:$0xff] }
 0x616   : > { %4172 = vmatpush1.msra.mxu1 %v4149_v26  ;;  %4405 = vmatpush1.msra.mxu0 %v4387_v47  ;;  %v4380_v1 = vunpack.c.h.bf16 %v6155_v49  ;;  %v4136_v2 = vunpack.c.h.bf16 %v4121_v61  ;;  %v4379_v4 = vunpack.c.l.bf16 %v6155_v49  ;;  %v4135_v6 = vunpack.c.l.bf16 %v4121_v61  ;;  %v6147_v15 = vld [vmem:[%s8399_s30 + $0xb8] sm:$0xff]  ;;  %v6151_v7 = vld [vmem:[%s8399_s30 + $0xd0] sm:$0xff]  ;;  %v6145_v25 = vld [vmem:[%s8399_s30 + $0xa8] sm:$0xff] }
 0x617   : > { %4173 = vmatprep.subr.mxu1 %v4148_v29  ;;  %4406 = vmatprep.subr.mxu0 %v4386_v39  ;;  %v4378_v9 = vunpack.c.h.bf16 %v6154_v62  ;;  %v4134_v28 = vunpack.c.h.bf16 %v4120_v0  ;;  %v4377_v43 = vunpack.c.l.bf16 %v6154_v62  ;;  %v4133_v13 = vunpack.c.l.bf16 %v4120_v0  ;;  %v6150_v27 = vld [vmem:[%s8399_s30 + $0xc8] sm:$0xff]  ;;  %v6144_v33 = vld [vmem:[%s8399_s30 + $0xa0] sm:$0xff]  ;;  %v6143_v41 = vld [vmem:[%s8399_s30 + $0x98] sm:$0xff] }
 0x618   : > { %4174 = vmatpush1.msra.mxu1 %v4147_v31  ;;  %4407 = vmatpush1.msra.mxu0 %v4385_v54  ;;  %v4115_v16 = vrot.slane %v8731_v3, 7  ;;  %v4376_v17 = vunpack.c.h.bf16 %v6153_v5  ;;  %v4132_v18 = vunpack.c.h.bf16 %v4119_v8  ;;  %v4375_v32 = vunpack.c.l.bf16 %v6153_v5  ;;  %v6186_v39 = vld [vmem:[%s8399_s30 + $0x1d8] sm:$0xff]  ;;  %v6185_v57 = vld [vmem:[%s8399_s30 + $0x1d0] sm:$0xff] }
 0x619   : > { %4175 = vmatprep.subr.mxu1 %v4146_v12  ;;  %4408 = vmatprep.subr.mxu0 %v4384_v51  ;;  %v4131_v20 = vunpack.c.l.bf16 %v4119_v8  ;;  %v4374_v22 = vunpack.c.h.bf16 %v6152_v11  ;;  %v4272_v14 = vunpack.c.h.bf16 %v6147_v15  ;;  %v4271_v24 = vunpack.c.l.bf16 %v6147_v15  ;;  %v6181_v15 = vld [vmem:[%s8399_s30 + $0x1b0] sm:$0xff] }
 0x61a   : > { %4176 = vmatpush1.msra.mxu1 %v4145_v38  ;;  %4409 = vmatpush1.msra.mxu0 %v4383_v59  ;;  %v4118_v23 = vsel %vm4117_vm5, %v8738_v19, %v4115_v16  ;;  %v4373_v26 = vunpack.c.l.bf16 %v6152_v11  ;;  %v4270_v29 = vunpack.c.h.bf16 %v6146_v21  ;;  %v4372_v30 = vunpack.c.h.bf16 %v6151_v7  ;;  %v6149_v38 = vld [vmem:[%s8399_s30 + $0xc0] sm:$0xff] }
 0x61b   : > { %4177 = vmatprep.subr.mxu1 %v4144_v44  ;;  %4410 = vmatprep.subr.mxu0 %v4382_v37  ;;  %v4269_v31 = vunpack.c.l.bf16 %v6146_v21  ;;  %v4371_v35 = vunpack.c.l.bf16 %v6151_v7  ;;  %v4268_v12 = vunpack.c.h.bf16 %v6145_v25  ;;  %v4370_v36 = vunpack.c.h.bf16 %v6150_v27  ;;  %v6184_v37 = vld [vmem:[%s8399_s30 + $0x1c8] sm:$0xff] }
 0x61c   : > { %4178 = vmatpush1.msra.mxu1 %v4143_v50  ;;  %4411 = vmatpush1.msra.mxu0 %v4381_v45  ;;  %v4267_v40 = vunpack.c.l.bf16 %v6145_v25  ;;  %v4266_v42 = vunpack.c.h.bf16 %v6144_v33  ;;  %v4369_v44 = vunpack.c.l.bf16 %v6150_v27  ;;  %v4349_v46 = vrot.slane %v8738_v19, 2  ;;  %v6142_v50 = vld [vmem:[%s8399_s30 + $0x90] sm:$0xff]  ;;  %v6173_v25 = vld [vmem:[%s8399_s30 + $0x178] sm:$0xff] }
 0x61d   : > { %4179 = vmatprep.subr.mxu1 %v4142_v53  ;;  %4412 = vmatprep.subr.mxu0 %v4380_v1  ;;  %v4351_v47 = vrot.slane %v8731_v3, 1  ;;  %v4265_v48 = vunpack.c.l.bf16 %v6144_v33  ;;  %v4368_v52 = vunpack.c.h.bf16 %v6149_v38  ;;  %v4264_v53 = vunpack.c.h.bf16 %v6143_v41  ;;  %v6183_v1 = vld [vmem:[%s8399_s30 + $0x1c0] sm:$0xff] }
 0x61e   : > { %4180 = vmatpush1.msra.mxu1 %v4141_v56  ;;  %4413 = vmatpush1.msra.mxu0 %v4379_v4  ;;  %v4367_v54 = vunpack.c.l.bf16 %v6149_v38  ;;  %v4263_v55 = vunpack.c.l.bf16 %v6143_v41  ;;  %v6141_v56 = vld [vmem:[%s8399_s30 + $0x88] sm:$0xff]  ;;  %v4262_v51 = vunpack.c.h.bf16 %v6142_v50  ;;  %v4626_v59 = vunpack.c.h.bf16 %v6186_v39 }
 0x61f   : > { %4181 = vmatprep.subr.mxu1 %v4140_v58  ;;  %4414 = vmatprep.subr.mxu0 %v4378_v9  ;;  %v4353_v58 = vsel %vm4117_vm5, %v4349_v46, %v4351_v47  ;;  %v4261_v49 = vunpack.c.l.bf16 %v6142_v50  ;;  %v4625_v61 = vunpack.c.l.bf16 %v6186_v39  ;;  %v4624_v45 = vunpack.c.h.bf16 %v6185_v57  ;;  %v6182_v9 = vld [vmem:[%s8399_s30 + $0x1b8] sm:$0xff] }
 0x620   : > { %4182 = vmatpush1.msra.mxu1 %v4139_v60  ;;  %4415 = vmatpush1.msra.mxu0 %v4377_v43  ;;  %v6140_v60 = vld [vmem:[%s8399_s30 + $0x80] sm:$0xff]  ;;  %v4259_v62 = vunpack.c.l.bf16 %v6141_v56  ;;  %v4623_v0 = vunpack.c.l.bf16 %v6185_v57  ;;  %v4622_v4 = vunpack.c.h.bf16 %v6184_v37  ;;  %v4621_v8 = vunpack.c.l.bf16 %v6184_v37  ;;  %v6176_v57 = vld [vmem:[%s8399_s30 + $0x188] sm:$0xff]  ;;  %v6168_v37 = vld [vmem:[%s8399_s30 + $0x150] sm:$0xff] }
 0x621   : > { %4183 = vmatprep.subr.mxu1 %v4138_v34  ;;  %4416 = vmatprep.subr.mxu0 %v4376_v17  ;;  %v4260_v34 = vunpack.c.h.bf16 %v6141_v56  ;;  %v4257_v5 = vunpack.c.l.bf16 %v6140_v60  ;;  %v4620_v43 = vunpack.c.h.bf16 %v6183_v1  ;;  %v4619_v16 = vunpack.c.l.bf16 %v6183_v1 }
 0x622   : > { %4184 = vmatpush1.msra.mxu1 %v4137_v63  ;;  %4417 = vmatpush1.msra.mxu0 %v4375_v32  ;;  %v6139_v63 = vld [vmem:[%s8399_s30 + $0x78] sm:$0xff]  ;;  %v4617_v21 = vunpack.c.l.bf16 %v6182_v9  ;;  %v4508_v38 = vunpack.c.h.bf16 %v6173_v25  ;;  %v4605_v1 = vunpack.c.l.bf16 %v6176_v57 }
 0x623   : > { %4185 = vmatprep.subr.mxu1 %v4136_v2  ;;  %4418 = vmatprep.subr.mxu0 %v4374_v22  ;;  %v4258_v2 = vunpack.c.h.bf16 %v6140_v60  ;;  %v4255_v11 = vunpack.c.l.bf16 %v6139_v63  ;;  %v6180_v22 = vld [vmem:[%s8399_s30 + $0x1a8] sm:$0xff] }
 0x624   : > { %4186 = vmatpush1.msra.mxu1 %v4135_v6  ;;  %4419 = vmatpush1.msra.mxu0 %v4373_v26  ;;  %v6138_v6 = vld [vmem:[%s8399_s30 + $0x70] sm:$0xff]  ;;  %v4615_v26 = vunpack.c.l.bf16 %v6181_v15 }
 0x625   : > { %4187 = vmatprep.subr.mxu1 %v4134_v28  ;;  %4420 = vmatprep.subr.mxu0 %v4372_v30  ;;  %v4256_v28 = vunpack.c.h.bf16 %v6139_v63  ;;  %v4254_v17 = vunpack.c.h.bf16 %v6138_v6  ;;  %v4253_v32 = vunpack.c.l.bf16 %v6138_v6  ;;  %v6179_v30 = vld [vmem:[%s8399_s30 + $0x1a0] sm:$0xff]  ;;  %v4587_v6 = vrot.slane %v8731_v3, 3 }
 0x626   : > { %4188 = vmatpush1.msra.mxu1 %v4133_v13  ;;  %4421 = vmatpush1.msra.mxu0 %v4371_v35  ;;  %v6137_v13 = vld [vmem:[%s8399_s30 + $0x68] sm:$0xff]  ;;  %v6172_v35 = vld [vmem:[%s8399_s30 + $0x170] sm:$0xff]  ;;  %v4612_v46 = vunpack.c.h.bf16 %v6179_v30  ;;  %v4611_v50 = vunpack.c.l.bf16 %v6179_v30 }
 0x627   : > { %4189 = vmatprep.subr.mxu1 %v4132_v18  ;;  %4422 = vmatprep.subr.mxu0 %v4370_v36  ;;  %v4618_v18 = vunpack.c.h.bf16 %v6182_v9  ;;  %v4252_v7 = vunpack.c.h.bf16 %v6137_v13  ;;  %v4705_v36 = vrot.slane %v8731_v3, 4  ;;  %v4505_v39 = vunpack.c.l.bf16 %v6172_v35  ;;  %v6166_v9 = vld [vmem:[%s8399_s30 + $0x140] sm:$0xff] }
 0x628   : > { %4190 = vmatpush1.msra.mxu1 %v4131_v20  ;;  %4423 = vmatpush1.msra.mxu0 %v4369_v44  ;;  %v6136_v20 = vld [vmem:[%s8399_s30 + $0x60] sm:$0xff]  ;;  %v6171_v44 = vld [vmem:[%s8399_s30 + $0x168] sm:$0xff] }
 0x629   : > { %6135 = vmatmul.mubr.msk.f32.vlgmr.msra.gmra.mxu1 %vm4155_vm6, %v4118_v23  ;;  %4284 = vmatprep.subr.mxu1 %v4272_v14  ;;  %v4616_v14 = vunpack.c.h.bf16 %v6181_v15  ;;  %v4251_v23 = vunpack.c.l.bf16 %v6137_v13  ;;  %v4250_v27 = vunpack.c.h.bf16 %v6136_v20  ;;  %v4249_v33 = vunpack.c.l.bf16 %v6136_v20 }
 0x62a   : > { %4285 = vmatpush1.msra.mxu1 %v4271_v24  ;;  %4340 = vmatprep.mubr.f32.mxu1 %v8078_v10  ;;  %v4233_v24 = vrot.slane %v8738_v19, 1  ;;  %v4939_v13 = vrot.slane %v8738_v19, 7 }
 0x62b   : > { %4286 = vmatprep.subr.mxu1 %v4270_v29  ;;  %4424 = vmatprep.subr.mxu0 %v4368_v52  ;;  %v4614_v29 = vunpack.c.h.bf16 %v6180_v22  ;;  %v6177_v52 = vld [vmem:[%s8399_s30 + $0x190] sm:$0xff] }
 0x62c   : > { %4287 = vmatpush1.msra.mxu1 %v4269_v31  ;;  %4425 = vmatpush1.msra.mxu0 %v4367_v54  ;;  %v4703_v31 = vrot.slane %v8738_v19, 5  ;;  %v4235_v41 = vsel %vm4117_vm5, %v4233_v24, %v8731_v3  ;;  %v4607_v60 = vunpack.c.l.bf16 %v6177_v52  ;;  %v6210_v24 = vld [vmem:[%s8399_s30 + $0x288] sm:$0xff] }
 0x62d   : > { %4288 = vmatprep.subr.mxu1 %v4268_v12  ;;  %6161 = vmatmul.mubr.msk.f32.vlgmr.msra.gmra.mxu0 %vm4155_vm6, %v4353_v58  ;;  %v4613_v12 = vunpack.c.l.bf16 %v6180_v22  ;;  %v6169_v58 = vld [vmem:[%s8399_s30 + $0x158] sm:$0xff] }
 0x62e   : > { %4289 = vmatpush1.msra.mxu1 %v4267_v40  ;;  %4638 = vmatprep.subr.mxu0 %v4626_v59  ;;  %v6178_v40 = vld [vmem:[%s8399_s30 + $0x198] sm:$0xff]  ;;  %v8780_v47 = vsel %vm4117_vm5, %v4703_v31, %v4705_v36  ;;  %v4608_v59 = vunpack.c.h.bf16 %v6177_v52  ;;  %v4499_v63 = vunpack.c.l.bf16 %v6169_v58  ;;  %v6209_v31 = vld [vmem:[%s8399_s30 + $0x280] sm:$0xff] }
 0x62f   : > { %4290 = vmatprep.subr.mxu1 %v4266_v42  ;;  %4639 = vmatpush1.msra.mxu0 %v4625_v61  ;;  %v4507_v42 = vunpack.c.l.bf16 %v6173_v25  ;;  %v4610_v54 = vunpack.c.h.bf16 %v6178_v40  ;;  %v4609_v56 = vunpack.c.l.bf16 %v6178_v40  ;;  %v6162_v36 = vld [vmem:[%s8399_s30 + $0x120] sm:$0xff]  ;;  %v6208_v40 = vld [vmem:[%s8399_s30 + $0x278] sm:$0xff]  ;;  %v4855_v52 = vunpack.c.l.bf16 %v6209_v31 }
 0x630   : > { %4291 = vmatpush1.msra.mxu1 %v4265_v48  ;;  %4640 = vmatprep.subr.mxu0 %v4624_v45  ;;  %v4506_v48 = vunpack.c.h.bf16 %v6172_v35  ;;  %v6175_v45 = vld [vmem:[%s8399_s30 + $0x180] sm:$0xff]  ;;  %v4858_v35 = vunpack.c.h.bf16 %v6210_v24 }
 0x631   : > { %4292 = vmatprep.subr.mxu1 %v4264_v53  ;;  %4641 = vmatpush1.msra.mxu0 %v4623_v0  ;;  %v6170_v53 = vld [vmem:[%s8399_s30 + $0x160] sm:$0xff]  ;;  %v6167_v0 = vld [vmem:[%s8399_s30 + $0x148] sm:$0xff] }
 0x632   : > { %4293 = vmatpush1.msra.mxu1 %v4263_v55  ;;  %4642 = vmatprep.subr.mxu0 %v4622_v4  ;;  %v4504_v55 = vunpack.c.h.bf16 %v6171_v44  ;;  %v4501_v61 = vunpack.c.l.bf16 %v6170_v53  ;;  %v4604_v4 = vunpack.c.h.bf16 %v6175_v45  ;;  %v4495_v15 = vunpack.c.l.bf16 %v6167_v0 }
 0x633   : > { %4294 = vmatprep.subr.mxu1 %v4262_v51  ;;  %4643 = vmatpush1.msra.mxu0 %v4621_v8  ;;  %v4503_v51 = vunpack.c.l.bf16 %v6171_v44  ;;  %v4497_v8 = vunpack.c.l.bf16 %v6168_v37 }
 0x634   : > { %4295 = vmatpush1.msra.mxu1 %v4261_v49  ;;  %4644 = vmatprep.subr.mxu0 %v4620_v43  ;;  %v4502_v49 = vunpack.c.h.bf16 %v6170_v53  ;;  %v6212_v43 = vld [vmem:[%s8399_s30 + $0x298] sm:$0xff]  ;;  %v4854_v53 = vunpack.c.h.bf16 %v6208_v40 }
 0x635   : > { %4296 = vmatprep.subr.mxu1 %v4260_v34  ;;  %4645 = vmatpush1.msra.mxu0 %v4619_v16  ;;  %v4606_v34 = vunpack.c.h.bf16 %v6176_v57  ;;  %v4941_v16 = vrot.slane %v8731_v3, 6  ;;  %v4853_v57 = vunpack.c.l.bf16 %v6208_v40  ;;  %v6190_v40 = vld [vmem:[%s8399_s30 + $0x1f0] sm:$0xff] }
 0x636   : > { %4297 = vmatpush1.msra.mxu1 %v4259_v62  ;;  %4646 = vmatprep.subr.mxu0 %v4618_v18  ;;  %v4500_v62 = vunpack.c.h.bf16 %v6169_v58  ;;  %v6211_v18 = vld [vmem:[%s8399_s30 + $0x290] sm:$0xff]  ;;  %v6206_v58 = vld [vmem:[%s8399_s30 + $0x268] sm:$0xff] }
 0x637   : > { %4298 = vmatprep.subr.mxu1 %v4258_v2  ;;  %4647 = vmatpush1.msra.mxu0 %v4617_v21  ;;  %v4498_v2 = vunpack.c.h.bf16 %v6168_v37  ;;  %v4862_v21 = vunpack.c.h.bf16 %v6212_v43  ;;  %v8801_v22 = vsel %vm4117_vm5, %v4939_v13, %v4941_v16  ;;  %v4859_v30 = vunpack.c.l.bf16 %v6211_v18  ;;  %v6194_v13 = vld [vmem:[%s8399_s30 + $0x210] sm:$0xff] }
 0x638   : > { %4299 = vmatpush1.msra.mxu1 %v4257_v5  ;;  %4648 = vmatprep.subr.mxu0 %v4616_v14  ;;  %v4585_v5 = vrot.slane %v8738_v19, 4  ;;  %v6164_v14 = vld [vmem:[%s8399_s30 + $0x130] sm:$0xff] }
 0x639   : > { %4300 = vmatprep.subr.mxu1 %v4256_v28  ;;  %4649 = vmatpush1.msra.mxu0 %v4615_v26  ;;  %v4603_v28 = vunpack.c.l.bf16 %v6175_v45  ;;  %v4860_v26 = vunpack.c.h.bf16 %v6211_v18  ;;  %v6205_v45 = vld [vmem:[%s8399_s30 + $0x260] sm:$0xff]  ;;  %v6202_v18 = vld [vmem:[%s8399_s30 + $0x248] sm:$0xff] }
 0x63a   : > { %4301 = vmatpush1.msra.mxu1 %v4255_v11  ;;  %4650 = vmatprep.subr.mxu0 %v4614_v29  ;;  %v4496_v11 = vunpack.c.h.bf16 %v6167_v0  ;;  %v4589_v20 = vsel %vm4117_vm5, %v4585_v5, %v4587_v6  ;;  %v6163_v29 = vld [vmem:[%s8399_s30 + $0x128] sm:$0xff]  ;;  %v4850_v0 = vunpack.c.h.bf16 %v6206_v58  ;;  %v6195_v6 = vld [vmem:[%s8399_s30 + $0x218] sm:$0xff] }
 0x63b   : > { %4302 = vmatprep.subr.mxu1 %v4254_v17  ;;  %4651 = vmatpush1.msra.mxu0 %v4613_v12  ;;  %v6165_v17 = vld [vmem:[%s8399_s30 + $0x138] sm:$0xff]  ;;  %v4489_v12 = vunpack.c.l.bf16 %v6164_v14  ;;  %v4487_v44 = vunpack.c.l.bf16 %v6163_v29 }
 0x63c   : > { %4303 = vmatpush1.msra.mxu1 %v4253_v32  ;;  %4652 = vmatprep.subr.mxu0 %v4612_v46  ;;  %v4494_v32 = vunpack.c.h.bf16 %v6166_v9  ;;  %v4492_v25 = vunpack.c.h.bf16 %v6165_v17  ;;  %v4467_v46 = vrot.slane %v8738_v19, 3 }
 0x63d   : > { %4304 = vmatprep.subr.mxu1 %v4252_v7  ;;  %4653 = vmatpush1.msra.mxu0 %v4611_v50  ;;  %v4493_v7 = vunpack.c.l.bf16 %v6166_v9  ;;  %v6199_v50 = vld [vmem:[%s8399_s30 + $0x238] sm:$0xff] }
 0x63e   : > { %4305 = vmatpush1.msra.mxu1 %v4251_v23  ;;  %4654 = vmatprep.subr.mxu0 %v4610_v54  ;;  %v4861_v23 = vunpack.c.l.bf16 %v6212_v43  ;;  %v6207_v54 = vld [vmem:[%s8399_s30 + $0x270] sm:$0xff] }
 0x63f   : > { %4306 = vmatprep.subr.mxu1 %v4250_v27  ;;  %4655 = vmatpush1.msra.mxu0 %v4609_v56  ;;  %v4491_v27 = vunpack.c.l.bf16 %v6165_v17  ;;  %v6198_v56 = vld [vmem:[%s8399_s30 + $0x230] sm:$0xff] }
 0x640   : > { %4307 = vmatpush1.msra.mxu1 %v4249_v33  ;;  %4656 = vmatprep.subr.mxu0 %v4608_v59  ;;  %v4490_v33 = vunpack.c.h.bf16 %v6164_v14  ;;  %v4742_v37 = vunpack.c.h.bf16 %v6198_v56  ;;  %v6203_v43 = vld [vmem:[%s8399_s30 + $0x250] sm:$0xff] }
 0x641   : > { %6148 = vmatmul.mubr.msk.f32.vlgmr.msra.gmra.mxu1 %vm4155_vm6, %v4235_v41  ;;  %4520 = vmatprep.subr.mxu1 %v4508_v38  ;;  %v4857_v38 = vunpack.c.l.bf16 %v6210_v24  ;;  %v4488_v41 = vunpack.c.h.bf16 %v6163_v29  ;;  %v4843_v14 = vunpack.c.l.bf16 %v6203_v43  ;;  %v6192_v24 = vld [vmem:[%s8399_s30 + $0x200] sm:$0xff] }
 0x642   : > { %4521 = vmatpush1.msra.mxu1 %v4507_v42  ;;  %4657 = vmatpush1.msra.mxu0 %v4607_v60  ;;  %v4856_v42 = vunpack.c.h.bf16 %v6209_v31  ;;  %v6197_v60 = vld [vmem:[%s8399_s30 + $0x228] sm:$0xff]  ;;  %v4841_v31 = vunpack.c.l.bf16 %v6202_v18 }
 0x643   : > { %4522 = vmatprep.subr.mxu1 %v4506_v48  ;;  %4658 = vmatprep.subr.mxu0 %v4606_v34  ;;  %v4469_v48 = vrot.slane %v8731_v3, 2  ;;  %v4851_v34 = vunpack.c.l.bf16 %v6207_v54  ;;  %v4739_v5 = vunpack.c.l.bf16 %v6197_v60 }
 0x644   : > { %4523 = vmatpush1.msra.mxu1 %v4505_v39  ;;  %4576 = vmatprep.mubr.f32.mxu1 %v8078_v10  ;;  %v4486_v39 = vunpack.c.h.bf16 %v6162_v36 }
 0x645   : > { %4524 = vmatprep.subr.mxu1 %v4504_v55  ;;  %4659 = vmatpush1.msra.mxu0 %v4605_v1  ;;  %v4485_v55 = vunpack.c.l.bf16 %v6162_v36  ;;  %v4471_v59 = vsel %vm4117_vm5, %v4467_v46, %v4469_v48  ;;  %v4740_v1 = vunpack.c.h.bf16 %v6197_v60  ;;  %v4823_v36 = vrot.slane %v8731_v3, 5  ;;  %v6189_v48 = vld [vmem:[%s8399_s30 + $0x1e8] sm:$0xff] }
 0x646   : > { %4525 = vmatpush1.msra.mxu1 %v4503_v51  ;;  %4660 = vmatprep.subr.mxu0 %v4604_v4  ;;  %v4744_v51 = vunpack.c.h.bf16 %v6199_v50  ;;  %v6204_v4 = vld [vmem:[%s8399_s30 + $0x258] sm:$0xff] }
 0x647   : > { %4526 = vmatprep.subr.mxu1 %v4502_v49  ;;  %4661 = vmatpush1.msra.mxu0 %v4603_v28  ;;  %v4743_v49 = vunpack.c.l.bf16 %v6199_v50  ;;  %v4847_v28 = vunpack.c.l.bf16 %v6205_v45  ;;  %v4846_v16 = vunpack.c.h.bf16 %v6204_v4  ;;  %v4845_v17 = vunpack.c.l.bf16 %v6204_v4  ;;  %v6237_v50 = vld [vmem:[%s8399_s30 + $0x350] sm:$0xff] }
 0x648   : > { %4527 = vmatpush1.msra.mxu1 %v4501_v61  ;;  %4694 = vmatprep.mubr.f32.mxu0 %v8078_v10  ;;  %v4852_v61 = vunpack.c.h.bf16 %v6207_v54 }
 0x649   : > { %4528 = vmatprep.subr.mxu1 %v4500_v62  ;;  %6187 = vmatmul.mubr.msk.f32.vlgmr.msra.gmra.mxu0 %vm4155_vm6, %v4589_v20  ;;  %v4741_v62 = vunpack.c.l.bf16 %v6198_v56  ;;  %v6193_v20 = vld [vmem:[%s8399_s30 + $0x208] sm:$0xff]  ;;  %v4724_v56 = vunpack.c.h.bf16 %v6189_v48 }
 0x64a   : > { %4529 = vmatpush1.msra.mxu1 %v4499_v63  ;;  %4874 = vmatprep.subr.mxu0 %v4862_v21  ;;  %v6196_v63 = vld [vmem:[%s8399_s30 + $0x220] sm:$0xff]  ;;  %v4844_v21 = vunpack.c.h.bf16 %v6203_v43  ;;  %v4731_v29 = vunpack.c.l.bf16 %v6193_v20 }
 0x64b   : > { %4530 = vmatprep.subr.mxu1 %v4498_v2  ;;  %4875 = vmatpush1.msra.mxu0 %v4861_v23  ;;  %v4849_v2 = vunpack.c.l.bf16 %v6206_v58  ;;  %v4738_v9 = vunpack.c.h.bf16 %v6196_v63  ;;  %v4733_v23 = vunpack.c.l.bf16 %v6194_v13  ;;  %v6225_v58 = vld [vmem:[%s8399_s30 + $0x2f8] sm:$0xff] }
 0x64c   : > { %4531 = vmatpush1.msra.mxu1 %v4497_v8  ;;  %4876 = vmatprep.subr.mxu0 %v4860_v26  ;;  %v4848_v8 = vunpack.c.h.bf16 %v6205_v45  ;;  %v6201_v26 = vld [vmem:[%s8399_s30 + $0x240] sm:$0xff] }
 0x64d   : > { %4532 = vmatprep.subr.mxu1 %v4496_v11  ;;  %4877 = vmatpush1.msra.mxu0 %v4859_v30  ;;  %v4737_v11 = vunpack.c.l.bf16 %v6196_v63  ;;  %v6191_v30 = vld [vmem:[%s8399_s30 + $0x1f8] sm:$0xff] }
 0x64e   : > { %4533 = vmatpush1.msra.mxu1 %v4495_v15  ;;  %4878 = vmatprep.subr.mxu0 %v4858_v35  ;;  %v4736_v15 = vunpack.c.h.bf16 %v6195_v6  ;;  %v4840_v35 = vunpack.c.h.bf16 %v6201_v26  ;;  %v4727_v46 = vunpack.c.l.bf16 %v6191_v30  ;;  %v6234_v63 = vld [vmem:[%s8399_s30 + $0x338] sm:$0xff] }
 0x64f   : > { %4534 = vmatprep.subr.mxu1 %v4494_v32  ;;  %4879 = vmatpush1.msra.mxu0 %v4857_v38  ;;  %v4735_v32 = vunpack.c.l.bf16 %v6195_v6  ;;  %v4729_v38 = vunpack.c.l.bf16 %v6192_v24  ;;  %v6233_v6 = vld [vmem:[%s8399_s30 + $0x330] sm:$0xff] }
 0x650   : > { %4535 = vmatpush1.msra.mxu1 %v4493_v7  ;;  %4880 = vmatprep.subr.mxu0 %v4856_v42  ;;  %v4734_v7 = vunpack.c.h.bf16 %v6194_v13  ;;  %v6238_v42 = vld [vmem:[%s8399_s30 + $0x358] sm:$0xff]  ;;  %v6232_v13 = vld [vmem:[%s8399_s30 + $0x328] sm:$0xff] }
 0x651   : > { %4536 = vmatprep.subr.mxu1 %v4492_v25  ;;  %4881 = vmatpush1.msra.mxu0 %v4855_v52  ;;  %v4842_v25 = vunpack.c.h.bf16 %v6202_v18  ;;  %v5097_v52 = vunpack.c.h.bf16 %v6238_v42  ;;  %v5096_v54 = vunpack.c.l.bf16 %v6238_v42  ;;  %v6217_v42 = vld [vmem:[%s8399_s30 + $0x2b8] sm:$0xff] }
 0x652   : > { %4537 = vmatpush1.msra.mxu1 %v4491_v27  ;;  %4882 = vmatprep.subr.mxu0 %v4854_v53  ;;  %v4732_v27 = vunpack.c.h.bf16 %v6193_v20  ;;  %v6188_v53 = vld [vmem:[%s8399_s30 + $0x1e0] sm:$0xff] }
 0x653   : > { %4538 = vmatprep.subr.mxu1 %v4490_v33  ;;  %4883 = vmatpush1.msra.mxu0 %v4853_v57  ;;  %v4730_v33 = vunpack.c.h.bf16 %v6192_v24  ;;  %v5095_v57 = vunpack.c.h.bf16 %v6237_v50  ;;  %v6231_v20 = vld [vmem:[%s8399_s30 + $0x320] sm:$0xff]  ;;  %v6230_v24 = vld [vmem:[%s8399_s30 + $0x318] sm:$0xff] }
 0x654   : > { %4539 = vmatpush1.msra.mxu1 %v4489_v12  ;;  %4884 = vmatprep.subr.mxu0 %v4852_v61  ;;  %v4821_v12 = vrot.slane %v8738_v19, 6  ;;  %v4726_v19 = vunpack.c.h.bf16 %v6190_v40  ;;  %v6235_v61 = vld [vmem:[%s8399_s30 + $0x340] sm:$0xff] }
 0x655   : > { %4540 = vmatprep.subr.mxu1 %v4488_v41  ;;  %4885 = vmatpush1.msra.mxu0 %v4851_v34  ;;  %v4839_v41 = vunpack.c.l.bf16 %v6201_v26  ;;  %v6224_v34 = vld [vmem:[%s8399_s30 + $0x2f0] sm:$0xff]  ;;  %v6219_v26 = vld [vmem:[%s8399_s30 + $0x2c8] sm:$0xff] }
 0x656   : > { %4541 = vmatpush1.msra.mxu1 %v4487_v44  ;;  %4886 = vmatprep.subr.mxu0 %v4850_v0  ;;  %v4728_v44 = vunpack.c.h.bf16 %v6191_v30  ;;  %v4825_v3 = vsel %vm4117_vm5, %v4821_v12, %v4823_v36  ;;  %v4979_v0 = vunpack.c.l.bf16 %v6225_v58  ;;  %v4978_v4 = vunpack.c.h.bf16 %v6224_v34 }
 0x657   : > { %4542 = vmatprep.subr.mxu1 %v4486_v39  ;;  %4887 = vmatpush1.msra.mxu0 %v4849_v2  ;;  %v4725_v39 = vunpack.c.l.bf16 %v6190_v40  ;;  %v5091_v2 = vunpack.c.h.bf16 %v6235_v61  ;;  %v5082_v30 = vunpack.c.l.bf16 %v6231_v20  ;;  %v5081_v12 = vunpack.c.h.bf16 %v6230_v24  ;;  %v6228_v40 = vld [vmem:[%s8399_s30 + $0x308] sm:$0xff] }
 0x658   : > { %4543 = vmatpush1.msra.mxu1 %v4485_v55  ;;  %4888 = vmatprep.subr.mxu0 %v4848_v8  ;;  %v6236_v55 = vld [vmem:[%s8399_s30 + $0x348] sm:$0xff]  ;;  %v4977_v8 = vunpack.c.l.bf16 %v6224_v34  ;;  %v4968_v36 = vunpack.c.h.bf16 %v6219_v26 }
 0x659   : > { %6174 = vmatmul.mubr.msk.f32.vlgmr.msra.gmra.mxu1 %vm4155_vm6, %v4471_v59  ;;  %4756 = vmatprep.subr.mxu1 %v4744_v51  ;;  %v4723_v51 = vunpack.c.l.bf16 %v6189_v48  ;;  %v5094_v59 = vunpack.c.l.bf16 %v6237_v50  ;;  %v5093_v60 = vunpack.c.h.bf16 %v6236_v55  ;;  %v5092_v45 = vunpack.c.l.bf16 %v6236_v55  ;;  %v6215_v55 = vld [vmem:[%s8399_s30 + $0x2a8] sm:$0xff] }
 0x65a   : > { %4757 = vmatpush1.msra.mxu1 %v4743_v49  ;;  %4889 = vmatpush1.msra.mxu0 %v4847_v28  ;;  %v4722_v49 = vunpack.c.h.bf16 %v6188_v53  ;;  %v5089_v28 = vunpack.c.h.bf16 %v6234_v63  ;;  %v4960_v34 = vunpack.c.h.bf16 %v6215_v55 }
 0x65b   : > { %4758 = vmatprep.subr.mxu1 %v4742_v37  ;;  %4890 = vmatprep.subr.mxu0 %v4846_v16  ;;  %v4721_v37 = vunpack.c.l.bf16 %v6188_v53  ;;  %v4964_v53 = vunpack.c.h.bf16 %v6217_v42 }
 0x65c   : > { %4759 = vmatpush1.msra.mxu1 %v4741_v62  ;;  %4891 = vmatpush1.msra.mxu0 %v4845_v17  ;;  %v4980_v62 = vunpack.c.h.bf16 %v6225_v58  ;;  %v5087_v17 = vunpack.c.h.bf16 %v6233_v6 }
 0x65d   : > { %4760 = vmatprep.subr.mxu1 %v4740_v1  ;;  %4892 = vmatprep.subr.mxu0 %v4844_v21  ;;  %v6223_v1 = vld [vmem:[%s8399_s30 + $0x2e8] sm:$0xff] }
 0x65e   : > { %4761 = vmatpush1.msra.mxu1 %v4739_v5  ;;  %4893 = vmatpush1.msra.mxu0 %v4843_v14  ;;  %v5090_v5 = vunpack.c.l.bf16 %v6235_v61  ;;  %v4976_v43 = vunpack.c.h.bf16 %v6223_v1  ;;  %v4975_v16 = vunpack.c.l.bf16 %v6223_v1  ;;  %v8869_v61 = vld [vmem:[#allocation3 + $0x8] sm:$0xf] }
 0x65f   : > { %4762 = vmatprep.subr.mxu1 %v4738_v9  ;;  %4894 = vmatprep.subr.mxu0 %v4842_v25  ;;  %v6222_v9 = vld [vmem:[%s8399_s30 + $0x2e0] sm:$0xff] }
 0x660   : > { %4763 = vmatpush1.msra.mxu1 %v4737_v11  ;;  %4812 = vmatprep.mubr.f32.mxu1 %v8078_v10  ;;  %v5088_v11 = vunpack.c.l.bf16 %v6234_v63  ;;  %v4974_v18 = vunpack.c.h.bf16 %v6222_v9  ;;  %v4973_v21 = vunpack.c.l.bf16 %v6222_v9  ;;  %v6262_v9 = vld [vmem:[%s8399_s30 + $0x408] sm:$0xff] }
 0x661   : > { %4764 = vmatprep.subr.mxu1 %v4736_v15  ;;  %4895 = vmatpush1.msra.mxu0 %v4841_v31  ;;  %v6221_v15 = vld [vmem:[%s8399_s30 + $0x2d8] sm:$0xff]  ;;  %v6229_v31 = vld [vmem:[%s8399_s30 + $0x310] sm:$0xff] }
 0x662   : > { %4765 = vmatpush1.msra.mxu1 %v4735_v32  ;;  %4896 = vmatprep.subr.mxu0 %v4840_v35  ;;  %v5086_v32 = vunpack.c.l.bf16 %v6233_v6  ;;  %v4972_v14 = vunpack.c.h.bf16 %v6221_v15  ;;  %v4971_v25 = vunpack.c.l.bf16 %v6221_v15  ;;  %v6218_v35 = vld [vmem:[%s8399_s30 + $0x2c0] sm:$0xff]  ;;  %v5078_v48 = vunpack.c.l.bf16 %v6229_v31 }
 0x663   : > { %4766 = vmatprep.subr.mxu1 %v4734_v7  ;;  %4897 = vmatpush1.msra.mxu0 %v4839_v41  ;;  %v5085_v7 = vunpack.c.h.bf16 %v6232_v13  ;;  %v4967_v41 = vunpack.c.l.bf16 %v6219_v26  ;;  %v4965_v50 = vunpack.c.l.bf16 %v6218_v35  ;;  %v6261_v15 = vld [vmem:[%s8399_s30 + $0x400] sm:$0xff]  ;;  %v6259_v26 = vld [vmem:[%s8399_s30 + $0x3f0] sm:$0xff] }
 0x664   : > { %4767 = vmatpush1.msra.mxu1 %v4733_v23  ;;  %4930 = vmatprep.mubr.f32.mxu0 %v8078_v10  ;;  %v5084_v23 = vunpack.c.l.bf16 %v6232_v13 }
 0x665   : > { %4768 = vmatprep.subr.mxu1 %v4732_v27  ;;  %6213 = vmatmul.mubr.msk.f32.vlgmr.msra.gmra.mxu0 %vm4155_vm6, %v4825_v3  ;;  %v5083_v27 = vunpack.c.h.bf16 %v6231_v20  ;;  %v5077_v3 = vunpack.c.h.bf16 %v6228_v40 }
 0x666   : > { %4769 = vmatpush1.msra.mxu1 %v4731_v29  ;;  %5109 = vmatprep.subr.mxu0 %v5097_v52  ;;  %v6227_v52 = vld [vmem:[%s8399_s30 + $0x300] sm:$0xff] }
 0x667   : > { %4770 = vmatprep.subr.mxu1 %v4730_v33  ;;  %5110 = vmatpush1.msra.mxu0 %v5096_v54  ;;  %v4963_v54 = vunpack.c.l.bf16 %v6217_v42 }
 0x668   : > { %4771 = vmatpush1.msra.mxu1 %v4729_v38  ;;  %5111 = vmatprep.subr.mxu0 %v5095_v57  ;;  %v5080_v38 = vunpack.c.l.bf16 %v6230_v24 }
 0x669   : > { %4772 = vmatprep.subr.mxu1 %v4728_v44  ;;  %5112 = vmatpush1.msra.mxu0 %v5094_v59  ;;  %v5079_v44 = vunpack.c.h.bf16 %v6229_v31 }
 0x66a   : > { %4773 = vmatpush1.msra.mxu1 %v4727_v46  ;;  %5113 = vmatprep.subr.mxu0 %v5093_v60  ;;  %v4966_v46 = vunpack.c.h.bf16 %v6218_v35  ;;  %v5074_v60 = vunpack.c.l.bf16 %v6227_v52 }
 0x66b   : > { %4774 = vmatprep.subr.mxu1 %v4726_v19  ;;  %5114 = vmatpush1.msra.mxu0 %v5092_v45  ;;  %v6216_v19 = vld [vmem:[%s8399_s30 + $0x2b0] sm:$0xff]  ;;  %v4959_v45 = vunpack.c.l.bf16 %v6215_v55 }
 0x66c   : > { %4775 = vmatpush1.msra.mxu1 %v4725_v39  ;;  %5115 = vmatprep.subr.mxu0 %v5091_v2  ;;  %v8864_v39 = vld [vmem:[#allocation3 + $0x14] sm:$0xf]  ;;  %v4962_v57 = vunpack.c.h.bf16 %v6216_v19  ;;  %v4961_v59 = vunpack.c.l.bf16 %v6216_v19  ;;  %v6263_v2 = vld [vmem:[%s8399_s30 + $0x410] sm:$0xff] }
 0x66d   : > { %4776 = vmatprep.subr.mxu1 %v4724_v56  ;;  %5116 = vmatpush1.msra.mxu0 %v5090_v5  ;;  %v5076_v56 = vunpack.c.l.bf16 %v6228_v40  ;;  %v5058_v58 = vrot.slane %v8864_v39, 7  ;;  %v6250_v5 = vld [vmem:[%s8399_s30 + $0x3b0] sm:$0xff]  ;;  %v5321_v40 = vunpack.c.l.bf16 %v6259_v26  ;;  %v6256_v19 = vld [vmem:[%s8399_s30 + $0x3d8] sm:$0xff] }
 0x66e   : > { %4777 = vmatpush1.msra.mxu1 %v4723_v51  ;;  %5117 = vmatprep.subr.mxu0 %v5089_v28  ;;  %v5075_v51 = vunpack.c.h.bf16 %v6227_v52  ;;  %v5212_v13 = vunpack.c.h.bf16 %v6250_v5  ;;  %v6243_v52 = vld [vmem:[%s8399_s30 + $0x378] sm:$0xff] }
 0x66f   : > { %4778 = vmatprep.subr.mxu1 %v4722_v49  ;;  %5118 = vmatpush1.msra.mxu0 %v5088_v11  ;;  %v6214_v49 = vld [vmem:[%s8399_s30 + $0x2a0] sm:$0xff]  ;;  %v5330_v11 = vunpack.c.h.bf16 %v6263_v2 }
 0x670   : > { %4779 = vmatpush1.msra.mxu1 %v4721_v37  ;;  %5119 = vmatprep.subr.mxu0 %v5087_v17  ;;  %v6264_v37 = vld [vmem:[%s8399_s30 + $0x418] sm:$0xff]  ;;  %v4958_v63 = vunpack.c.h.bf16 %v6214_v49  ;;  %v5211_v17 = vunpack.c.l.bf16 %v6250_v5 }
 0x671   : > { %6200 = vmatmul.mubr.msk.f32.vlgmr.msra.gmra.mxu1 %vm4155_vm6, %v8780_v47  ;;  %4992 = vmatprep.subr.mxu1 %v4980_v62  ;;  %v6220_v47 = vld [vmem:[%s8399_s30 + $0x2d0] sm:$0xff]  ;;  %v6251_v62 = vld [vmem:[%s8399_s30 + $0x3b8] sm:$0xff]  ;;  %v5332_v1 = vunpack.c.h.bf16 %v6264_v37  ;;  %v5331_v6 = vunpack.c.l.bf16 %v6264_v37  ;;  %v5197_v37 = vunpack.c.l.bf16 %v6243_v52 }
 0x672   : > { %4993 = vmatpush1.msra.mxu1 %v4979_v0  ;;  %v4970_v29 = vunpack.c.h.bf16 %v6220_v47  ;;  %5120 = vmatpush1.msra.mxu0 %v5086_v32  ;;  %v4969_v33 = vunpack.c.l.bf16 %v6220_v47  ;;  %v5060_v0 = vsel %vm4117_vm5, %v8869_v61, %v5058_v58  ;;  %v5213_v28 = vunpack.c.l.bf16 %v6251_v62  ;;  %v6260_v47 = vld [vmem:[%s8399_s30 + $0x3f8] sm:$0xff] }
 0x673   : > { %4994 = vmatprep.subr.mxu1 %v4978_v4  ;;  %5121 = vmatprep.subr.mxu0 %v5085_v7  ;;  %v4957_v4 = vunpack.c.l.bf16 %v6214_v49  ;;  %v5328_v32 = vunpack.c.h.bf16 %v6262_v9  ;;  %v5323_v31 = vunpack.c.l.bf16 %v6260_v47  ;;  %v5316_v58 = vunpack.c.h.bf16 %v6256_v19 }
 0x674   : > { %4995 = vmatpush1.msra.mxu1 %v4977_v8  ;;  %5122 = vmatpush1.msra.mxu0 %v5084_v23  ;;  %v5214_v8 = vunpack.c.h.bf16 %v6251_v62  ;;  %v5326_v23 = vunpack.c.h.bf16 %v6261_v15  ;;  %v5315_v49 = vunpack.c.l.bf16 %v6256_v19  ;;  %v6267_v19 = vld [vmem:[%s8399_s30 + $0x428] sm:$0xff] }
 0x675   : > { %4996 = vmatprep.subr.mxu1 %v4976_v43  ;;  %5123 = vmatprep.subr.mxu0 %v5083_v27  ;;  %v6249_v43 = vld [vmem:[%s8399_s30 + $0x3a8] sm:$0xff] }
 0x676   : > { %4997 = vmatpush1.msra.mxu1 %v4975_v16  ;;  %5124 = vmatpush1.msra.mxu0 %v5082_v30  ;;  %v5329_v16 = vunpack.c.l.bf16 %v6263_v2  ;;  %v5210_v20 = vunpack.c.h.bf16 %v6249_v43  ;;  %v5209_v7 = vunpack.c.l.bf16 %v6249_v43 }
 0x677   : > { %4998 = vmatprep.subr.mxu1 %v4974_v18  ;;  %5125 = vmatprep.subr.mxu0 %v5081_v12  ;;  %v6248_v18 = vld [vmem:[%s8399_s30 + $0x3a0] sm:$0xff]  ;;  %v6245_v12 = vld [vmem:[%s8399_s30 + $0x388] sm:$0xff] }
 0x678   : > { %4999 = vmatpush1.msra.mxu1 %v4973_v21  ;;  %5126 = vmatpush1.msra.mxu0 %v5080_v38  ;;  %v5327_v21 = vunpack.c.l.bf16 %v6262_v9  ;;  %v5208_v24 = vunpack.c.h.bf16 %v6248_v18  ;;  %v5207_v27 = vunpack.c.l.bf16 %v6248_v18  ;;  %v5175_v9 = vrot.slane %v8869_v61, 1  ;;  %v6276_v18 = vld [vmem:[%s8399_s30 + $0x470] sm:$0xff] }
 0x679   : > { %5000 = vmatprep.subr.mxu1 %v4972_v14  ;;  %5127 = vmatprep.subr.mxu0 %v5079_v44  ;;  %v6247_v14 = vld [vmem:[%s8399_s30 + $0x398] sm:$0xff]  ;;  %v6244_v44 = vld [vmem:[%s8399_s30 + $0x380] sm:$0xff] }
 0x67a   : > { %5001 = vmatpush1.msra.mxu1 %v4971_v25  ;;  %5128 = vmatpush1.msra.mxu0 %v5078_v48  ;;  %v5325_v25 = vunpack.c.l.bf16 %v6261_v15  ;;  %v5206_v30 = vunpack.c.h.bf16 %v6247_v14  ;;  %v5205_v35 = vunpack.c.l.bf16 %v6247_v14  ;;  %v5202_v48 = vunpack.c.h.bf16 %v6245_v12 }
 0x67b   : > { %5002 = vmatprep.subr.mxu1 %v4970_v29  ;;  %5129 = vmatprep.subr.mxu0 %v5077_v3  ;;  %v5324_v29 = vunpack.c.h.bf16 %v6260_v47  ;;  %v5201_v3 = vunpack.c.l.bf16 %v6245_v12  ;;  %v5291_v15 = vrot.slane %v8869_v61, 2  ;;  %v6275_v47 = vld [vmem:[%s8399_s30 + $0x468] sm:$0xff] }
 0x67c   : > { %5003 = vmatpush1.msra.mxu1 %v4969_v33  ;;  %5048 = vmatprep.mubr.f32.mxu1 %v8078_v10  ;;  %v6258_v33 = vld [vmem:[%s8399_s30 + $0x3e8] sm:$0xff] }
 0x67d   : > { %5004 = vmatprep.subr.mxu1 %v4968_v36  ;;  %5130 = vmatpush1.msra.mxu0 %v5076_v56  ;;  %v5322_v36 = vunpack.c.h.bf16 %v6259_v26  ;;  %v6255_v56 = vld [vmem:[%s8399_s30 + $0x3d0] sm:$0xff]  ;;  %v5445_v26 = vunpack.c.l.bf16 %v6275_v47 }
 0x67e   : > { %5005 = vmatpush1.msra.mxu1 %v4967_v41  ;;  %5131 = vmatprep.subr.mxu0 %v5075_v51  ;;  %v6257_v41 = vld [vmem:[%s8399_s30 + $0x3e0] sm:$0xff]  ;;  %v6242_v51 = vld [vmem:[%s8399_s30 + $0x370] sm:$0xff] }
 0x67f   : > { %5006 = vmatprep.subr.mxu1 %v4966_v46  ;;  %5132 = vmatpush1.msra.mxu0 %v5074_v60  ;;  %v5320_v46 = vunpack.c.h.bf16 %v6258_v33  ;;  %v5317_v55 = vunpack.c.l.bf16 %v6257_v41  ;;  %v6254_v60 = vld [vmem:[%s8399_s30 + $0x3c8] sm:$0xff]  ;;  %v5196_v62 = vunpack.c.h.bf16 %v6242_v51 }
 0x680   : > { %5007 = vmatpush1.msra.mxu1 %v4965_v50  ;;  %5165 = vmatprep.mubr.f32.mxu0 %v8078_v10  ;;  %v5319_v50 = vunpack.c.l.bf16 %v6258_v33  ;;  %v5312_v2 = vunpack.c.h.bf16 %v6254_v60 }
 0x681   : > { %5008 = vmatprep.subr.mxu1 %v4964_v53  ;;  %6239 = vmatmul.mubr.msk.f32.vlgmr.msra.gmra.mxu0 %vm4155_vm6, %v5060_v0  ;;  %v5318_v53 = vunpack.c.h.bf16 %v6257_v41  ;;  %v5195_v0 = vunpack.c.l.bf16 %v6242_v51 }
 0x682   : > { %5009 = vmatpush1.msra.mxu1 %v4963_v54  ;;  %5344 = vmatprep.subr.mxu0 %v5332_v1  ;;  %v5200_v54 = vunpack.c.h.bf16 %v6244_v44  ;;  %v6240_v1 = vld [vmem:[%s8399_s30 + $0x360] sm:$0xff] }
 0x683   : > { %5010 = vmatprep.subr.mxu1 %v4962_v57  ;;  %5345 = vmatpush1.msra.mxu0 %v5331_v6  ;;  %v5199_v57 = vunpack.c.l.bf16 %v6244_v44  ;;  %v5192_v43 = vunpack.c.h.bf16 %v6240_v1 }
 0x684   : > { %5011 = vmatpush1.msra.mxu1 %v4961_v59  ;;  %5346 = vmatprep.subr.mxu0 %v5330_v11  ;;  %v5198_v59 = vunpack.c.h.bf16 %v6243_v52 }
 0x685   : > { %5012 = vmatprep.subr.mxu1 %v4960_v34  ;;  %5347 = vmatpush1.msra.mxu0 %v5329_v16  ;;  %v6241_v34 = vld [vmem:[%s8399_s30 + $0x368] sm:$0xff] }
 0x686   : > { %5013 = vmatpush1.msra.mxu1 %v4959_v45  ;;  %5348 = vmatprep.subr.mxu0 %v5328_v32  ;;  %v5314_v45 = vunpack.c.h.bf16 %v6255_v56  ;;  %v5194_v5 = vunpack.c.h.bf16 %v6241_v34  ;;  %v5193_v6 = vunpack.c.l.bf16 %v6241_v34 }
 0x687   : > { %5014 = vmatprep.subr.mxu1 %v4958_v63  ;;  %5349 = vmatpush1.msra.mxu0 %v5327_v21  ;;  %v5313_v63 = vunpack.c.l.bf16 %v6255_v56  ;;  %v5409_v56 = vrot.slane %v8869_v61, 3 }
 0x688   : > { %5015 = vmatpush1.msra.mxu1 %v4957_v4  ;;  %5350 = vmatprep.subr.mxu0 %v5326_v23  ;;  %v6253_v4 = vld [vmem:[%s8399_s30 + $0x3c0] sm:$0xff]  ;;  %v5447_v23 = vunpack.c.l.bf16 %v6276_v18 }
 0x689   : > { %6226 = vmatmul.mubr.msk.f32.vlgmr.msra.gmra.mxu1 %vm4155_vm6, %v8801_v22  ;;  %5226 = vmatprep.subr.mxu1 %v5214_v8  ;;  %v6246_v22 = vld [vmem:[%s8399_s30 + $0x390] sm:$0xff]  ;;  %v5311_v8 = vunpack.c.l.bf16 %v6254_v60  ;;  %v5310_v11 = vunpack.c.h.bf16 %v6253_v4  ;;  %v5309_v16 = vunpack.c.l.bf16 %v6253_v4 }
 0x68a   : > { %5227 = vmatpush1.msra.mxu1 %v5213_v28  ;;  %5351 = vmatpush1.msra.mxu0 %v5325_v25  ;;  %v5204_v38 = vunpack.c.h.bf16 %v6246_v22  ;;  %v5203_v42 = vunpack.c.l.bf16 %v6246_v22  ;;  %v6277_v28 = vld [vmem:[%s8399_s30 + $0x478] sm:$0xff]  ;;  %v5446_v25 = vunpack.c.h.bf16 %v6275_v47  ;;  %v5533_v47 = vld [vmem:[%s8407_s16 + $0x28] sm:$0xff] }
 0x68b   : > { %5228 = vmatprep.subr.mxu1 %v5212_v13  ;;  %5352 = vmatprep.subr.mxu0 %v5324_v29  ;;  %v5191_v13 = vunpack.c.l.bf16 %v6240_v1  ;;  %v5450_v32 = vunpack.c.h.bf16 %v6277_v28  ;;  %v5449_v21 = vunpack.c.l.bf16 %v6277_v28  ;;  %v5542_v60 = vld [vmem:[%s8407_s16 + $0x70] sm:$0xff]  ;;  %v5539_v1 = vld [vmem:[%s8407_s16 + $0x58] sm:$0xff] }
 0x68c   : > { %5229 = vmatpush1.msra.mxu1 %v5211_v17  ;;  %5353 = vmatpush1.msra.mxu0 %v5323_v31  ;;  %v5293_v17 = vrot.slane %v8864_v39, 1  ;;  %v5588_v61 = vunpack.c.l.bf16 %v5542_v60 }
 0x68d   : > { %5230 = vmatprep.subr.mxu1 %v5210_v20  ;;  %5354 = vmatprep.subr.mxu0 %v5322_v36  ;;  %v5177_v20 = vsel %vm4117_vm5, %v5175_v9, %v8864_v39 }
 0x68e   : > { %5231 = vmatpush1.msra.mxu1 %v5209_v7  ;;  %5355 = vmatpush1.msra.mxu0 %v5321_v40  ;;  %v5448_v7 = vunpack.c.h.bf16 %v6276_v18  ;;  %v5295_v14 = vsel %vm4117_vm5, %v5291_v15, %v5293_v17  ;;  %v5535_v18 = vld [vmem:[%s8407_s16 + $0x38] sm:$0xff] }
 0x68f   : > { %5232 = vmatprep.subr.mxu1 %v5208_v24  ;;  %5356 = vmatprep.subr.mxu0 %v5320_v46  ;;  %v6274_v24 = vld [vmem:[%s8399_s30 + $0x460] sm:$0xff]  ;;  %v6268_v46 = vld [vmem:[%s8399_s30 + $0x430] sm:$0xff] }
 0x690   : > { %5233 = vmatpush1.msra.mxu1 %v5207_v27  ;;  %5357 = vmatpush1.msra.mxu0 %v5319_v50  ;;  %v6273_v27 = vld [vmem:[%s8399_s30 + $0x458] sm:$0xff]  ;;  %v5444_v22 = vunpack.c.h.bf16 %v6274_v24  ;;  %v5443_v29 = vunpack.c.l.bf16 %v6274_v24  ;;  %v5431_v52 = vunpack.c.l.bf16 %v6268_v46  ;;  %v5571_v24 = vunpack.c.h.bf16 %v5533_v47 }
 0x691   : > { %5234 = vmatprep.subr.mxu1 %v5206_v30  ;;  %5358 = vmatprep.subr.mxu0 %v5318_v53  ;;  %v6272_v30 = vld [vmem:[%s8399_s30 + $0x450] sm:$0xff]  ;;  %v5442_v31 = vunpack.c.h.bf16 %v6273_v27  ;;  %v5441_v33 = vunpack.c.l.bf16 %v6273_v27  ;;  %v6266_v53 = vld [vmem:[%s8399_s30 + $0x420] sm:$0xff] }
 0x692   : > { %5235 = vmatpush1.msra.mxu1 %v5205_v35  ;;  %5359 = vmatpush1.msra.mxu0 %v5317_v55  ;;  %v6271_v35 = vld [vmem:[%s8399_s30 + $0x448] sm:$0xff]  ;;  %v5440_v12 = vunpack.c.h.bf16 %v6272_v30  ;;  %v5439_v36 = vunpack.c.l.bf16 %v6272_v30  ;;  %v5429_v55 = vunpack.c.l.bf16 %v6267_v19  ;;  %v5428_v51 = vunpack.c.h.bf16 %v6266_v53 }
 0x693   : > { %5236 = vmatprep.subr.mxu1 %v5204_v38  ;;  %5360 = vmatprep.subr.mxu0 %v5316_v58  ;;  %v6270_v38 = vld [vmem:[%s8399_s30 + $0x440] sm:$0xff]  ;;  %v5438_v40 = vunpack.c.h.bf16 %v6271_v35  ;;  %v5437_v41 = vunpack.c.l.bf16 %v6271_v35  ;;  %v5427_v58 = vunpack.c.l.bf16 %v6266_v53 }
 0x694   : > { %5237 = vmatpush1.msra.mxu1 %v5203_v42  ;;  %5361 = vmatpush1.msra.mxu0 %v5315_v49  ;;  %v6269_v42 = vld [vmem:[%s8399_s30 + $0x438] sm:$0xff]  ;;  %v5435_v44 = vunpack.c.l.bf16 %v6270_v38 }
 0x695   : > { %5238 = vmatprep.subr.mxu1 %v5202_v48  ;;  %5362 = vmatprep.subr.mxu0 %v5314_v45  ;;  %v5434_v48 = vunpack.c.h.bf16 %v6269_v42  ;;  %v5433_v50 = vunpack.c.l.bf16 %v6269_v42  ;;  %v5543_v49 = vld [vmem:[%s8407_s16 + $0x78] sm:$0xff] }
 0x696   : > { %5239 = vmatpush1.msra.mxu1 %v5201_v3  ;;  %5363 = vmatpush1.msra.mxu0 %v5313_v63  ;;  %v5432_v3 = vunpack.c.h.bf16 %v6268_v46  ;;  %v5590_v34 = vunpack.c.l.bf16 %v5543_v49  ;;  %v5591_v45 = vunpack.c.h.bf16 %v5543_v49  ;;  %v5553_v49 = vld [vmem:[%s8407_s16 + $0xc8] sm:$0xff] }
 0x697   : > { %5240 = vmatprep.subr.mxu1 %v5200_v54  ;;  %5364 = vmatprep.subr.mxu0 %v5312_v2  ;;  %v5430_v54 = vunpack.c.h.bf16 %v6267_v19 }
 0x698   : > { %5241 = vmatpush1.msra.mxu1 %v5199_v57  ;;  %5282 = vmatprep.mubr.f32.mxu1 %v8078_v10  ;;  %v5411_v57 = vrot.slane %v8864_v39, 2  ;;  %v5540_v39 = vld [vmem:[%s8407_s16 + $0x60] sm:$0xff] }
 0x699   : > { %5242 = vmatprep.subr.mxu1 %v5198_v59  ;;  %5365 = vmatpush1.msra.mxu0 %v5311_v8  ;;  %v5585_v2 = vunpack.c.h.bf16 %v5540_v39  ;;  %v5584_v4 = vunpack.c.l.bf16 %v5540_v39  ;;  %v5538_v8 = vld [vmem:[%s8407_s16 + $0x50] sm:$0xff] }
 0x69a   : > { %5243 = vmatpush1.msra.mxu1 %v5197_v37  ;;  %5366 = vmatprep.subr.mxu0 %v5310_v11  ;;  %v5413_v59 = vsel %vm4117_vm5, %v5409_v56, %v5411_v57  ;;  %v5541_v37 = vld [vmem:[%s8407_s16 + $0x68] sm:$0xff]  ;;  %v5581_v9 = vunpack.c.h.bf16 %v5538_v8  ;;  %v5580_v28 = vunpack.c.l.bf16 %v5538_v8  ;;  %v5555_v57 = vld [vmem:[%s8407_s16 + $0xd8] sm:$0xff]  ;;  %v5548_v8 = vld [vmem:[%s8407_s16 + $0xa0] sm:$0xff] }
 0x69b   : > { %5244 = vmatprep.subr.mxu1 %v5196_v62  ;;  %5367 = vmatpush1.msra.mxu0 %v5309_v16  ;;  %v5589_v62 = vunpack.c.h.bf16 %v5542_v60  ;;  %v5587_v63 = vunpack.c.h.bf16 %v5541_v37  ;;  %v5536_v16 = vld [vmem:[%s8407_s16 + $0x40] sm:$0xff] }
 0x69c   : > { %5245 = vmatpush1.msra.mxu1 %v5195_v0  ;;  %5400 = vmatprep.mubr.f32.mxu0 %v8078_v10  ;;  %v5586_v0 = vunpack.c.l.bf16 %v5541_v37  ;;  %v5577_v15 = vunpack.c.h.bf16 %v5536_v16  ;;  %v5576_v17 = vunpack.c.l.bf16 %v5536_v16  ;;  %v5552_v60 = vld [vmem:[%s8407_s16 + $0xc0] sm:$0xff] }
 0x69d   : > { %5246 = vmatprep.subr.mxu1 %v5194_v5  ;;  %6265 = vmatmul.mubr.msk.f32.vlgmr.msra.gmra.mxu0 %vm4155_vm6, %v5295_v14  ;;  %v5583_v5 = vunpack.c.h.bf16 %v5539_v1  ;;  %v5609_v39 = vunpack.c.h.bf16 %v5552_v60 }
 0x69e   : > { %5247 = vmatpush1.msra.mxu1 %v5193_v6  ;;  %5624 = vmatprep.subr.mxu0 %v5591_v45  ;;  %v5582_v6 = vunpack.c.l.bf16 %v5539_v1  ;;  %v5611_v45 = vunpack.c.h.bf16 %v5553_v49 }
 0x69f   : > { %5248 = vmatprep.subr.mxu1 %v5192_v43  ;;  %5625 = vmatpush1.msra.mxu0 %v5590_v34  ;;  %v5537_v43 = vld [vmem:[%s8407_s16 + $0x48] sm:$0xff] }
 0x6a0   : > { %5249 = vmatpush1.msra.mxu1 %v5191_v13  ;;  %5626 = vmatprep.subr.mxu0 %v5589_v62  ;;  %v5579_v11 = vunpack.c.h.bf16 %v5537_v43  ;;  %v5578_v13 = vunpack.c.l.bf16 %v5537_v43  ;;  %v5610_v62 = vunpack.c.l.bf16 %v5553_v49  ;;  %v5547_v43 = vld [vmem:[%s8407_s16 + $0x98] sm:$0xff] }
 0x6a1   : > { %6252 = vmatmul.mubr.msk.f32.vlgmr.msra.gmra.mxu1 %vm4155_vm6, %v5177_v20  ;;  %5462 = vmatprep.subr.mxu1 %v5450_v32  ;;  %v5575_v32 = vunpack.c.h.bf16 %v5535_v18  ;;  %v5574_v20 = vunpack.c.l.bf16 %v5535_v18  ;;  %v5599_v16 = vunpack.c.h.bf16 %v5547_v43 }
 0x6a2   : > { %5463 = vmatpush1.msra.mxu1 %v5449_v21  ;;  %5518 = vmatprep.mubr.f32.mxu1 %v8078_v10  ;;  %v5436_v10 = vunpack.c.h.bf16 %v6270_v38  ;;  %v5534_v21 = vld [vmem:[%s8407_s16 + $0x30] sm:$0xff] }
 0x6a3   : > { %5464 = vmatprep.subr.mxu1 %v5448_v7  ;;  %5627 = vmatpush1.msra.mxu0 %v5588_v61  ;;  %v5532_v7 = vld [vmem:[%s8407_s16 + $0x20] sm:$0xff]  ;;  %v5572_v14 = vunpack.c.l.bf16 %v5534_v21  ;;  %v5551_v61 = vld [vmem:[%s8407_s16 + $0xb8] sm:$0xff] }
 0x6a4   : > { %5465 = vmatpush1.msra.mxu1 %v5447_v23  ;;  %5628 = vmatprep.subr.mxu0 %v5587_v63  ;;  %v5573_v23 = vunpack.c.h.bf16 %v5534_v21  ;;  %v5569_v27 = vunpack.c.h.bf16 %v5532_v7  ;;  %v5608_v63 = vunpack.c.l.bf16 %v5552_v60  ;;  %v5607_v1 = vunpack.c.h.bf16 %v5551_v61 }
 0x6a5   : > { %5466 = vmatprep.subr.mxu1 %v5446_v25  ;;  %5629 = vmatpush1.msra.mxu0 %v5586_v0  ;;  %v5570_v25 = vunpack.c.l.bf16 %v5533_v47  ;;  %v5550_v0 = vld [vmem:[%s8407_s16 + $0xb0] sm:$0xff] }
 0x6a6   : > { %5467 = vmatpush1.msra.mxu1 %v5445_v26  ;;  %5630 = vmatprep.subr.mxu0 %v5585_v2  ;;  %v5531_v26 = vld [vmem:[%s8407_s16 + $0x18] sm:$0xff]  ;;  %v5606_v2 = vunpack.c.l.bf16 %v5551_v61 }
 0x6a7   : > { %5468 = vmatprep.subr.mxu1 %v5444_v22  ;;  %5631 = vmatpush1.msra.mxu0 %v5584_v4  ;;  %v5568_v22 = vunpack.c.l.bf16 %v5532_v7  ;;  %v5567_v30 = vunpack.c.h.bf16 %v5531_v26  ;;  %v5549_v4 = vld [vmem:[%s8407_s16 + $0xa8] sm:$0xff]  ;;  %v5544_v7 = vld [vmem:[%s8407_s16 + $0x80] sm:$0xff] }
 0x6a8   : > { %5469 = vmatpush1.msra.mxu1 %v5443_v29  ;;  %5632 = vmatprep.subr.mxu0 %v5583_v5  ;;  %v5530_v29 = vld [vmem:[%s8407_s16 + $0x10] sm:$0xff]  ;;  %v5605_v5 = vunpack.c.h.bf16 %v5550_v0 }
 0x6a9   : > { %5470 = vmatprep.subr.mxu1 %v5442_v31  ;;  %5633 = vmatpush1.msra.mxu0 %v5582_v6  ;;  %v5566_v31 = vunpack.c.l.bf16 %v5531_v26  ;;  %v5565_v35 = vunpack.c.h.bf16 %v5530_v29  ;;  %v5604_v6 = vunpack.c.l.bf16 %v5550_v0 }
 0x6aa   : > { %5471 = vmatpush1.msra.mxu1 %v5441_v33  ;;  %5634 = vmatprep.subr.mxu0 %v5581_v9  ;;  %v5529_v33 = vld [vmem:[%s8407_s16 + $0x8] sm:$0xff]  ;;  %v5603_v9 = vunpack.c.h.bf16 %v5549_v4 }
 0x6ab   : > { %5472 = vmatprep.subr.mxu1 %v5440_v12  ;;  %5635 = vmatpush1.msra.mxu0 %v5580_v28  ;;  %v5564_v12 = vunpack.c.l.bf16 %v5530_v29  ;;  %v5563_v38 = vunpack.c.h.bf16 %v5529_v33  ;;  %v5602_v28 = vunpack.c.l.bf16 %v5549_v4 }
 0x6ac   : > { %5473 = vmatpush1.msra.mxu1 %v5439_v36  ;;  %5636 = vmatprep.subr.mxu0 %v5579_v11  ;;  %v5528_v36 = vld [vmem:[%s8407_s16] sm:$0xff]  ;;  %v5601_v11 = vunpack.c.h.bf16 %v5548_v8 }
 0x6ad   : > { %5474 = vmatprep.subr.mxu1 %v5438_v40  ;;  %5637 = vmatpush1.msra.mxu0 %v5578_v13  ;;  %v5562_v40 = vunpack.c.l.bf16 %v5529_v33  ;;  %v5561_v42 = vunpack.c.h.bf16 %v5528_v36  ;;  %v5600_v13 = vunpack.c.l.bf16 %v5548_v8 }
 0x6ae   : > { %5475 = vmatpush1.msra.mxu1 %v5437_v41  ;;  %5638 = vmatprep.subr.mxu0 %v5577_v15  ;;  %v5559_v41 = vld [vmem:[%s8407_s16 + $0xf8] sm:$0xff]  ;;  %v5598_v15 = vunpack.c.l.bf16 %v5547_v43 }
 0x6af   : > { %5476 = vmatprep.subr.mxu1 %v5436_v10  ;;  %5639 = vmatpush1.msra.mxu0 %v5576_v17  ;;  %v5560_v10 = vunpack.c.l.bf16 %v5528_v36  ;;  %v5622_v46 = vunpack.c.l.bf16 %v5559_v41  ;;  %v5546_v17 = vld [vmem:[%s8407_s16 + $0x90] sm:$0xff] }
 0x6b0   : > { %5477 = vmatpush1.msra.mxu1 %v5435_v44  ;;  %5640 = vmatprep.subr.mxu0 %v5575_v32  ;;  %v5623_v44 = vunpack.c.h.bf16 %v5559_v41  ;;  %v5597_v18 = vunpack.c.h.bf16 %v5546_v17  ;;  %v5596_v32 = vunpack.c.l.bf16 %v5546_v17  ;;  %v8079_v17 = vmov 1983009808  }
 0x6b1   : > { %5478 = vmatprep.subr.mxu1 %v5434_v48  ;;  %5641 = vmatpush1.msra.mxu0 %v5574_v20  ;;  %v5558_v48 = vld [vmem:[%s8407_s16 + $0xf0] sm:$0xff]  ;;  %v5545_v20 = vld [vmem:[%s8407_s16 + $0x88] sm:$0xff] }
 0x6b2   : > { %5479 = vmatpush1.msra.mxu1 %v5433_v50  ;;  %5642 = vmatprep.subr.mxu0 %v5573_v23  ;;  %v5621_v50 = vunpack.c.h.bf16 %v5558_v48  ;;  %v5620_v19 = vunpack.c.l.bf16 %v5558_v48  ;;  %v5595_v21 = vunpack.c.h.bf16 %v5545_v20  ;;  %v5594_v47 = vunpack.c.l.bf16 %v5545_v20 }
 0x6b3   : > { %5480 = vmatprep.subr.mxu1 %v5432_v3  ;;  %5643 = vmatpush1.msra.mxu0 %v5572_v14  ;;  %v5557_v3 = vld [vmem:[%s8407_s16 + $0xe8] sm:$0xff]  ;;  %v5593_v14 = vunpack.c.h.bf16 %v5544_v7  ;;  %v5592_v23 = vunpack.c.l.bf16 %v5544_v7 }
 0x6b4   : > { %5481 = vmatpush1.msra.mxu1 %v5431_v52  ;;  %5644 = vmatprep.subr.mxu0 %v5571_v24  ;;  %v5619_v52 = vunpack.c.h.bf16 %v5557_v3  ;;  %v5618_v53 = vunpack.c.l.bf16 %v5557_v3  ;;  %v4102_v24 = vlaneseq }
 0x6b5   : > { %5482 = vmatprep.subr.mxu1 %v5430_v54  ;;  %5645 = vmatpush1.msra.mxu0 %v5570_v25  ;;  %v5556_v54 = vld [vmem:[%s8407_s16 + $0xe0] sm:$0xff] }
 0x6b6   : > { %5483 = vmatpush1.msra.mxu1 %v5429_v55  ;;  %5646 = vmatprep.subr.mxu0 %v5569_v27  ;;  %v5617_v55 = vunpack.c.h.bf16 %v5556_v54  ;;  %v5616_v56 = vunpack.c.l.bf16 %v5556_v54  ;;  %v8961_v25 = vshrl.u32 %v4102_v24, 7 }
 0x6b7   : > { %5484 = vmatprep.subr.mxu1 %v5428_v51  ;;  %5647 = vmatpush1.msra.mxu0 %v5568_v22  ;;  %v5615_v51 = vunpack.c.h.bf16 %v5555_v57  ;;  %v4100_v22 = vld [vmem:[%s8405_s29] sm:$0x3] }
 0x6b8   : > { %5485 = vmatpush1.msra.mxu1 %v5427_v58  ;;  %5648 = vmatprep.subr.mxu0 %v5567_v30  ;;  %v5614_v58 = vunpack.c.l.bf16 %v5555_v57  ;;  %v4108_v27 = vsub.s32 1, %v8961_v25  ;;  %v4104_v29 = vsub.s32 0, %v8961_v25 }
 0x6b9   : > { %6278 = vmatmul.mubr.msk.f32.vlgmr.msra.gmra.mxu1 %vm4155_vm6, %v5413_v59  ;;  %5649 = vmatpush1.msra.mxu0 %v5566_v31  ;;  %v5554_v59 = vld [vmem:[%s8407_s16 + $0xd0] sm:$0xff]  ;;  %s9185_s16 = sld [smem:[#allocation41_spill]] (!%p6279_p13) }
 0x6ba   : > { %5650 = vmatprep.subr.mxu0 %v5565_v35  ;;  %v5612_v37 = vunpack.c.l.bf16 %v5554_v59  ;;  %v5613_v34 = vunpack.c.h.bf16 %v5554_v59  ;;  %v4109_v33 = vrot.slane %v4100_v22, %v4108_v27  ;;  %v4105_v35 = vrot.slane %v4100_v22, %v4104_v29 }
 0x6bb   : > { %5651 = vmatpush1.msra.mxu0 %v5564_v12 }
 0x6bc   : > { %5652 = vmatprep.subr.mxu0 %v5563_v38 }
 0x6bd   : > { %5653 = vmatpush1.msra.mxu0 %v5562_v40 }
 0x6be   : > { %5654 = vmatprep.subr.mxu0 %v5561_v42 }
 0x6bf   : > { %5655 = vmatpush1.msra.mxu0 %v5560_v10 }
 0x6c0   : > { %5656 = vmatprep.subr.mxu0 %v5623_v44 }
 0x6c1   : > { %5657 = vmatpush2.msra.mxu0 %v5622_v46 }
 0x6c2   : > { %5658 = vmatprep.subr.mxu0 %v5621_v50 }
 0x6c3   : > { %5659 = vmatpush2.msra.mxu0 %v5620_v19 }
 0x6c4   : > { %5660 = vmatprep.subr.mxu0 %v5619_v52 }
 0x6c5   : > { %5661 = vmatpush2.msra.mxu0 %v5618_v53 }
 0x6c6   : > { %5662 = vmatprep.subr.mxu0 %v5617_v55 }
 0x6c7   : > { %5663 = vmatpush2.msra.mxu0 %v5616_v56 }
 0x6c8   : > { %5664 = vmatprep.subr.mxu0 %v5615_v51 }
 0x6c9   : > { %5665 = vmatpush2.msra.mxu0 %v5614_v58 }
 0x6ca   : > { %5666 = vmatprep.subr.mxu0 %v5613_v34 }
 0x6cb   : > { %5667 = vmatpush2.msra.mxu0 %v5612_v37 }
 0x6cc   : > { %5668 = vmatprep.subr.mxu0 %v5611_v45 }
 0x6cd   : > { %5669 = vmatpush2.msra.mxu0 %v5610_v62 }
 0x6ce   : > { %5670 = vmatprep.subr.mxu0 %v5609_v39 }
 0x6cf   : > { %5671 = vmatpush2.msra.mxu0 %v5608_v63 }
 0x6d0   : > { %5672 = vmatprep.subr.mxu0 %v5607_v1 }
 0x6d1   : > { %5673 = vmatpush2.msra.mxu0 %v5606_v2 }
 0x6d2   : > { %5674 = vmatprep.subr.mxu0 %v5605_v5 }
 0x6d3   : > { %5675 = vmatpush2.msra.mxu0 %v5604_v6 }
 0x6d4   : > { %5676 = vmatprep.subr.mxu0 %v5603_v9 }
 0x6d5   : > { %5677 = vmatpush2.msra.mxu0 %v5602_v28 }
 0x6d6   : > { %5678 = vmatprep.subr.mxu0 %v5601_v11 }
 0x6d7   : > { %5679 = vmatpush2.msra.mxu0 %v5600_v13 }
 0x6d8   : > { %5680 = vmatprep.subr.mxu0 %v5599_v16 }
 0x6d9   : > { %5681 = vmatpush2.msra.mxu0 %v5598_v15 }
 0x6da   : > { %5682 = vmatprep.subr.mxu0 %v5597_v18  ;;  %v5699_v18 = vunpack.c.l.s4 %v8079_v17 }
 0x6db   : > { %5683 = vmatpush2.msra.mxu0 %v5596_v32 }
 0x6dc   : > { %5684 = vmatprep.subr.mxu0 %v5595_v21  ;;  %v5700_v32 = vunpack.c.0.s8 %v5699_v18 }
 0x6dd   : > { %5685 = vmatpush2.msra.mxu0 %v5594_v47 }
 0x6de   : > { %5686 = vmatprep.subr.mxu0 %v5593_v14  ;;  %v5703_v21 = vsub.s32 %v5700_v32, %v8961_v25  ;;  %v5527_v14 = vld [vmem:[#allocation4] sm:$0xf] }
 0x6df   : > { %5687 = vmatpush2.msra.mxu0 %v5592_v23 }
 0x6e9   : > { %v4225_v26 = vpop.f32.mrf.mxu1 }
 0x6ea   : > { %v4230_v40 = vadd.f32 %v4225_v26, %v4105_v35 }
 0x6eb   : > { %v4227_v30 = vpop.f32.mrf.mxu1 }
 0x6ec   : > { %v4231_v38 = vadd.f32 %v4227_v30, %v4109_v33 }
 0x6ed   : > { %v4460_v36 = vpop.f32.mrf.mxu0 }
 0x6ef   : > { %v4462_v44 = vpop.f32.mrf.mxu0 }
 0x701   : > { %v4342_v31 = vpop.f32.mrf.mxu1 }
 0x702   : > { %v4347_v10 = vadd.f32 %v4342_v31, %v4230_v40 }
 0x703   : > { %v4344_v12 = vpop.f32.mrf.mxu1 }
 0x704   : > { %v4348_v42 = vadd.f32 %v4344_v12, %v4231_v38  ;;  %v4465_v19 = vadd.f32 %v4460_v36, %v4347_v10 }
 0x706   : > { %v4466_v50 = vadd.f32 %v4462_v44, %v4348_v42 }
 0x709   : > { %v4696_v48 = vpop.f32.mrf.mxu0 }
 0x70b   : > { %v4698_v54 = vpop.f32.mrf.mxu0 }
 0x719   : > { %v4578_v41 = vpop.f32.mrf.mxu1 }
 0x71a   : > { %v4583_v53 = vadd.f32 %v4578_v41, %v4465_v19 }
 0x71b   : > { %v4580_v46 = vpop.f32.mrf.mxu1 }
 0x71c   : > { %v4584_v52 = vadd.f32 %v4580_v46, %v4466_v50  ;;  %v4701_v51 = vadd.f32 %v4696_v48, %v4583_v53 }
 0x71e   : > { %v4702_v57 = vadd.f32 %v4698_v54, %v4584_v52 }
 0x725   : > { %v4932_v56 = vpop.f32.mrf.mxu0 }
 0x727   : > { %v4934_v60 = vpop.f32.mrf.mxu0 }
 0x731   : > { %v4814_v3 = vpop.f32.mrf.mxu1 }
 0x732   : > { %v4819_v49 = vadd.f32 %v4814_v3, %v4701_v51 }
 0x733   : > { %v4816_v55 = vpop.f32.mrf.mxu1 }
 0x734   : > { %v4820_v59 = vadd.f32 %v4816_v55, %v4702_v57  ;;  %v4937_v62 = vadd.f32 %v4932_v56, %v4819_v49 }
 0x736   : > { %v4938_v45 = vadd.f32 %v4934_v60, %v4820_v59 }
 0x741   : > { %v5167_v34 = vpop.f32.mrf.mxu0 }
 0x743   : > { %v5169_v0 = vpop.f32.mrf.mxu0 }
 0x749   : > { %v5050_v58 = vpop.f32.mrf.mxu1 }
 0x74a   : > { %v5055_v63 = vadd.f32 %v5050_v58, %v4937_v62 }
 0x74b   : > { %v5052_v37 = vpop.f32.mrf.mxu1 }
 0x74c   : > { %v5056_v39 = vadd.f32 %v5052_v37, %v4938_v45  ;;  %v5172_v5 = vadd.f32 %v5167_v34, %v5055_v63 }
 0x74e   : > { %v5173_v4 = vadd.f32 %v5169_v0, %v5056_v39 }
 0x75d   : > { %v5402_v2 = vpop.f32.mrf.mxu0 }
 0x75f   : > { %v5404_v9 = vpop.f32.mrf.mxu0 }
 0x761   : > { %v5284_v61 = vpop.f32.mrf.mxu1 }
 0x762   : > { %v5289_v8 = vadd.f32 %v5284_v61, %v5172_v5 }
 0x763   : > { %v5286_v1 = vpop.f32.mrf.mxu1 }
 0x764   : > { %v5290_v6 = vadd.f32 %v5286_v1, %v5173_v4  ;;  %v5407_v11 = vadd.f32 %v5402_v2, %v5289_v8 }
 0x766   : > { %v5408_v43 = vadd.f32 %v5404_v9, %v5290_v6 }
 0x779   : > { %v5520_v28 = vpop.f32.mrf.mxu1 }
 0x77a   : > { %v5525_v15 = vadd.f32 %v5520_v28, %v5407_v11 }
 0x77b   : > { %v5522_v13 = vpop.f32.mrf.mxu1 }
 0x77c   : > { %v5526_v16 = vadd.f32 %v5522_v13, %v5408_v43 }
 0x77e   : > { %5688 = vmatprep.mubr.f32.mxu0 %v5526_v16 }
 0x77f   : > { %5689 = vmatmul.mubr.f32.vlgmr.msra.gmra.mxu0 %v5525_v15 }
 0x83f   : > { %v5690_v20 = vpop.f32.mrf.mxu0 }
 0x841   : > { %v5692_v47 = vpop.f32.mrf.mxu0 }
 0x842   : > { %v5697_v7 = vcombine.low %v5690_v20, %v5692_v47 }
 0x844   : > { %v5704_v23 = vrot.slane %v5697_v7, %v5703_v21  ;;  %5711 = sbr.rel (%p6279_p13) target bundleno = 2354 (0x932), region = 124 }
 0x846   : > { %v5706_v24 = vadd.f32 %v5704_v23, %v5527_v14 }
 0x848   : > { %5707 = vst [vmem:[#allocation4] sm:$0xf] %v5706_v24 }
 0x849   : > { %v5764_v26 = vld [vmem:[%s9185_s16 + $0xf8] sm:$0xff]  ;;  %v5763_v30 = vld [vmem:[%s9185_s16 + $0xf0] sm:$0xff]  ;;  %v5762_v33 = vld [vmem:[%s9185_s16 + $0xe8] sm:$0xff]  ;;  %vm5853_vm7 = vcmask 74752  }
 0x84a   : > { %v5748_v22 = vld [vmem:[%s9185_s16 + $0x78] sm:$0xff]  ;;  %6703 = vmatprep.subr.mxu0 %v5764_v26  ;;  %v5747_v31 = vld [vmem:[%s9185_s16 + $0x70] sm:$0xff]  ;;  %v5746_v35 = vld [vmem:[%s9185_s16 + $0x68] sm:$0xff] }
 0x84b   : > { %6704 = vmatpush3.msra.mxu0 %v5748_v22  ;;  %v5761_v12 = vld [vmem:[%s9185_s16 + $0xe0] sm:$0xff]  ;;  %v5760_v38 = vld [vmem:[%s9185_s16 + $0xd8] sm:$0xff]  ;;  %v5759_v41 = vld [vmem:[%s9185_s16 + $0xd0] sm:$0xff] }
 0x84c   : > { %6705 = vmatprep.subr.mxu0 %v5763_v30  ;;  %v5745_v36 = vld [vmem:[%s9185_s16 + $0x60] sm:$0xff]  ;;  %v5744_v40 = vld [vmem:[%s9185_s16 + $0x58] sm:$0xff]  ;;  %v5743_v42 = vld [vmem:[%s9185_s16 + $0x50] sm:$0xff] }
 0x84d   : > { %6706 = vmatpush3.msra.mxu0 %v5747_v31  ;;  %v5758_v10 = vld [vmem:[%s9185_s16 + $0xc8] sm:$0xff]  ;;  %v5713_v46 = vld [vmem:[#allocation19] sm:$0x3]  ;;  %v5756_v52 = vld [vmem:[%s9185_s16 + $0xb8] sm:$0xff] }
 0x84e   : > { %6707 = vmatprep.subr.mxu0 %v5762_v33  ;;  %v5742_v44 = vld [vmem:[%s9185_s16 + $0x48] sm:$0xff]  ;;  %v5757_v48 = vld [vmem:[%s9185_s16 + $0xc0] sm:$0xff]  ;;  %v5718_v50 = vrot.slane %v5713_v46, %v4104_v29  ;;  %v5722_v19 = vrot.slane %v5713_v46, %v4108_v27  ;;  %v5740_v54 = vld [vmem:[%s9185_s16 + $0x38] sm:$0xff] }
 0x84f   : > { %6708 = vmatpush3.msra.mxu0 %v5746_v35  ;;  %v5741_v3 = vld [vmem:[%s9185_s16 + $0x40] sm:$0xff]  ;;  %v5712_v29 = vld [vmem:[#allocation4] sm:$0xf]  ;;  %v5755_v25 = vld [vmem:[%s9185_s16 + $0xb0] sm:$0xff] }
 0x850   : > { %6709 = vmatprep.subr.mxu0 %v5761_v12  ;;  %v5723_v53 = vcombine.low %v5718_v50, %v5722_v19  ;;  %v5739_v55 = vld [vmem:[%s9185_s16 + $0x30] sm:$0xff]  ;;  %v5754_v56 = vld [vmem:[%s9185_s16 + $0xa8] sm:$0xff]  ;;  %v5753_v58 = vld [vmem:[%s9185_s16 + $0xa0] sm:$0xff] }
 0x851   : > { %6710 = vmatpush3.msra.mxu0 %v5745_v36  ;;  %v5738_v51 = vld [vmem:[%s9185_s16 + $0x28] sm:$0xff]  ;;  %v5737_v49 = vld [vmem:[%s9185_s16 + $0x20] sm:$0xff]  ;;  %v5752_v60 = vld [vmem:[%s9185_s16 + $0x98] sm:$0xff] }
 0x852   : > { %6711 = vmatprep.subr.mxu0 %v5760_v38  ;;  %v5730_v27 = vrot.slane %v5723_v53, %v5703_v21  ;;  %v5736_v34 = vld [vmem:[%s9185_s16 + $0x18] sm:$0xff]  ;;  %v5751_v45 = vld [vmem:[%s9185_s16 + $0x90] sm:$0xff]  ;;  %v5750_v61 = vld [vmem:[%s9185_s16 + $0x88] sm:$0xff] }
 0x853   : > { %6712 = vmatpush3.msra.mxu0 %v5744_v40  ;;  %v5735_v62 = vld [vmem:[%s9185_s16 + $0x10] sm:$0xff]  ;;  %v5734_v39 = vld [vmem:[%s9185_s16 + $0x8] sm:$0xff]  ;;  %v5749_v63 = vld [vmem:[%s9185_s16 + $0x80] sm:$0xff] }
 0x854   : > { %6713 = vmatprep.subr.mxu0 %v5759_v41  ;;  %v5732_v57 = vadd.f32 %v5730_v27, %v5712_v29  ;;  %v5733_v0 = vld [vmem:[%s9185_s16] sm:$0xff] }
 0x855   : > { %6714 = vmatpush3.msra.mxu0 %v5743_v42  ;;  %v6280_v2 = vld [vmem:[#allocation20] ss:$0 sm:$0xff] }
 0x856   : > { %6715 = vmatprep.subr.mxu0 %v5758_v10  ;;  %v5779_v59 = vrot.slane %v5732_v57, %v5703_v21 }
 0x857   : > { %6716 = vmatpush3.msra.mxu0 %v5742_v44 }
 0x858   : > { %6717 = vmatprep.subr.mxu0 %v5757_v48  ;;  %v5780_v37 = vcombine.high %v5779_v59, %v5779_v59 }
 0x859   : > { %6718 = vmatpush3.msra.mxu0 %v5741_v3 }
 0x85a   : > { %6719 = vmatprep.subr.mxu0 %v5756_v52  ;;  %5847 = vmatprep.mubr.f32.mxu0 %v5780_v37 }
 0x85b   : > { %6720 = vmatpush3.msra.mxu0 %v5740_v54 }
 0x85c   : > { %6721 = vmatprep.subr.mxu0 %v5755_v25 }
 0x85d   : > { %6722 = vmatpush3.msra.mxu0 %v5739_v55 }
 0x85e   : > { %6723 = vmatprep.subr.mxu0 %v5754_v56 }
 0x85f   : > { %6724 = vmatpush3.msra.mxu0 %v5738_v51 }
 0x860   : > { %6725 = vmatprep.subr.mxu0 %v5753_v58 }
 0x861   : > { %6726 = vmatpush3.msra.mxu0 %v5737_v49 }
 0x862   : > { %6727 = vmatprep.subr.mxu0 %v5752_v60 }
 0x863   : > { %6728 = vmatpush3.msra.mxu0 %v5736_v34 }
 0x864   : > { %6729 = vmatprep.subr.mxu0 %v5751_v45 }
 0x865   : > { %6730 = vmatpush3.msra.mxu0 %v5735_v62 }
 0x866   : > { %6731 = vmatprep.subr.mxu0 %v5750_v61 }
 0x867   : > { %6732 = vmatpush3.msra.mxu0 %v5734_v39 }
 0x868   : > { %6733 = vmatprep.subr.mxu0 %v5749_v63 }
 0x869   : > { %6734 = vmatpush3.msra.mxu0 %v5733_v0 }
 0x86a   : > { %5848 = vmatmul.mubr.f32.vlgmr.msra.gmra.mxu0 %v5779_v59 }
 0x92a   : > { %v6735_v1 = vpop.f32.mrf.mxu0 }
 0x92c   : > { %v6736_v4 = vpop.f32.mrf.mxu0 }
 0x92d   : > { %v6737_v5 = vadd.f32 %v6736_v4, %v6735_v1 }
 0x92f   : > { %v5850_v6 = vadd.f32 %v6737_v5, %v6280_v2 }
 0x931   : > { %5854 = vst.msk [vmem:[#allocation21] sm:$0x3] %vm5853_vm7, %v5850_v6 }
 0x932 PF: > { %p7626_p6 = scmp.eq.s32.totalorder %s8172_s14, 3  ;;  %s8080_s3 = smov [#allocation21]  }
 0x933   : > { %s5862_s24 = sshll.u32 %s8080_s3, 4  ;;  %s5863_s24 = int_to_ptr.vmem [resolvable:$true] %s5862_s24 }
 0x934   : > { %s7972_s30 = scalar_lea.vmem %s5863_s24, 32  ;;  %p7979_p1 = scmp.lt.s32.totalorder %s5863_s24, %s5863_s24 }
 0x935   : > { %p7973_p0 = scmp.ne.s32.totalorder %s5863_s24, %s7972_s30  ;;  %p7980_p4 = scmp.lt.s32.totalorder %s7972_s30, %s7972_s30 }
 0x937   : > { %p7974_p10 = pnand %p7973_p0, %p7626_p6  ;;  %p7981_p8 = por %p7980_p4, %p7979_p1 }
 0x939   : > { %p7975_p12 = pneg %p7974_p10 }
 0x93b   : > { %p7982_p11 = pnand %p7981_p8, %p7975_p12 }
 0x93d   : > { %7985 = shalt.err (!%p7982_p11)
}
 0x93e   : > { %s9186_s18 = sld [smem:[#allocation42_spill]] }
 0x944   : > { %7571 = dma.vmem_to_hbm [thread:$0]  (%p7626_p6), %s5863_s24, 32, %s9186_s18, [#allocation7]  }
 0x945   : > { %8041 = dma.done.wait (%p7626_p6), [#allocation7], 32  }
 0x946   : > { %8043 = vsyncadd (%p7626_p6), [#allocation7], 4294967264 }
 0x947 PF: > { %s9187_s28 = sld [smem:[#allocation32_spill]] }
 0x948   : > { %s9188_s25 = sld [smem:[#allocation30_spill]] }
 0x949   : > { %s9189_s26 = sld [smem:[#allocation31_spill]] }
 0x94a   : > { %s9190_s27 = sld [smem:[#allocation33_spill]] }
 0x94d   : > { %p25_p2 = scmp.ge.s32.totalorder %s9187_s28, 6  }
 0x94f   :  { %27 = sbr.rel (!%p25_p2) target bundleno = 15 (0xf), region = 197 }
 0x954   :  { %5875 = vsyncpa [#allocation6], 1 }
 0x955   :  { %5877 = vsyncpa [#allocation6 + $0x1], 1 }
 0x956   :  { %5878 = vsyncpa [#allocation9], 1 }
 0x957   :  { %5879 = vsyncpa [#allocation12], 1 }
 0x958   :  { %5880 = vsyncpa [#allocation15], 1 }
 0x959   :  { %5881 = vsyncpa [#allocation7], 1 }
 0x95a   :  { %5883 = vsyncpa [#allocation7 + $0x1], 1 }

</bundles_post_ra>
